<compile_context>
chip_gen: v7x
topology: tpu7x:2x2x1
jax: 0.10.0
libtpu: 0.0.40
codegen_flags: <defaults>
</compile_context>

<pallas_src>
import math
import functools

import jax
import jax.numpy as jnp
from jax.experimental import pallas as pl
from jax.experimental.pallas import tpu as pltpu


def _round_up(v, m):
    return (v + m - 1) // m * m


def am_block_kernel(prelu_ref,                      # SMEM (5,) PReLU slopes
                    x_ref, xt_ref, feat_ref,        # rows, transposed rows, feature rows
                    bmat_ref, phase_ref,            # RFF matrix (Din,E) + phase (1,E)
                    w1e_ref, w1f_ref,               # layer-1 split weights (bf16)
                    wstack_ref, bstack_ref,         # layers 2..5 stacked (bf16), biases (5,F)
                    wpfT_ref, wpeT_ref, bpT_ref,    # proj weights pre-transposed (bf16) + bias
                    o_ref):                         # (Din, TM) f32 output block
    x = x_ref[...]                                  # (TM, Din) f32
    xin = x * 110.0 - 0.55

    # --- RFF2 on the VPU --------------------------------------------------------
    # K = Din is tiny, so an MXU dot would waste vmatmul issue slots and lose fp32
    # phase accuracy; 4 broadcast FMAs keep it exact.  sin and cos are produced by a
    # single transcendental pass via the (0 | pi/2) phase constant.
    bm = bmat_ref[...]                              # (Din, E) f32
    p = phase_ref[...]                              # (1, E) -> broadcasts on first add
    for k in range(x.shape[-1]):
        p = p + xin[:, k:k + 1] * bm[k:k + 1, :]
    emb = jnp.sin(p)                                # (TM, E) fp32 == [sin | cos]
    emb_b = emb.astype(jnp.bfloat16)

    # --- tmlp layer 1 (concat([sin,cos, gained feature]) via weight row-split;
    #     tanh(gain) already folded into w1f on the host) ------------------------
    bst = bstack_ref[...]                           # (5, F) fp32
    feat_b = feat_ref[...].astype(jnp.bfloat16)
    h = (jnp.dot(emb_b, w1e_ref[...], preferred_element_type=jnp.float32)
         + jnp.dot(feat_b, w1f_ref[...], preferred_element_type=jnp.float32)
         + bst[0:1, :])
    h = jnp.where(h > 0, h, prelu_ref[0] * h)

    # --- tmlp layers 2..5 (stacked weights, static unroll) ----------------------
    for j in range(4):
        h = (jnp.dot(h.astype(jnp.bfloat16), wstack_ref[j],
                     preferred_element_type=jnp.float32)
             + bst[j + 1:j + 2, :])
        h = jnp.where(h > 0, h, prelu_ref[j + 1] * h)

    # --- proj + GLU + residual, lane-dense ---------------------------------------
    # With Din=4 a row-major tail runs at 4-8 of 128 lanes and needs masked stores.
    # Transpose h / emb once (XLU) and compute zT of shape (2*Din, TM) so that
    # sigmoid / GLU / residual / store all run on full-lane vregs and the output
    # block (Din, TM) is written with dense stores.
    hT = h.T.astype(jnp.bfloat16)                   # (F, TM)
    embT = emb.T.astype(jnp.bfloat16)               # (E, TM)
    zT = (jnp.dot(wpfT_ref[...], hT, preferred_element_type=jnp.float32)
          + jnp.dot(wpeT_ref[...], embT, preferred_element_type=jnp.float32)
          + bpT_ref[...])                           # (2*Din, TM) fp32
    d = x.shape[-1]
    gluT = zT[:d, :] * jax.nn.sigmoid(zT[d:, :])    # (Din, TM)
    o_ref[...] = xt_ref[...] * (1.0 + gluT)         # residual gate, lane-dense store


def init_params(key, input_dim, embed_dim, num_features):
    half = embed_dim // 2
    feature_dim = embed_dim * num_features
    concat_size = feature_dim + embed_dim
    keys = jax.random.split(key, 16)

    params = {}
    # RFF2 buffers/params (matches torch init).
    params["rff_N"] = jnp.ones((input_dim, half), jnp.float32) / input_dim / half
    params["rff_e"] = jnp.float32(1.0)
    # gain_in ~ randn(num_features)/2
    params["gain_in"] = jax.random.normal(keys[0], (num_features,), jnp.float32) * 0.5

    # tmlp: 5 x (Linear + PReLU)
    dims = [concat_size] + 5 * [feature_dim]
    Ws, bs = [], []
    for i in range(5):
        kw, kb = jax.random.split(keys[1 + i])
        bound = 1.0 / math.sqrt(dims[i])
        Ws.append(jax.random.uniform(kw, (dims[i], dims[i + 1]), jnp.float32, -bound, bound))
        bs.append(jax.random.uniform(kb, (dims[i + 1],), jnp.float32, -bound, bound))
    params["Ws"] = Ws
    params["bs"] = bs
    params["prelu"] = jnp.full((5,), 0.25, jnp.float32)     # PReLU default init

    # proj: Linear(concat_size, 2*input_dim)
    bound = 1.0 / math.sqrt(concat_size)
    params["Wp"] = jax.random.uniform(keys[7], (concat_size, 2 * input_dim),
                                      jnp.float32, -bound, bound)
    params["bp"] = jax.random.uniform(keys[8], (2 * input_dim,), jnp.float32, -bound, bound)
    return params


def pack_params(params, input_dim, embed_dim, num_features):
    """One-time parameter glue (folds, casts, stacks, transposes) done OUTSIDE the
    jitted forward so it is not re-executed per call."""
    del input_dim
    half = embed_dim // 2
    feature_dim = embed_dim * num_features

    bmat = (2.0 * jnp.pi) * params["rff_e"] * params["rff_N"]            # (Din, half)
    bmat2 = jnp.concatenate([bmat, bmat], axis=-1)                       # (Din, E): sin|cos
    # cos(t) == sin(t + pi/2): one transcendental instead of sin+cos+select.
    phase = jnp.concatenate([jnp.zeros((half,), jnp.float32),
                             jnp.full((half,), 0.5 * jnp.pi, jnp.float32)])[None, :]

    gain_vec = jnp.repeat(jnp.tanh(params["gain_in"]), embed_dim)        # (F,)
    W1 = params["Ws"][0]
    w1e = W1[:embed_dim].astype(jnp.bfloat16)                            # (E, F)
    w1f = (gain_vec[:, None] * W1[embed_dim:]).astype(jnp.bfloat16)      # (F, F), gain folded

    wstack = jnp.stack(params["Ws"][1:5]).astype(jnp.bfloat16)           # (4, F, F)
    bstack = jnp.stack(params["bs"])                                     # (5, F) fp32

    Wp = params["Wp"]
    wpfT = Wp[:feature_dim].T.astype(jnp.bfloat16)                       # (2*Din, F)
    wpeT = Wp[feature_dim:].T.astype(jnp.bfloat16)                       # (2*Din, E)
    bpT = params["bp"][:, None]                                          # (2*Din, 1) fp32

    return dict(prelu=params["prelu"], bmat2=bmat2, phase=phase,
                w1e=w1e, w1f=w1f, wstack=wstack, bstack=bstack,
                wpfT=wpfT, wpeT=wpeT, bpT=bpT)


def am_block_forward(inp, feature, slider, packed, *, input_dim, embed_dim,
                     num_features, tm=1024):
    """AMBlock forward as one fused Pallas kernel.  `slider` is accepted for signature
    parity with AMBlock.forward but unused (as in the PyTorch module)."""
    del slider
    feature_dim = embed_dim * num_features
    B, T, _ = inp.shape
    N = B * T

    # Row tile: multiple of 128 so the transposed (Din, tm) output block is lane-dense;
    # large (default 1024) to amortize the ~0.35us/step overhead; capped so realistic
    # workloads get >= 2 grid steps (feeds both v7x TensorCores).
    tm_eff = max(128, min(tm, _round_up(pl.cdiv(N, 2), 128)))
    grid_n = pl.cdiv(N, tm_eff)
    np_cols = grid_n * tm_eff            # output padded to whole tiles; inputs NOT padded

    x2d = inp.reshape(N, input_dim)
    xt2d = x2d.T                         # (Din, N) for the lane-dense residual/store
    feat2d = feature.reshape(N, feature_dim)
    # No jnp.pad of inputs (that would cost an extra HBM round trip of `feature`): the
    # edge tile reads past N and produces garbage rows/columns that are sliced off
    # below.  Safe because the kernel has no cross-row reductions.

    def rowspec(d):
        return pl.BlockSpec((tm_eff, d), lambda i: (i, 0))

    def fullspec(shape):
        return pl.BlockSpec(shape, lambda i: (0,) * len(shape))

    in_specs = [
        pl.BlockSpec(memory_space=pltpu.MemorySpace.SMEM),       # prelu slopes
        rowspec(input_dim),                                      # x rows
        pl.BlockSpec((input_dim, tm_eff), lambda i: (0, i)),     # x transposed
        rowspec(feature_dim),                                    # feature rows
        fullspec((input_dim, embed_dim)),                        # duplicated RFF matrix
        fullspec((1, embed_dim)),                                # phase constant (0 | pi/2)
        fullspec((embed_dim, feature_dim)),                      # w1e
        fullspec((feature_dim, feature_dim)),                    # w1f (gain folded)
        fullspec((4, feature_dim, feature_dim)),                 # W2..W5 stacked
        fullspec((5, feature_dim)),                              # b1..b5 stacked
        fullspec((2 * input_dim, feature_dim)),                  # projT: tmlp part
        fullspec((2 * input_dim, embed_dim)),                    # projT: emb part
        fullspec((2 * input_dim, 1)),                            # proj bias (column)
    ]

    out = pl.pallas_call(
        am_block_kernel,
        out_shape=jax.ShapeDtypeStruct((input_dim, np_cols), jnp.float32),
        grid=(grid_n,),
        in_specs=in_specs,
        out_specs=pl.BlockSpec((input_dim, tm_eff), lambda i: (0, i)),
        compiler_params=pltpu.CompilerParams(
            dimension_semantics=("parallel",),
            # ~2-3 MiB actually needed at F=128; 32 MiB leaves headroom on every
            # generation and stays within v7x's 64 MiB physical VMEM.
            vmem_limit_bytes=32 * 1024 * 1024),
    )(packed["prelu"], x2d, xt2d, feat2d, packed["bmat2"], packed["phase"],
      packed["w1e"], packed["w1f"], packed["wstack"], packed["bstack"],
      packed["wpfT"], packed["wpeT"], packed["bpT"])

    return out[:, :N].T.reshape(B, T, input_dim)


def ref_forward(inp, feature, slider, params, input_dim, embed_dim, num_features):
    """Plain-JAX fp32 reference mirroring the PyTorch forward, for correctness check."""
    del slider
    bmat = (2.0 * jnp.pi) * params["rff_e"] * params["rff_N"]
    xin = inp * 110.0 - 0.55
    p = xin @ bmat
    emb = jnp.concatenate([jnp.sin(p), jnp.cos(p)], axis=-1)
    g = jnp.tanh(params["gain_in"])
    feat_g = feature * jnp.repeat(g, embed_dim)[None, None, :]
    h = jnp.concatenate([emb, feat_g], axis=-1)
    for i in range(5):
        h = h @ params["Ws"][i] + params["bs"][i]
        a = params["prelu"][i]
        h = jnp.where(h > 0, h, a * h)
    y = jnp.concatenate([h, emb], axis=-1)
    z = y @ params["Wp"] + params["bp"]
    glu = z[..., :input_dim] * jax.nn.sigmoid(z[..., input_dim:])
    return inp * (1.0 + glu)


if __name__ == "__main__":
    # Small shapes consistent with the module.
    B, T = 2, 8
    input_dim, embed_dim, num_features = 4, 32, 4
    feature_dim = embed_dim * num_features

    key = jax.random.PRNGKey(0)
    k_in, k_ft, k_sl, k_pr = jax.random.split(key, 4)
    inp = jax.random.normal(k_in, (B, T, input_dim), jnp.float32) * 0.01
    feature = jax.random.normal(k_ft, (B, T, feature_dim), jnp.float32)
    slider = jax.random.uniform(k_sl, (B, T, 1), jnp.float32)   # unused by the forward pass

    params = init_params(k_pr, input_dim, embed_dim, num_features)
    packed = pack_params(params, input_dim, embed_dim, num_features)   # one-time glue

    forward = jax.jit(functools.partial(am_block_forward,
                                        input_dim=input_dim,
                                        embed_dim=embed_dim,
                                        num_features=num_features))
    out = jax.block_until_ready(forward(inp, feature, slider, packed))

    ref = ref_forward(inp, feature, slider, params, input_dim, embed_dim, num_features)
    assert out.shape == (B, T, input_dim)
    # bf16 matmuls (fp32 accumulation) => relaxed tolerance vs the fp32 reference.
    assert jnp.allclose(out, ref, atol=5e-3, rtol=5e-2), "mismatch vs reference"

    print("KERNEL_OK")
</pallas_src>

<mosaic_0001>
module attributes {stable_mosaic.version = 11 : i64} {
  func.func @am_block_kernel(%arg0: i32, %arg1: memref<5xf32, #tpu.memory_space<smem>>, %arg2: memref<128x4xf32, #tpu.memory_space<vmem>>, %arg3: memref<4x128xf32, #tpu.memory_space<vmem>>, %arg4: memref<128x128xf32, #tpu.memory_space<vmem>>, %arg5: memref<4x32xf32, #tpu.memory_space<vmem>>, %arg6: memref<1x32xf32, #tpu.memory_space<vmem>>, %arg7: memref<32x128xbf16, #tpu.memory_space<vmem>>, %arg8: memref<128x128xbf16, #tpu.memory_space<vmem>>, %arg9: memref<4x128x128xbf16, #tpu.memory_space<vmem>>, %arg10: memref<5x128xf32, #tpu.memory_space<vmem>>, %arg11: memref<8x128xbf16, #tpu.memory_space<vmem>>, %arg12: memref<8x32xbf16, #tpu.memory_space<vmem>>, %arg13: memref<8x1xf32, #tpu.memory_space<vmem>>, %arg14: memref<4x128xf32, #tpu.memory_space<vmem>>) attributes {dimension_semantics = [#tpu.dimension_semantics<parallel>], iteration_bounds = array<i64: 1>, scalar_prefetch = 0 : i64, scratch_operands = 0 : i64, tpu.core_type = #tpu.core_type<tc>, window_params = [{transform_indices = @transform_0, window_bounds = array<i64: 5>}, {transform_indices = @transform_1, window_bounds = array<i64: 128, 4>}, {transform_indices = @transform_2, window_bounds = array<i64: 4, 128>}, {transform_indices = @transform_3, window_bounds = array<i64: 128, 128>}, {pipeline_mode = #tpu.pipeline_mode<synchronous>, transform_indices = @transform_4, window_bounds = array<i64: 4, 32>}, {pipeline_mode = #tpu.pipeline_mode<synchronous>, transform_indices = @transform_5, window_bounds = array<i64: 1, 32>}, {pipeline_mode = #tpu.pipeline_mode<synchronous>, transform_indices = @transform_6, window_bounds = array<i64: 32, 128>}, {pipeline_mode = #tpu.pipeline_mode<synchronous>, transform_indices = @transform_7, window_bounds = array<i64: 128, 128>}, {pipeline_mode = #tpu.pipeline_mode<synchronous>, transform_indices = @transform_8, window_bounds = array<i64: 4, 128, 128>}, {pipeline_mode = #tpu.pipeline_mode<synchronous>, transform_indices = @transform_9, window_bounds = array<i64: 5, 128>}, {pipeline_mode = #tpu.pipeline_mode<synchronous>, transform_indices = @transform_10, window_bounds = array<i64: 8, 128>}, {pipeline_mode = #tpu.pipeline_mode<synchronous>, transform_indices = @transform_11, window_bounds = array<i64: 8, 32>}, {pipeline_mode = #tpu.pipeline_mode<synchronous>, transform_indices = @transform_12, window_bounds = array<i64: 8, 1>}, {transform_indices = @transform_13, window_bounds = array<i64: 4, 128>}]} {
    %c0 = arith.constant 0 : index
    %c0_0 = arith.constant 0 : index
    %0 = vector.load %arg2[%c0, %c0_0] : memref<128x4xf32, #tpu.memory_space<vmem>>, vector<128x4xf32>
    %cst = arith.constant 1.100000e+02 : f32
    %1 = vector.broadcast %cst : f32 to vector<128x4xf32>
    %2 = arith.mulf %0, %1 : vector<128x4xf32>
    %cst_1 = arith.constant 5.500000e-01 : f32
    %3 = vector.broadcast %cst_1 : f32 to vector<128x4xf32>
    %4 = arith.subf %2, %3 : vector<128x4xf32>
    %c0_2 = arith.constant 0 : index
    %c0_3 = arith.constant 0 : index
    %5 = vector.load %arg5[%c0_2, %c0_3] : memref<4x32xf32, #tpu.memory_space<vmem>>, vector<4x32xf32>
    %c0_4 = arith.constant 0 : index
    %c0_5 = arith.constant 0 : index
    %6 = vector.load %arg6[%c0_4, %c0_5] : memref<1x32xf32, #tpu.memory_space<vmem>>, vector<1x32xf32>
    %7 = vector.extract_strided_slice %4 {offsets = [0, 0], sizes = [128, 1], strides = [1, 1]} : vector<128x4xf32> to vector<128x1xf32>
    %8 = vector.extract_strided_slice %5 {offsets = [0, 0], sizes = [1, 32], strides = [1, 1]} : vector<4x32xf32> to vector<1x32xf32>
    %9 = vector.broadcast %7 : vector<128x1xf32> to vector<128x32xf32>
    %10 = vector.broadcast %8 : vector<1x32xf32> to vector<128x32xf32>
    %11 = arith.mulf %9, %10 : vector<128x32xf32>
    %12 = vector.broadcast %6 : vector<1x32xf32> to vector<128x32xf32>
    %13 = arith.addf %12, %11 : vector<128x32xf32>
    %14 = vector.extract_strided_slice %4 {offsets = [0, 1], sizes = [128, 1], strides = [1, 1]} : vector<128x4xf32> to vector<128x1xf32>
    %15 = vector.extract_strided_slice %5 {offsets = [1, 0], sizes = [1, 32], strides = [1, 1]} : vector<4x32xf32> to vector<1x32xf32>
    %16 = vector.broadcast %14 : vector<128x1xf32> to vector<128x32xf32>
    %17 = vector.broadcast %15 : vector<1x32xf32> to vector<128x32xf32>
    %18 = arith.mulf %16, %17 : vector<128x32xf32>
    %19 = arith.addf %13, %18 : vector<128x32xf32>
    %20 = vector.extract_strided_slice %4 {offsets = [0, 2], sizes = [128, 1], strides = [1, 1]} : vector<128x4xf32> to vector<128x1xf32>
    %21 = vector.extract_strided_slice %5 {offsets = [2, 0], sizes = [1, 32], strides = [1, 1]} : vector<4x32xf32> to vector<1x32xf32>
    %22 = vector.broadcast %20 : vector<128x1xf32> to vector<128x32xf32>
    %23 = vector.broadcast %21 : vector<1x32xf32> to vector<128x32xf32>
    %24 = arith.mulf %22, %23 : vector<128x32xf32>
    %25 = arith.addf %19, %24 : vector<128x32xf32>
    %26 = vector.extract_strided_slice %4 {offsets = [0, 3], sizes = [128, 1], strides = [1, 1]} : vector<128x4xf32> to vector<128x1xf32>
    %27 = vector.extract_strided_slice %5 {offsets = [3, 0], sizes = [1, 32], strides = [1, 1]} : vector<4x32xf32> to vector<1x32xf32>
    %28 = vector.broadcast %26 : vector<128x1xf32> to vector<128x32xf32>
    %29 = vector.broadcast %27 : vector<1x32xf32> to vector<128x32xf32>
    %30 = arith.mulf %28, %29 : vector<128x32xf32>
    %31 = arith.addf %25, %30 : vector<128x32xf32>
    %32 = math.sin %31 : vector<128x32xf32>
    %33 = arith.truncf %32 : vector<128x32xf32> to vector<128x32xbf16>
    %c0_6 = arith.constant 0 : index
    %c0_7 = arith.constant 0 : index
    %34 = vector.load %arg10[%c0_6, %c0_7] : memref<5x128xf32, #tpu.memory_space<vmem>>, vector<5x128xf32>
    %c0_8 = arith.constant 0 : index
    %c0_9 = arith.constant 0 : index
    %35 = vector.load %arg4[%c0_8, %c0_9] : memref<128x128xf32, #tpu.memory_space<vmem>>, vector<128x128xf32>
    %36 = arith.truncf %35 : vector<128x128xf32> to vector<128x128xbf16>
    %c0_10 = arith.constant 0 : index
    %c0_11 = arith.constant 0 : index
    %37 = vector.load %arg7[%c0_10, %c0_11] : memref<32x128xbf16, #tpu.memory_space<vmem>>, vector<32x128xbf16>
    %cst_12 = arith.constant dense<0.000000e+00> : vector<128x128xf32>
    %38 = tpu.matmul %33, %37, %cst_12 {dimension_numbers = #tpu.dot_dimension_numbers<[1], [0], [0], [1], [0, 0, 1, 1], [], []>} : vector<128x32xbf16>, vector<32x128xbf16>, vector<128x128xf32> -> vector<128x128xf32>
    %c0_13 = arith.constant 0 : index
    %c0_14 = arith.constant 0 : index
    %39 = vector.load %arg8[%c0_13, %c0_14] : memref<128x128xbf16, #tpu.memory_space<vmem>>, vector<128x128xbf16>
    %cst_15 = arith.constant dense<0.000000e+00> : vector<128x128xf32>
    %40 = tpu.matmul %36, %39, %cst_15 {dimension_numbers = #tpu.dot_dimension_numbers<[1], [0], [0], [1], [0, 0, 1, 1], [], []>} : vector<128x128xbf16>, vector<128x128xbf16>, vector<128x128xf32> -> vector<128x128xf32>
    %41 = arith.addf %38, %40 : vector<128x128xf32>
    %42 = vector.extract_strided_slice %34 {offsets = [0, 0], sizes = [1, 128], strides = [1, 1]} : vector<5x128xf32> to vector<1x128xf32>
    %43 = vector.broadcast %42 : vector<1x128xf32> to vector<128x128xf32>
    %44 = arith.addf %41, %43 : vector<128x128xf32>
    %cst_16 = arith.constant 0.000000e+00 : f32
    %45 = vector.broadcast %cst_16 : f32 to vector<128x128xf32>
    %46 = arith.cmpf ogt, %44, %45 : vector<128x128xf32>
    %c0_17 = arith.constant 0 : index
    %47 = memref.load %arg1[%c0_17] : memref<5xf32, #tpu.memory_space<smem>>
    %48 = vector.broadcast %47 : f32 to vector<128x128xf32>
    %49 = arith.mulf %48, %44 : vector<128x128xf32>
    %50 = arith.select %46, %44, %49 : vector<128x128xi1>, vector<128x128xf32>
    %51 = arith.truncf %50 : vector<128x128xf32> to vector<128x128xbf16>
    %c0_18 = arith.constant 0 : index
    %c0_19 = arith.constant 0 : index
    %c0_20 = arith.constant 0 : index
    %52 = vector.load %arg9[%c0_18, %c0_19, %c0_20] : memref<4x128x128xbf16, #tpu.memory_space<vmem>>, vector<1x128x128xbf16>
    %53 = vector.shape_cast %52 : vector<1x128x128xbf16> to vector<128x128xbf16>
    %cst_21 = arith.constant dense<0.000000e+00> : vector<128x128xf32>
    %54 = tpu.matmul %51, %53, %cst_21 {dimension_numbers = #tpu.dot_dimension_numbers<[1], [0], [0], [1], [0, 0, 1, 1], [], []>} : vector<128x128xbf16>, vector<128x128xbf16>, vector<128x128xf32> -> vector<128x128xf32>
    %55 = vector.extract_strided_slice %34 {offsets = [1, 0], sizes = [1, 128], strides = [1, 1]} : vector<5x128xf32> to vector<1x128xf32>
    %56 = vector.broadcast %55 : vector<1x128xf32> to vector<128x128xf32>
    %57 = arith.addf %54, %56 : vector<128x128xf32>
    %cst_22 = arith.constant 0.000000e+00 : f32
    %58 = vector.broadcast %cst_22 : f32 to vector<128x128xf32>
    %59 = arith.cmpf ogt, %57, %58 : vector<128x128xf32>
    %c1 = arith.constant 1 : index
    %60 = memref.load %arg1[%c1] : memref<5xf32, #tpu.memory_space<smem>>
    %61 = vector.broadcast %60 : f32 to vector<128x128xf32>
    %62 = arith.mulf %61, %57 : vector<128x128xf32>
    %63 = arith.select %59, %57, %62 : vector<128x128xi1>, vector<128x128xf32>
    %64 = arith.truncf %63 : vector<128x128xf32> to vector<128x128xbf16>
    %c1_23 = arith.constant 1 : index
    %c0_24 = arith.constant 0 : index
    %c0_25 = arith.constant 0 : index
    %65 = vector.load %arg9[%c1_23, %c0_24, %c0_25] : memref<4x128x128xbf16, #tpu.memory_space<vmem>>, vector<1x128x128xbf16>
    %66 = vector.shape_cast %65 : vector<1x128x128xbf16> to vector<128x128xbf16>
    %cst_26 = arith.constant dense<0.000000e+00> : vector<128x128xf32>
    %67 = tpu.matmul %64, %66, %cst_26 {dimension_numbers = #tpu.dot_dimension_numbers<[1], [0], [0], [1], [0, 0, 1, 1], [], []>} : vector<128x128xbf16>, vector<128x128xbf16>, vector<128x128xf32> -> vector<128x128xf32>
    %68 = vector.extract_strided_slice %34 {offsets = [2, 0], sizes = [1, 128], strides = [1, 1]} : vector<5x128xf32> to vector<1x128xf32>
    %69 = vector.broadcast %68 : vector<1x128xf32> to vector<128x128xf32>
    %70 = arith.addf %67, %69 : vector<128x128xf32>
    %cst_27 = arith.constant 0.000000e+00 : f32
    %71 = vector.broadcast %cst_27 : f32 to vector<128x128xf32>
    %72 = arith.cmpf ogt, %70, %71 : vector<128x128xf32>
    %c2 = arith.constant 2 : index
    %73 = memref.load %arg1[%c2] : memref<5xf32, #tpu.memory_space<smem>>
    %74 = vector.broadcast %73 : f32 to vector<128x128xf32>
    %75 = arith.mulf %74, %70 : vector<128x128xf32>
    %76 = arith.select %72, %70, %75 : vector<128x128xi1>, vector<128x128xf32>
    %77 = arith.truncf %76 : vector<128x128xf32> to vector<128x128xbf16>
    %c2_28 = arith.constant 2 : index
    %c0_29 = arith.constant 0 : index
    %c0_30 = arith.constant 0 : index
    %78 = vector.load %arg9[%c2_28, %c0_29, %c0_30] : memref<4x128x128xbf16, #tpu.memory_space<vmem>>, vector<1x128x128xbf16>
    %79 = vector.shape_cast %78 : vector<1x128x128xbf16> to vector<128x128xbf16>
    %cst_31 = arith.constant dense<0.000000e+00> : vector<128x128xf32>
    %80 = tpu.matmul %77, %79, %cst_31 {dimension_numbers = #tpu.dot_dimension_numbers<[1], [0], [0], [1], [0, 0, 1, 1], [], []>} : vector<128x128xbf16>, vector<128x128xbf16>, vector<128x128xf32> -> vector<128x128xf32>
    %81 = vector.extract_strided_slice %34 {offsets = [3, 0], sizes = [1, 128], strides = [1, 1]} : vector<5x128xf32> to vector<1x128xf32>
    %82 = vector.broadcast %81 : vector<1x128xf32> to vector<128x128xf32>
    %83 = arith.addf %80, %82 : vector<128x128xf32>
    %cst_32 = arith.constant 0.000000e+00 : f32
    %84 = vector.broadcast %cst_32 : f32 to vector<128x128xf32>
    %85 = arith.cmpf ogt, %83, %84 : vector<128x128xf32>
    %c3 = arith.constant 3 : index
    %86 = memref.load %arg1[%c3] : memref<5xf32, #tpu.memory_space<smem>>
    %87 = vector.broadcast %86 : f32 to vector<128x128xf32>
    %88 = arith.mulf %87, %83 : vector<128x128xf32>
    %89 = arith.select %85, %83, %88 : vector<128x128xi1>, vector<128x128xf32>
    %90 = arith.truncf %89 : vector<128x128xf32> to vector<128x128xbf16>
    %c3_33 = arith.constant 3 : index
    %c0_34 = arith.constant 0 : index
    %c0_35 = arith.constant 0 : index
    %91 = vector.load %arg9[%c3_33, %c0_34, %c0_35] : memref<4x128x128xbf16, #tpu.memory_space<vmem>>, vector<1x128x128xbf16>
    %92 = vector.shape_cast %91 : vector<1x128x128xbf16> to vector<128x128xbf16>
    %cst_36 = arith.constant dense<0.000000e+00> : vector<128x128xf32>
    %93 = tpu.matmul %90, %92, %cst_36 {dimension_numbers = #tpu.dot_dimension_numbers<[1], [0], [0], [1], [0, 0, 1, 1], [], []>} : vector<128x128xbf16>, vector<128x128xbf16>, vector<128x128xf32> -> vector<128x128xf32>
    %94 = vector.extract_strided_slice %34 {offsets = [4, 0], sizes = [1, 128], strides = [1, 1]} : vector<5x128xf32> to vector<1x128xf32>
    %95 = vector.broadcast %94 : vector<1x128xf32> to vector<128x128xf32>
    %96 = arith.addf %93, %95 : vector<128x128xf32>
    %cst_37 = arith.constant 0.000000e+00 : f32
    %97 = vector.broadcast %cst_37 : f32 to vector<128x128xf32>
    %98 = arith.cmpf ogt, %96, %97 : vector<128x128xf32>
    %c4 = arith.constant 4 : index
    %99 = memref.load %arg1[%c4] : memref<5xf32, #tpu.memory_space<smem>>
    %100 = vector.broadcast %99 : f32 to vector<128x128xf32>
    %101 = arith.mulf %100, %96 : vector<128x128xf32>
    %102 = arith.select %98, %96, %101 : vector<128x128xi1>, vector<128x128xf32>
    %103 = tpu.transpose %102, [1, 0] : vector<128x128xf32> -> vector<128x128xf32>
    %104 = arith.truncf %103 : vector<128x128xf32> to vector<128x128xbf16>
    %105 = tpu.transpose %32, [1, 0] : vector<128x32xf32> -> vector<32x128xf32>
    %106 = arith.truncf %105 : vector<32x128xf32> to vector<32x128xbf16>
    %c0_38 = arith.constant 0 : index
    %c0_39 = arith.constant 0 : index
    %107 = vector.load %arg11[%c0_38, %c0_39] : memref<8x128xbf16, #tpu.memory_space<vmem>>, vector<8x128xbf16>
    %cst_40 = arith.constant dense<0.000000e+00> : vector<8x128xf32>
    %108 = tpu.matmul %107, %104, %cst_40 {dimension_numbers = #tpu.dot_dimension_numbers<[1], [0], [0], [1], [0, 0, 1, 1], [], []>} : vector<8x128xbf16>, vector<128x128xbf16>, vector<8x128xf32> -> vector<8x128xf32>
    %c0_41 = arith.constant 0 : index
    %c0_42 = arith.constant 0 : index
    %109 = vector.load %arg12[%c0_41, %c0_42] : memref<8x32xbf16, #tpu.memory_space<vmem>>, vector<8x32xbf16>
    %cst_43 = arith.constant dense<0.000000e+00> : vector<8x128xf32>
    %110 = tpu.matmul %109, %106, %cst_43 {dimension_numbers = #tpu.dot_dimension_numbers<[1], [0], [0], [1], [0, 0, 1, 1], [], []>} : vector<8x32xbf16>, vector<32x128xbf16>, vector<8x128xf32> -> vector<8x128xf32>
    %111 = arith.addf %108, %110 : vector<8x128xf32>
    %c0_44 = arith.constant 0 : index
    %c0_45 = arith.constant 0 : index
    %112 = vector.load %arg13[%c0_44, %c0_45] : memref<8x1xf32, #tpu.memory_space<vmem>>, vector<8x1xf32>
    %113 = vector.broadcast %112 : vector<8x1xf32> to vector<8x128xf32>
    %114 = arith.addf %111, %113 : vector<8x128xf32>
    %115 = vector.extract_strided_slice %114 {offsets = [0, 0], sizes = [4, 128], strides = [1, 1]} : vector<8x128xf32> to vector<4x128xf32>
    %116 = vector.extract_strided_slice %114 {offsets = [4, 0], sizes = [4, 128], strides = [1, 1]} : vector<8x128xf32> to vector<4x128xf32>
    %117 = arith.negf %116 : vector<4x128xf32>
    %118 = math.exp %117 : vector<4x128xf32>
    %cst_46 = arith.constant 1.000000e+00 : f32
    %119 = vector.broadcast %cst_46 : f32 to vector<4x128xf32>
    %120 = arith.addf %119, %118 : vector<4x128xf32>
    %121 = arith.divf %119, %120 : vector<4x128xf32>
    %122 = arith.mulf %115, %121 : vector<4x128xf32>
    %c0_47 = arith.constant 0 : index
    %c0_48 = arith.constant 0 : index
    %123 = vector.load %arg3[%c0_47, %c0_48] : memref<4x128xf32, #tpu.memory_space<vmem>>, vector<4x128xf32>
    %cst_49 = arith.constant 1.000000e+00 : f32
    %124 = vector.broadcast %cst_49 : f32 to vector<4x128xf32>
    %125 = arith.addf %124, %122 : vector<4x128xf32>
    %126 = arith.mulf %123, %125 : vector<4x128xf32>
    %c0_50 = arith.constant 0 : index
    %c0_51 = arith.constant 0 : index
    %127 = vector.load %arg14[%c0_50, %c0_51] : memref<4x128xf32, #tpu.memory_space<vmem>>, vector<4x128xf32>
    tpu.vector_store %arg14[%c0_50, %c0_51], %126 {strides = array<i32>} : memref<4x128xf32, #tpu.memory_space<vmem>>, vector<4x128xf32>,
    return
  }
  func.func @transform_0(%arg0: i32) -> i32 {
    %c0_i32 = arith.constant 0 : i32
    %c0_i32_0 = arith.constant 0 : i32
    return %c0_i32 : i32
  }
  func.func @transform_1(%arg0: i32) -> (i32, i32) {
    %c0_i32 = arith.constant 0 : i32
    %c0_i32_0 = arith.constant 0 : i32
    return %arg0, %c0_i32 : i32, i32
  }
  func.func @transform_2(%arg0: i32) -> (i32, i32) {
    %c0_i32 = arith.constant 0 : i32
    %c0_i32_0 = arith.constant 0 : i32
    return %c0_i32, %arg0 : i32, i32
  }
  func.func @transform_3(%arg0: i32) -> (i32, i32) {
    %c0_i32 = arith.constant 0 : i32
    %c0_i32_0 = arith.constant 0 : i32
    return %arg0, %c0_i32 : i32, i32
  }
  func.func @transform_4(%arg0: i32) -> (i32, i32) {
    %c0_i32 = arith.constant 0 : i32
    %c0_i32_0 = arith.constant 0 : i32
    %c0_i32_1 = arith.constant 0 : i32
    return %c0_i32, %c0_i32_0 : i32, i32
  }
  func.func @transform_5(%arg0: i32) -> (i32, i32) {
    %c0_i32 = arith.constant 0 : i32
    %c0_i32_0 = arith.constant 0 : i32
    %c0_i32_1 = arith.constant 0 : i32
    return %c0_i32, %c0_i32_0 : i32, i32
  }
  func.func @transform_6(%arg0: i32) -> (i32, i32) {
    %c0_i32 = arith.constant 0 : i32
    %c0_i32_0 = arith.constant 0 : i32
    %c0_i32_1 = arith.constant 0 : i32
    return %c0_i32, %c0_i32_0 : i32, i32
  }
  func.func @transform_7(%arg0: i32) -> (i32, i32) {
    %c0_i32 = arith.constant 0 : i32
    %c0_i32_0 = arith.constant 0 : i32
    %c0_i32_1 = arith.constant 0 : i32
    return %c0_i32, %c0_i32_0 : i32, i32
  }
  func.func @transform_8(%arg0: i32) -> (i32, i32, i32) {
    %c0_i32 = arith.constant 0 : i32
    %c0_i32_0 = arith.constant 0 : i32
    %c0_i32_1 = arith.constant 0 : i32
    %c0_i32_2 = arith.constant 0 : i32
    return %c0_i32, %c0_i32_0, %c0_i32_1 : i32, i32, i32
  }
  func.func @transform_9(%arg0: i32) -> (i32, i32) {
    %c0_i32 = arith.constant 0 : i32
    %c0_i32_0 = arith.constant 0 : i32
    %c0_i32_1 = arith.constant 0 : i32
    return %c0_i32, %c0_i32_0 : i32, i32
  }
  func.func @transform_10(%arg0: i32) -> (i32, i32) {
    %c0_i32 = arith.constant 0 : i32
    %c0_i32_0 = arith.constant 0 : i32
    %c0_i32_1 = arith.constant 0 : i32
    return %c0_i32, %c0_i32_0 : i32, i32
  }
  func.func @transform_11(%arg0: i32) -> (i32, i32) {
    %c0_i32 = arith.constant 0 : i32
    %c0_i32_0 = arith.constant 0 : i32
    %c0_i32_1 = arith.constant 0 : i32
    return %c0_i32, %c0_i32_0 : i32, i32
  }
  func.func @transform_12(%arg0: i32) -> (i32, i32) {
    %c0_i32 = arith.constant 0 : i32
    %c0_i32_0 = arith.constant 0 : i32
    %c0_i32_1 = arith.constant 0 : i32
    return %c0_i32, %c0_i32_0 : i32, i32
  }
  func.func @transform_13(%arg0: i32) -> (i32, i32) {
    %c0_i32 = arith.constant 0 : i32
    %c0_i32_0 = arith.constant 0 : i32
    return %c0_i32, %arg0 : i32, i32
  }
}

</mosaic_0001>

<bundles_post_ra>
// kernel: am_block_forward.1
= control target key start
LH: loop header
LB: loop body
LE: loop exit
PB: predicated region body
PF: predicated region fallthrough
CT: control target
= control target key end

     0   :  { %18 = vsyncpa [#allocation4], 0  ;;  %s7131_s0 = inlined_call_operand.vmem [shape: f32[5], index: 0, kind: input, shape index: {}]   ;;  %s7132_s1 = inlined_call_operand.vmem [shape: f32[16,4], index: 1, kind: input, shape index: {}]   ;;  %s7133_s2 = inlined_call_operand.vmem [shape: f32[4,16], index: 2, kind: input, shape index: {}]   ;;  %s7134_s3 = inlined_call_operand.vmem [shape: f32[16,128], index: 3, kind: input, shape index: {}]   ;;  %s7135_s4 = inlined_call_operand.vmem [shape: f32[4,32], index: 4, kind: input, shape index: {}]   ;;  %s7136_s5 = inlined_call_operand.vmem [shape: f32[1,32], index: 5, kind: input, shape index: {}]   ;;  %s7137_s6 = inlined_call_operand.hbm [shape: bf16[32,128], index: 6, kind: input, shape index: {}]   ;;  %s7138_s7 = inlined_call_operand.vmem [shape: bf16[128,128], index: 7, kind: input, shape index: {}]   ;;  %s7139_s8 = inlined_call_operand.hbm [shape: bf16[4,128,128], index: 8, kind: input, shape index: {}]   ;;  %s7140_s9 = inlined_call_operand.vmem [shape: f32[5,128], index: 9, kind: input, shape index: {}]   ;;  %s7141_s10 = inlined_call_operand.vmem [shape: bf16[8,128], index: 10, kind: input, shape index: {}]   ;;  %s7142_s11 = inlined_call_operand.hbm [shape: bf16[8,32], index: 11, kind: input, shape index: {}]   ;;  %s7143_s12 = inlined_call_operand.vmem [shape: f32[8,1], index: 12, kind: input, shape index: {}]   ;;  %s7144_s13 = inlined_call_operand.vmem [shape: f32[4,128], index: 13, kind: output, shape index: {}]  }
   0x1   :  { %19 = vsyncpa [#allocation3], 0 }
   0x2   :  { %20 = vsyncpa [#allocation7], 0  ;;  %s27_s27 = sshll.u32 %s7131_s0, 4  ;;  %s4478_s28 = smov [#allocation6]   ;;  %s28_s27 = int_to_ptr.vmem [resolvable:$true] %s27_s27 }
   0x3   :  { %s60_s29 = sshll.u32 %s4478_s28, 4  ;;  %s4394_s15 = scalar_lea.hbm %s7139_s8, 4096  ;;  %s61_s29 = int_to_ptr.vmem [resolvable:$true] %s60_s29 }
   0x4   :  { %p4395_p0 = scmp.ne.s32.totalorder %s7139_s8, %s4394_s15  ;;  %p4398_p1 = scmp.lt.u32.totalorder %s4394_s15, %s7139_s8 }
   0x6   :  { %p4400_p2 = pnand %p4398_p1, %p4395_p0 }
   0x8   :  { %4403 = shalt.err (!%p4400_p2)
}
   0x9   :  { %s4404_s20 = scalar_lea.vmem %s61_s29, 4096  ;;  %p4409_p4 = scmp.lt.s32.totalorder %s61_s29, %s61_s29 }
   0xa   :  { %p4405_p3 = scmp.ne.s32.totalorder %s61_s29, %s4404_s20  ;;  %p4410_p5 = scmp.lt.s32.totalorder %s4404_s20, %s4404_s20 }
   0xc   :  { %p4411_p6 = por %p4410_p5, %p4409_p4 }
   0xe   :  { %p4412_p7 = pnand %p4411_p6, %p4405_p3 }
  0x10   :  { %4415 = shalt.err (!%p4412_p7)
}
  0x11   :  { %s4479_s0 = smov 64   ;;  %s4480_s21 = smov 4  }
  0x12   :  { %66 = dma.hbm_to_vmem [thread:$0]  %s7139_s8, 4096, %s61_s29, [#allocation7], %s4479_s0, %s4479_s0, %s4480_s21  }
  0x13   :  { %s4416_s24 = scalar_lea.vmem %s28_s27, 16  ;;  %p4421_p9 = scmp.lt.s32.totalorder %s28_s27, %s28_s27 }
  0x14   :  { %p4417_p8 = scmp.ne.s32.totalorder %s28_s27, %s4416_s24  ;;  %p4422_p10 = scmp.lt.s32.totalorder %s4416_s24, %s4416_s24 }
  0x16   :  { %p4423_p11 = por %p4422_p10, %p4421_p9 }
  0x18   :  { %p4424_p12 = pnand %p4423_p11, %p4417_p8 }
  0x1a   :  { %4427 = shalt.err (!%p4424_p12)
}
  0x1b   :  { %s4481_s25 = smov [#allocation2]   ;;  %s4482_s26 = smov [#allocation5]  }
  0x1c   :  { %30 = dma.vmem_to_smem %s28_s27, 16, %s4481_s25, [#allocation4]  }
  0x1d   :  { %s46_s28 = sshll.u32 %s4482_s26, 4  ;;  %s4483_s30 = smov [#allocation8]   ;;  %s47_s28 = int_to_ptr.vmem [resolvable:$true] %s46_s28 }
  0x1e   :  { %s77_s14 = sshll.u32 %s4483_s30, 4  ;;  %s4428_s17 = scalar_lea.hbm %s7137_s6, 256  ;;  %s78_s14 = int_to_ptr.vmem [resolvable:$true] %s77_s14 }
  0x1f   :  { %p4429_p13 = scmp.ne.s32.totalorder %s7137_s6, %s4428_s17  ;;  %p4432_p0 = scmp.lt.u32.totalorder %s4428_s17, %s7137_s6 }
  0x21   :  { %p4434_p1 = pnand %p4432_p0, %p4429_p13 }
  0x23   :  { %4437 = shalt.err (!%p4434_p1)
}
  0x24   :  { %s4438_s27 = scalar_lea.vmem %s47_s28, 256  ;;  %p4443_p3 = scmp.lt.s32.totalorder %s47_s28, %s47_s28 }
  0x25   :  { %p4439_p2 = scmp.ne.s32.totalorder %s47_s28, %s4438_s27  ;;  %p4444_p4 = scmp.lt.s32.totalorder %s4438_s27, %s4438_s27 }
  0x27   :  { %p4445_p5 = por %p4444_p4, %p4443_p3 }
  0x29   :  { %p4446_p6 = pnand %p4445_p5, %p4439_p2 }
  0x2b   :  { %4449 = shalt.err (!%p4446_p6)
}
  0x2c   :  { %52 = dma.hbm_to_vmem [thread:$0]  %s7137_s6, 256, %s47_s28, [#allocation3], %s4479_s0, %s4479_s0, %s4480_s21  }
  0x2d   :  { %s4450_s25 = scalar_lea.hbm %s7142_s11, 64 }
  0x2e   :  { %p4451_p7 = scmp.ne.s32.totalorder %s7142_s11, %s4450_s25  ;;  %p4454_p8 = scmp.lt.u32.totalorder %s4450_s25, %s7142_s11 }
  0x30   :  { %p4456_p9 = pnand %p4454_p8, %p4451_p7 }
  0x32   :  { %4459 = shalt.err (!%p4456_p9)
}
  0x33   :  { %s4460_s17 = scalar_lea.vmem %s78_s14, 64  ;;  %p4465_p11 = scmp.lt.s32.totalorder %s78_s14, %s78_s14 }
  0x34   :  { %p4461_p10 = scmp.ne.s32.totalorder %s78_s14, %s4460_s17  ;;  %p4466_p12 = scmp.lt.s32.totalorder %s4460_s17, %s4460_s17 }
  0x36   :  { %p4467_p13 = por %p4466_p12, %p4465_p11 }
  0x38   :  { %p4468_p0 = pnand %p4467_p13, %p4461_p10 }
  0x3a   :  { %4471 = shalt.err (!%p4468_p0)
}
  0x3b   :  { %80 = dma.hbm_to_vmem [thread:$0]  %s7142_s11, 64, %s78_s14, [#allocation7]  }
  0x3c   :  { %4472 = dma.done.wait [#allocation4], 16  }
  0x3d   :  { %4473 = vsyncadd [#allocation4], 4294967280 }
  0x3e   :  { %4474 = dma.done.wait [#allocation3], 256  }
  0x3f   :  { %4475 = vsyncadd [#allocation3], 4294967040 }
  0x40   :  { %4476 = dma.done.wait [#allocation7], 4160  }
  0x41   :  { %4477 = vsyncadd [#allocation7], 4294963136 }
  0x42   :  { %95 = sfence }
  0x43   :  { %v99_v0 = vld [vmem:[%s7132_s1 + $0x10] sm:$0xff]  ;;  %v97_v1 = vld [vmem:[%s7132_s1] sm:$0xff]  ;;  %v100_v2 = vld [vmem:[%s7132_s1 + $0x18] sm:$0xff]  ;;  %v7148_v3 = vmov 0   ;;  %v4485_v30 = vmov 1   ;;  %v4486_v33 = vmov 2   ;;  %v227_v58 = vlaneseq }
  0x44   :  { %4263 = vset.pattern.permute.xlu1 %v7148_v3  ;;  %4262 = vset.pattern.permute.xlu0 %v7148_v3  ;;  %v115_v4 = vmul.f32 110.0, %v99_v0  ;;  %v113_v5 = vmul.f32 110.0, %v97_v1  ;;  %v116_v6 = vmul.f32 110.0, %v100_v2  ;;  %v98_v7 = vld [vmem:[%s7132_s1 + $0x8] sm:$0xff]  ;;  %v101_v18 = vld [vmem:[%s7132_s1 + $0x20] sm:$0xff]  ;;  %v104_v20 = vld [vmem:[%s7132_s1 + $0x38] sm:$0xff] }
  0x45   :  { %v114_v8 = vmul.f32 110.0, %v98_v7  ;;  %v102_v9 = vld [vmem:[%s7132_s1 + $0x28] sm:$0xff]  ;;  %v105_v22 = vld [vmem:[%s7132_s1 + $0x40] sm:$0xff]  ;;  %v108_v23 = vld [vmem:[%s7132_s1 + $0x58] sm:$0xff]  ;;  %v117_v24 = vmul.f32 110.0, %v101_v18  ;;  %v120_v26 = vmul.f32 110.0, %v104_v20 }
  0x46   :  { %v3719_v10 = vadd.f32 -0.55, %v115_v4  ;;  %v4628_v11 = vadd.f32 -0.55, %v113_v5  ;;  %v106_v12 = vld [vmem:[%s7132_s1 + $0x48] sm:$0xff]  ;;  %v118_v15 = vmul.f32 110.0, %v102_v9 }
  0x47   :  { %v4634_v13 = vadd.f32 -0.55, %v116_v6  ;;  %v3718_v14 = vadd.f32 -0.55, %v114_v8  ;;  %v110_v16 = vld [vmem:[%s7132_s1 + $0x68] sm:$0xff]  ;;  %v122_v17 = vmul.f32 110.0, %v106_v12 }
  0x48   :  { %159 = vperm.xlu1 %4263, %v3719_v10   ;;  %149 = vperm.xlu0 %4262, %v4628_v11   ;;  %v126_v19 = vmul.f32 110.0, %v110_v16  ;;  %v4646_v21 = vadd.f32 -0.55, %v118_v15  ;;  %v121_v28 = vmul.f32 110.0, %v105_v22  ;;  %v124_v29 = vmul.f32 110.0, %v108_v23  ;;  %v103_v36 = vld [vmem:[%s7132_s1 + $0x30] sm:$0xff] }
  0x49   :  { %v4654_v25 = vadd.f32 -0.55, %v122_v17  ;;  %v3721_v31 = vadd.f32 -0.55, %v117_v24  ;;  %v3724_v32 = vadd.f32 -0.55, %v120_v26 }
  0x4a   :  { %v4656_v27 = vadd.f32 -0.55, %v126_v19  ;;  %v3725_v34 = vadd.f32 -0.55, %v121_v28  ;;  %v4487_v35 = vmov 3   ;;  %v109_v37 = vld [vmem:[%s7132_s1 + $0x60] sm:$0xff] }
  0x4b   :  { %v3728_v38 = vadd.f32 -0.55, %v124_v29  ;;  %v119_v39 = vmul.f32 110.0, %v103_v36  ;;  %v125_v40 = vmul.f32 110.0, %v109_v37  ;;  %v112_v41 = vld [vmem:[%s7132_s1 + $0x78] sm:$0xff]  ;;  %v107_v46 = vld [vmem:[%s7132_s1 + $0x50] sm:$0xff] }
  0x4c   :  { %164 = vperm.xlu1 %4263, %v4634_v13   ;;  %154 = vperm.xlu0 %4262, %v3718_v14   ;;  %v128_v44 = vmul.f32 110.0, %v112_v41  ;;  %v123_v47 = vmul.f32 110.0, %v107_v46  ;;  %v111_v49 = vld [vmem:[%s7132_s1 + $0x70] sm:$0xff]  ;;  %v4726_v61 = vshrl.u32 %v227_v58, 7  ;;  %v145_v1 = vld [vmem:[%s7135_s4] sm:$0xf] }
  0x4d   :  { %v3723_v42 = vadd.f32 -0.55, %v119_v39  ;;  %v4679_v43 = vadd.f32 -0.55, %v125_v40  ;;  %v127_v50 = vmul.f32 110.0, %v111_v49  ;;  %s3833_s30 = sld [smem:[#allocation2 + $0x2]] }
  0x4e   :  { %v4682_v45 = vadd.f32 -0.55, %v128_v44  ;;  %v3727_v48 = vadd.f32 -0.55, %v123_v47  ;;  %7258 = vst [vmem:[#allocation12_spill] sm:$0xff] %v4726_v61  ;;  %v7149_v0 = vsub.s32 0, %v4726_v61 }
  0x4f   :  { %v3731_v53 = vadd.f32 -0.55, %v127_v50  ;;  %v7147_v6 = vsub.s32 1, %v4726_v61  ;;  %v7146_v8 = vsub.s32 2, %v4726_v61  ;;  %v4758_v12 = vld [vmem:[%s7136_s5] ss:$0 sm:$0xff] }
  0x50   :  { %4264 = vset.pattern.permute.xlu1 %v4485_v30  ;;  %174 = vperm.xlu0 %4262, %v4646_v21   ;;  %v4742_v5 = vrot.slane %v145_v1, %v7149_v0  ;;  %v7145_v16 = vsub.s32 3, %v4726_v61  ;;  %v7166_v46 = vmov 683565275   ;;  %s3842_s15 = sld [smem:[#allocation2 + $0x3]]  ;;  %s3851_s16 = sld [smem:[#allocation2 + $0x4]] }
  0x51   :  { %274 = vperm.xlu1 %4264, %v3718_v14   ;;  %v4765_v15 = vrot.slane %v145_v1, %v7146_v8 }
  0x52   :  { %v4777_v22 = vrot.slane %v145_v1, %v7145_v16 }
  0x54   :  { %194 = vperm.xlu0 %4262, %v4654_v25  }
  0x55   :  { %278 = vperm.xlu1 %4264, %v3719_v10  }
  0x58   :  { %214 = vperm.xlu0 %4262, %v4656_v27  }
  0x59   :  { %4265 = vset.pattern.permute.xlu1 %v4486_v33 }
  0x5a   :  { %370 = vperm.xlu1 %4265, %v4628_v11  }
  0x5c   :  { %4276 = vset.pattern.permute.xlu0 %v4485_v30 }
  0x5d   :  { %270 = vperm.xlu0 %4276, %v4628_v11  }
  0x5e   :  { %378 = vperm.xlu1 %4265, %v3719_v10  }
  0x61   :  { %282 = vperm.xlu0 %4276, %v4634_v13  }
  0x62   :  { %382 = vperm.xlu1 %4265, %v4634_v13  }
  0x65   :  { %286 = vperm.xlu0 %4276, %v3721_v31  }
  0x66   :  { %4266 = vset.pattern.permute.xlu1 %v4487_v35 }
  0x67   :  { %474 = vperm.xlu1 %4266, %v3718_v14  }
  0x69   :  { %298 = vperm.xlu0 %4276, %v3724_v32  }
  0x6b   :  { %478 = vperm.xlu1 %4266, %v3719_v10  }
  0x6d   :  { %302 = vperm.xlu0 %4276, %v3725_v34  }
  0x6f   :  { %4267 = vset.pattern.permute.xlu1 %v7148_v3 }
  0x70   :  { %169 = vperm.xlu1 %4267, %v3721_v31  }
  0x71   :  { %314 = vperm.xlu0 %4276, %v3728_v38  }
  0x74   :  { %179 = vperm.xlu1 %4267, %v3723_v42  }
  0x75   :  { %318 = vperm.xlu0 %4276, %v4679_v43  }
  0x78   :  { %184 = vperm.xlu1 %4267, %v3724_v32  }
  0x79   :  { %330 = vperm.xlu0 %4276, %v4682_v45  }
  0x7c   :  { %4268 = vset.pattern.permute.xlu1 %v4485_v30 }
  0x7d   :  { %290 = vperm.xlu1 %4268, %v4646_v21   ;;  %4278 = vset.pattern.permute.xlu0 %v4486_v33 }
  0x7e   :  { %374 = vperm.xlu0 %4278, %v3718_v14  }
  0x81   :  { %294 = vperm.xlu1 %4268, %v3723_v42  }
  0x82   :  { %390 = vperm.xlu0 %4278, %v4646_v21  }
  0x85   :  { %4269 = vset.pattern.permute.xlu1 %v4486_v33 }
  0x86   :  { %386 = vperm.xlu1 %4269, %v3721_v31   ;;  %406 = vperm.xlu0 %4278, %v4654_v25  }
  0x8a   :  { %394 = vperm.xlu1 %4269, %v3723_v42   ;;  %422 = vperm.xlu0 %4278, %v4656_v27  }
  0x8e   :  { %398 = vperm.xlu1 %4269, %v3724_v32   ;;  %4280 = vset.pattern.permute.xlu0 %v4487_v35 }
  0x8f   :  { %470 = vperm.xlu0 %4280, %v4628_v11   ;;  %v4753_v11 = vrot.slane %v145_v1, %v7147_v6 }
  0x92   :  { %4270 = vset.pattern.permute.xlu1 %v4487_v35 }
  0x93   :  { %490 = vperm.xlu1 %4270, %v4646_v21   ;;  %482 = vperm.xlu0 %4280, %v4634_v13  }
  0x97   :  { %494 = vperm.xlu1 %4270, %v3723_v42   ;;  %486 = vperm.xlu0 %4280, %v3721_v31  }
  0x9b   :  { %4271 = vset.pattern.permute.xlu1 %v7148_v3  ;;  %498 = vperm.xlu0 %4280, %v3724_v32  }
  0x9c   :  { %189 = vperm.xlu1 %4271, %v3725_v34  }
  0x9f   :  { %502 = vperm.xlu0 %4280, %v3725_v34  }
  0xa0   :  { %199 = vperm.xlu1 %4271, %v3727_v48  }
  0xa3   :  { %514 = vperm.xlu0 %4280, %v3728_v38  }
  0xa4   :  { %204 = vperm.xlu1 %4271, %v3728_v38  }
  0xa7   :  { %518 = vperm.xlu0 %4280, %v4679_v43  }
  0xa8   :  { %4272 = vset.pattern.permute.xlu1 %v4485_v30 }
  0xa9   :  { %306 = vperm.xlu1 %4272, %v4654_v25  }
  0xab   :  { %530 = vperm.xlu0 %4280, %v4682_v45  }
  0xad   :  { %310 = vperm.xlu1 %4272, %v3727_v48  }
  0xb1   :  { %4273 = vset.pattern.permute.xlu1 %v4486_v33 }
  0xb2   :  { %402 = vperm.xlu1 %4273, %v3725_v34  }
  0xb6   :  { %410 = vperm.xlu1 %4273, %v3727_v48  }
  0xba   :  { %414 = vperm.xlu1 %4273, %v3728_v38  }
  0xbe   :  { %4274 = vset.pattern.permute.xlu1 %v4487_v35 }
  0xbf   :  { %506 = vperm.xlu1 %4274, %v4654_v25  }
  0xc3   :  { %510 = vperm.xlu1 %4274, %v3727_v48   ;;  %v7157_v48 = vmov 2475754826  }
  0xc7   :  { %v160_v51 = vpop.permute.xlu1 %159  ;;  %4275 = vset.pattern.permute.xlu1 %v7148_v3  ;;  %v4712_v52 = vpop.permute.xlu0 %149 }
  0xc8   :  { %209 = vperm.xlu1 %4275, %v4679_v43   ;;  %v233_v10 = vmul.f32 %v4742_v5, %v160_v51 }
  0xca   :  { %v255_v18 = vadd.f32 %v4758_v12, %v233_v10 }
  0xcb   :  { %v4715_v54 = vpop.permute.xlu1 %164  ;;  %v155_v55 = vpop.permute.xlu0 %154 }
  0xcc   :  { %219 = vperm.xlu1 %4275, %v3731_v53   ;;  %v232_v38 = vmul.f32 %v4742_v5, %v155_v55 }
  0xce   :  { %v254_v44 = vadd.f32 %v4758_v12, %v232_v38 }
  0xcf   :  { %v4717_v56 = vpop.permute.xlu0 %174 }
  0xd0   :  { %v4719_v57 = vpop.permute.xlu1 %274  ;;  %224 = vperm.xlu1 %4275, %v4682_v45  }
  0xd3   :  { %v4722_v59 = vpop.permute.xlu0 %194 }
  0xd4   :  { %v279_v60 = vpop.permute.xlu1 %278  ;;  %4277 = vset.pattern.permute.xlu1 %v4485_v30 }
  0xd5   :  { %322 = vperm.xlu1 %4277, %v4656_v27   ;;  %v339_v14 = vmul.f32 %v4753_v11, %v279_v60  ;;  %v7159_v60 = vmov 2102212464  }
  0xd7   :  { %v4728_v62 = vpop.permute.xlu0 %214  ;;  %v355_v21 = vadd.f32 %v339_v14, %v255_v18  ;;  %v7161_v14 = vmov 920167782  }
  0xd9   :  { %326 = vperm.xlu1 %4277, %v3731_v53   ;;  %v4730_v63 = vpop.permute.xlu1 %370 }
  0xdc   :  { %v4736_v2 = vpop.permute.xlu0 %270 }
  0xdd   :  { %4279 = vset.pattern.permute.xlu1 %v4486_v33  ;;  %v379_v4 = vpop.permute.xlu1 %378 }
  0xde   :  { %418 = vperm.xlu1 %4279, %v4679_v43   ;;  %v439_v19 = vmul.f32 %v4765_v15, %v379_v4 }
  0xe0   :  { %v4745_v7 = vpop.permute.xlu0 %282  ;;  %v455_v24 = vadd.f32 %v439_v19, %v355_v21  ;;  %v7152_v21 = vmov 1326507024  }
  0xe1   :  { %v4748_v9 = vpop.permute.xlu1 %382 }
  0xe2   :  { %426 = vperm.xlu1 %4279, %v3731_v53  }
  0xe4   :  { %v4760_v13 = vpop.permute.xlu0 %286 }
  0xe6   :  { %430 = vperm.xlu1 %4279, %v4682_v45   ;;  %v4769_v17 = vpop.permute.xlu1 %474 }
  0xe8   :  { %v4773_v20 = vpop.permute.xlu0 %298 }
  0xea   :  { %4281 = vset.pattern.permute.xlu1 %v4487_v35  ;;  %v479_v23 = vpop.permute.xlu1 %478 }
  0xeb   :  { %v539_v25 = vmul.f32 %v4777_v22, %v479_v23  ;;  %522 = vperm.xlu1 %4281, %v4656_v27  }
  0xec   :  { %v4782_v26 = vpop.permute.xlu0 %302 }
  0xed   :  { %v4784_v28 = vadd.f32 %v539_v25, %v455_v24  ;;  %v4283_v24 = vld [vmem:[%s7138_s7] sm:$0xff]  }
  0xee   :  { %3956 = vmatprep.subr.bf16.mxu0 %v4283_v24 }
  0xef   :  { %7259 = vst [vmem:[#allocation13_spill] sm:$0xff] %v4784_v28  ;;  %v780_v29 = vand.u32 2139095040, %v4784_v28  ;;  %526 = vperm.xlu1 %4281, %v3731_v53   ;;  %v4787_v30 = vpop.permute.xlu1 %169  ;;  %v7150_v27 = vand.u32 2147483647, %v4784_v28  ;;  %v7155_v53 = vmov 2131351028   ;;  %3957 = vmatpush3.bf16.msra.mxu0 %v4283_v24 }
  0xf0   :  { %v4789_v31 = vpop.permute.xlu0 %314  ;;  %vm779_vm15 = vcmp.lt.s32.totalorder %v4784_v28, 0 }
  0xf1   :  { %v781_v32 = vshrl.u32 %v780_v29, 23  ;;  %v784_v42 = vand.u32 8388607, %v7150_v27 }
  0xf3   :  { %v3742_v33 = vadd.s32 4294967169, %v781_v32  ;;  %v4791_v34 = vpop.permute.xlu1 %179  ;;  %v785_v25 = vor.u32 8388608, %v784_v42 }
  0xf4   :  { %v4793_v35 = vpop.permute.xlu0 %318 }
  0xf5   :  { %v787_v36 = vadd.s32 1, %v3742_v33 }
  0xf7   :  { %vm788_vm0 = vcmp.gt.s32.totalorder %v787_v36, 0  ;;  %v4796_v37 = vpop.permute.xlu1 %184 }
  0xf8   :  { %v789_v39 = vsel %vm788_vm0, %v787_v36, 0  ;;  %v4799_v40 = vpop.permute.xlu0 %330 }
  0xf9   :  { %v791_v41 = vand.u32 31, %v789_v39  ;;  %v790_v45 = vshrl.u32 %v789_v39, 5 }
  0xfb   :  { %v792_v43 = vsub.s32 32, %v791_v41  ;;  %v794_v47 = vshll.u32 %v7166_v46, %v791_v41  ;;  %v797_v49 = vshll.u32 %v7157_v48, %v791_v41  ;;  %v800_v58 = vshll.u32 %v7155_v53, %v791_v41 }
  0xfc   :  { %v4806_v50 = vpop.permute.xlu1 %290  ;;  %v803_v10 = vshll.u32 %v7159_v60, %v791_v41  ;;  %v806_v19 = vshll.u32 %v7161_v14, %v791_v41  ;;  %vm809_vm1 = vcmp.lt.s32.totalorder %v790_v45, 1  ;;  %vm812_vm2 = vcmp.lt.s32.totalorder %v790_v45, 4 }
  0xfd   :  { %v795_v51 = vshrl.u32 %v7157_v48, %v792_v43  ;;  %v798_v55 = vshrl.u32 %v7155_v53, %v792_v43  ;;  %v801_v1 = vshrl.u32 %v7159_v60, %v792_v43  ;;  %v375_v4 = vpop.permute.xlu0 %374  ;;  %v804_v18 = vshrl.u32 %v7161_v14, %v792_v43 }
  0xfe   :  { %v807_v23 = vshrl.u32 %v7152_v21, %v792_v43  ;;  %v338_v41 = vmul.f32 %v4753_v11, %v4719_v57  ;;  %v793_v42 = vshrl.u32 %v7166_v46, %v792_v43  ;;  %vm811_vm3 = vcmp.lt.s32.totalorder %v790_v45, 3 }
  0xff   :  { %v796_v29 = vor.u32 %v795_v51, %v794_v47  ;;  %v799_v32 = vor.u32 %v798_v55, %v797_v49  ;;  %v802_v33 = vor.u32 %v801_v1, %v800_v58  ;;  %v805_v36 = vor.u32 %v804_v18, %v803_v10  ;;  %v4284_v51 = vld [vmem:[%s7138_s7 + $0x8] sm:$0xff]  }
 0x100   :  { %v808_v38 = vor.u32 %v807_v23, %v806_v19  ;;  %v4819_v39 = vpop.permute.xlu1 %294  ;;  %vm810_vm4 = vcmp.lt.s32.totalorder %v790_v45, 2  ;;  %v825_v57 = vshll.u32 %v785_v25, 8  ;;  %3958 = vmatprep.subr.bf16.mxu0 %v4284_v51  ;;  %v4285_v45 = vld [vmem:[%s7138_s7 + $0x10] sm:$0xff]  }
 0x101   :  { %v814_v16 = vsel %vm812_vm2, %v802_v33, 2102212464  ;;  %v817_v8 = vsel %vm809_vm1, %v796_v29, %v799_v32  ;;  %v821_v6 = vsel %vm809_vm1, %v799_v32, %v802_v33  ;;  %v391_v3 = vpop.permute.xlu0 %390  ;;  %v818_v47 = vsel %vm812_vm2, %v805_v36, 920167782  ;;  %3959 = vmatpush3.bf16.msra.mxu0 %v4284_v51 }
 0x102   :  { %v822_v49 = vsel %vm812_vm2, %v808_v38, 1326507024  ;;  %v819_v55 = vsel %vm811_vm3, %v802_v33, %v818_v47  ;;  %v813_v1 = vsel %vm809_vm1, %v793_v42, %v796_v29  ;;  %v815_v10 = vsel %vm811_vm3, %v799_v32, %v814_v16  ;;  %3960 = vmatprep.subr.bf16.mxu0 %v4285_v45 }
 0x103   :  { %v823_v58 = vsel %vm811_vm3, %v805_v36, %v822_v49  ;;  %v820_v18 = vsel %vm810_vm4, %v817_v8, %v819_v55  ;;  %v816_v16 = vsel %vm810_vm4, %v813_v1, %v815_v10  ;;  %v354_v8 = vadd.f32 %v338_v41, %v254_v44  ;;  %v4286_v36 = vld [vmem:[%s7138_s7 + $0x18] sm:$0xff]  }
 0x104   :  { %v824_v19 = vsel %vm810_vm4, %v821_v6, %v823_v58  ;;  %v4833_v43 = vmul.u32.u64.low %v825_v57, %v820_v18  ;;  %v4834_v0 = vmul.u32.u64.high %v825_v57, %v820_v18, %v4833_v43  ;;  %v438_v6 = vmul.f32 %v4765_v15, %v375_v4  ;;  %v4287_v58 = vld [vmem:[%s7138_s7 + $0x20] sm:$0xff]  }
 0x105   :  { %v4830_v23 = vmul.u32.u64.low %v825_v57, %v824_v19  ;;  %v4831_v24 = vmul.u32.u64.high %v825_v57, %v824_v19, %v4830_v23  ;;  %v4837_v38 = vpop.permute.xlu1 %386  ;;  %v4839_v27 = vpop.permute.xlu0 %406  ;;  %3961 = vmatpush3.bf16.msra.mxu0 %v4285_v45  ;;  %v832_v33 = vmul.u32 %v825_v57, %v816_v16  ;;  %v236_v44 = vmul.f32 %v4742_v5, %v4717_v56 }
 0x106   :  { %v835_v25 = vadd.s32 1, %v4834_v0  ;;  %v454_v4 = vadd.f32 %v438_v6, %v354_v8  ;;  %3962 = vmatprep.subr.bf16.mxu0 %v4286_v36  ;;  %v538_v41 = vmul.f32 %v4777_v22, %v4769_v17  ;;  %v342_v57 = vmul.f32 %v4753_v11, %v4806_v50 }
 0x107   :  { %vm834_vm5 = vc.u32 %v4831_v24, %v4833_v43  ;;  %v258_v17 = vadd.f32 %v4758_v12, %v236_v44  ;;  %v340_v10 = vmul.f32 %v4753_v11, %v4745_v7  ;;  %v442_v18 = vmul.f32 %v4765_v15, %v391_v3 }
 0x108   :  { %v836_v42 = vsel %vm834_vm5, %v835_v25, %v4834_v0  ;;  %v234_v0 = vmul.f32 %v4742_v5, %v4715_v54  ;;  %v4869_v1 = vadd.f32 %v538_v41, %v454_v4  ;;  %v231_v6 = vmul.f32 %v4742_v5, %v4712_v52 }
 0x109   :  { %v4848_v29 = vpop.permute.xlu1 %394  ;;  %v4850_v32 = vpop.permute.xlu0 %422  ;;  %v837_v47 = vadd.s32 %v836_v42, %v832_v33  ;;  %3963 = vmatpush3.bf16.msra.mxu0 %v4286_v36  ;;  %v358_v45 = vadd.f32 %v342_v57, %v258_v17  ;;  %v440_v3 = vmul.f32 %v4765_v15, %v4748_v9  ;;  %v337_v52 = vmul.f32 %v4753_v11, %v4736_v2 }
 0x10a   :  { %7260 = vst [vmem:[#allocation14_spill] sm:$0xff] %v4869_v1  ;;  %3964 = vmatprep.subr.bf16.mxu0 %v4287_v58  ;;  %v256_v54 = vadd.f32 %v4758_v12, %v234_v0  ;;  %v676_v50 = vand.u32 2139095040, %v4869_v1  ;;  %v253_v41 = vadd.f32 %v4758_v12, %v231_v6  ;;  %v235_v0 = vmul.f32 %v4742_v5, %v4787_v30  ;;  %v4288_v6 = vld [vmem:[%s7138_s7 + $0x28] sm:$0xff]  }
 0x10b   :  { %v838_v51 = vadd.s32 536870912, %v837_v47  ;;  %v458_v33 = vadd.f32 %v442_v18, %v358_v45  ;;  %v244_v57 = vmul.f32 %v4742_v5, %v4728_v62  ;;  %v437_v30 = vmul.f32 %v4765_v15, %v4730_v63 }
 0x10c   :  { %v356_v7 = vadd.f32 %v340_v10, %v256_v54  ;;  %v677_v42 = vshrl.u32 %v676_v50, 23  ;;  %v341_v62 = vmul.f32 %v4753_v11, %v4760_v13  ;;  %v257_v50 = vadd.f32 %v4758_v12, %v235_v0 }
 0x10d   :  { %v4860_v49 = vpop.permute.xlu1 %398  ;;  %v4871_v56 = vshrl.u32 %v838_v51, 30  ;;  %3965 = vmatpush3.bf16.msra.mxu0 %v4287_v58  ;;  %v240_v51 = vmul.f32 %v4742_v5, %v4722_v59  ;;  %v238_v59 = vmul.f32 %v4742_v5, %v4796_v37  ;;  %v344_v13 = vmul.f32 %v4753_v11, %v4773_v20 }
 0x10e   :  { %v471_v55 = vpop.permute.xlu0 %470  ;;  %v456_v58 = vadd.f32 %v440_v3, %v356_v7  ;;  %v3738_v17 = vadd.s32 4294967169, %v677_v42  ;;  %3966 = vmatprep.subr.bf16.mxu0 %v4288_v6  ;;  %v4938_v20 = vmul.f32 %v4753_v11, %v4789_v31  ;;  %v4950_v31 = vmul.f32 %v4753_v11, %v4793_v35 }
 0x10f   :  { %v840_v19 = vshll.u32 %v4871_v56, 30  ;;  %v4906_v54 = vadd.f32 %v4758_v12, %v240_v51  ;;  %v537_v7 = vmul.f32 %v4777_v22, %v471_v55  ;;  %v260_v42 = vadd.f32 %v4758_v12, %v238_v59 }
 0x110   :  { %v683_v37 = vadd.s32 1, %v3738_v17  ;;  %v343_v55 = vmul.f32 %v4753_v11, %v4819_v39  ;;  %7264 = vst [vmem:[#allocation18_spill] sm:$0xff] %v4950_v31  ;;  %v4964_v35 = vmul.f32 %v4765_v15, %v4839_v27 }
 0x111   :  { %v4883_v8 = vsub.s32 %v837_v47, %v840_v19  ;;  %v353_v19 = vadd.f32 %v337_v52, %v253_v41  ;;  %3967 = vmatpush3.bf16.msra.mxu0 %v4288_v6  ;;  %v357_v52 = vadd.f32 %v341_v62, %v257_v50  ;;  %v4956_v0 = vadd.f32 %v344_v13, %v260_v42 }
 0x112   :  { %v491_v23 = vpop.permute.xlu1 %490  ;;  %v483_v25 = vpop.permute.xlu0 %482  ;;  %vm684_vm6 = vcmp.gt.s32.totalorder %v683_v37, 0 }
 0x113   :  { %v542_v16 = vmul.f32 %v4777_v22, %v491_v23  ;;  %v843_v36 = vsub.s32 0, %v4883_v8  ;;  %v540_v44 = vmul.f32 %v4777_v22, %v483_v25  ;;  %v4921_v25 = vadd.f32 %v4758_v12, %v244_v57 }
 0x114   :  { %v4958_v17 = vsel %vm684_vm6, %v683_v37, 0 }
 0x115   :  { %v4888_v4 = vadd.f32 %v542_v16, %v458_v33  ;;  %v3743_v47 = vmin.u32 %v843_v36, %v4883_v8  ;;  %v4902_v18 = vadd.f32 %v540_v44, %v456_v58  ;;  %v237_v16 = vmul.f32 %v4742_v5, %v4791_v34  ;;  %7262 = vst [vmem:[#allocation16_spill] sm:$0xff] %v4921_v25 }
 0x116   :  { %v453_v33 = vadd.f32 %v437_v30, %v353_v19  ;;  %v4931_v36 = vmul.f32 %v4753_v11, %v4782_v26  ;;  %v4289_v26 = vld [vmem:[%s7138_s7 + $0x30] sm:$0xff]   ;;  %v443_v19 = vmul.f32 %v4765_v15, %v4848_v29 }
 0x117   :  { %7261 = vst [vmem:[#allocation15_spill] sm:$0xff] %v4888_v4  ;;  %v1092_v9 = vand.u32 2139095040, %v4888_v4  ;;  %v845_v2 = vclz %v3743_v47  ;;  %v7151_v23 = vand.u32 2147483647, %v4888_v4  ;;  %v884_v63 = vand.u32 2139095040, %v4902_v18  ;;  %3968 = vmatprep.subr.bf16.mxu0 %v4289_v26 }
 0x118   :  { %v259_v41 = vadd.f32 %v4758_v12, %v237_v16  ;;  %v441_v47 = vmul.f32 %v4765_v15, %v4837_v38  ;;  %v4946_v51 = vadd.f32 %v537_v7, %v453_v33  ;;  %v4954_v38 = vmul.f32 %v4753_v11, %v4799_v40  ;;  %3969 = vmatpush3.bf16.msra.mxu0 %v4289_v26  ;;  %v4290_v40 = vld [vmem:[%s7138_s7 + $0x38] sm:$0xff]  }
 0x119   :  { %v1093_v10 = vshrl.u32 %v1092_v9, 23  ;;  %v3744_v3 = vadd.s32 4294967294, %v845_v2  ;;  %v1096_v34 = vand.u32 8388607, %v7151_v23  ;;  %v885_v39 = vshrl.u32 %v884_v63, 23  ;;  %3970 = vmatprep.subr.bf16.mxu0 %v4290_v40 }
 0x11a   :  { %7263 = vst [vmem:[#allocation17_spill] sm:$0xff] %v4946_v51  ;;  %7265 = vst [vmem:[#allocation19_spill] sm:$0xff] %v4954_v38  ;;  %v359_v9 = vadd.f32 %v343_v55, %v259_v41  ;;  %v572_v59 = vand.u32 2139095040, %v4946_v51 }
 0x11b   :  { %v3754_v45 = vadd.s32 4294967169, %v1093_v10  ;;  %vm3745_vm8 = vcmp.lt.s32.totalorder %v3744_v3, 0  ;;  %v1097_v58 = vor.u32 8388608, %v1096_v34  ;;  %v4960_v10 = vadd.f32 %v441_v47, %v357_v52 }
 0x11c   :  { %v4971_v2 = vsel %vm3745_vm8, 0, %v3744_v3  ;;  %v3746_v30 = vadd.s32 4294967169, %v885_v39  ;;  %3971 = vmatpush3.bf16.msra.mxu0 %v4290_v40 }
 0x11d   :  { %v1099_v44 = vadd.s32 1, %v3754_v45  ;;  %v4976_v27 = vshll.u32 %v1097_v58, 8 }
 0x11f   :  { %vm1100_vm7 = vcmp.gt.s32.totalorder %v1099_v44, 0 }
 0x120   :  { %v1101_v12 = vsel %vm1100_vm7, %v1099_v44, 0  ;;  %v891_v44 = vadd.s32 1, %v3746_v30  ;;  %v573_v30 = vshrl.u32 %v572_v59, 23  ;;  %v459_v59 = vadd.f32 %v443_v19, %v359_v9 }
 0x121   :  { %v1103_v57 = vand.u32 31, %v1101_v12  ;;  %v1102_v62 = vshrl.u32 %v1101_v12, 5 }
 0x122   :  { %vm892_vm13 = vcmp.gt.s32.totalorder %v891_v44, 0 }
 0x123   :  { %v1104_v45 = vsub.s32 32, %v1103_v57  ;;  %v1106_v50 = vshll.u32 %v7166_v46, %v1103_v57  ;;  %v1109_v16 = vshll.u32 %v7157_v48, %v1103_v57  ;;  %v1112_v37 = vshll.u32 %v7155_v53, %v1103_v57 }
 0x124   :  { %v1115_v63 = vshll.u32 %v7159_v60, %v1103_v57  ;;  %v1118_v3 = vshll.u32 %v7161_v14, %v1103_v57  ;;  %vm1121_vm9 = vcmp.lt.s32.totalorder %v1102_v62, 1  ;;  %vm1124_vm10 = vcmp.lt.s32.totalorder %v1102_v62, 4 }
 0x125   :  { %v1107_v29 = vshrl.u32 %v7157_v48, %v1104_v45  ;;  %v1110_v6 = vshrl.u32 %v7155_v53, %v1104_v45  ;;  %v1113_v7 = vshrl.u32 %v7159_v60, %v1104_v45  ;;  %v1116_v13 = vshrl.u32 %v7161_v14, %v1104_v45 }
 0x126   :  { %v1119_v33 = vshrl.u32 %v7152_v21, %v1104_v45  ;;  %v1105_v47 = vshrl.u32 %v7166_v46, %v1104_v45  ;;  %vm1122_vm11 = vcmp.lt.s32.totalorder %v1102_v62, 2  ;;  %vm1123_vm12 = vcmp.lt.s32.totalorder %v1102_v62, 3 }
 0x127   :  { %v1108_v34 = vor.u32 %v1107_v29, %v1106_v50  ;;  %v1111_v42 = vor.u32 %v1110_v6, %v1109_v16  ;;  %v1114_v55 = vor.u32 %v1113_v7, %v1112_v37  ;;  %v1117_v41 = vor.u32 %v1116_v13, %v1115_v63 }
 0x128   :  { %v1120_v52 = vor.u32 %v1119_v33, %v1118_v3  ;;  %v853_v16 = vsub.s32 4294967266, %v4971_v2  ;;  %v7154_v45 = vand.u32 2147483647, %v4902_v18  ;;  %v893_v3 = vsel %vm892_vm13, %v891_v44, 0 }
 0x129   :  { %v1126_v26 = vsel %vm1124_vm10, %v1114_v55, 2102212464  ;;  %v1129_v39 = vsel %vm1121_vm9, %v1108_v34, %v1111_v42  ;;  %v1133_v58 = vsel %vm1121_vm9, %v1111_v42, %v1114_v55  ;;  %v1130_v12 = vsel %vm1124_vm10, %v1117_v41, 920167782 }
 0x12a   :  { %v1134_v40 = vsel %vm1124_vm10, %v1120_v52, 1326507024  ;;  %v1125_v57 = vsel %vm1121_vm9, %v1105_v47, %v1108_v34  ;;  %v1127_v23 = vsel %vm1123_vm12, %v1111_v42, %v1126_v26  ;;  %v1131_v21 = vsel %vm1123_vm12, %v1114_v55, %v1130_v12  ;;  %v495_v12 = vpop.permute.xlu1 %494 }
 0x12b   :  { %v1135_v50 = vsel %vm1123_vm12, %v1117_v41, %v1134_v40  ;;  %v1132_v29 = vsel %vm1122_vm11, %v1129_v39, %v1131_v21  ;;  %v1128_v63 = vsel %vm1122_vm11, %v1125_v57, %v1127_v23  ;;  %v833_v33 = vadd.s32 %v4833_v43, %v4831_v24 }
 0x12c   :  { %v1136_v6 = vsel %vm1122_vm11, %v1133_v58, %v1135_v50  ;;  %v4994_v62 = vmul.u32.u64.low %v4976_v27, %v1132_v29  ;;  %v4995_v13 = vmul.u32.u64.high %v4976_v27, %v1132_v29, %v4994_v62  ;;  %v895_v34 = vand.u32 31, %v893_v3 }
 0x12d   :  { %v4989_v37 = vmul.u32.u64.low %v4976_v27, %v1136_v6  ;;  %v4990_v7 = vmul.u32.u64.high %v4976_v27, %v1136_v6, %v4989_v37  ;;  %v849_v42 = vsub.s32 32, %v4971_v2  ;;  %v854_v55 = vadd.s32 127, %v853_v16 }
 0x12e   :  { %v5003_v41 = vand.u32 31, %v4958_v17  ;;  %v3734_v23 = vadd.s32 4294967169, %v573_v30  ;;  %v1144_v52 = vmul.u32 %v4976_v27, %v1128_v63  ;;  %v888_v44 = vand.u32 8388607, %v7154_v45 }
 0x12f   :  { %vm1146_vm14 = vc.u32 %v4990_v7, %v4994_v62  ;;  %v896_v24 = vsub.s32 32, %v895_v34  ;;  %v1147_v43 = vadd.s32 1, %v4995_v13  ;;  %v894_v9 = vshrl.u32 %v893_v3, 5 }
 0x130   :  { %7266 = vst [vmem:[#allocation20_spill] sm:$0xff] %v5003_v41  ;;  %v898_v19 = vshll.u32 %v7166_v46, %v895_v34  ;;  %v901_v47 = vshll.u32 %v7157_v48, %v895_v34  ;;  %v904_v27 = vshll.u32 %v7155_v53, %v895_v34  ;;  %v907_v57 = vshll.u32 %v7159_v60, %v895_v34 }
 0x131   :  { %v899_v26 = vshrl.u32 %v7157_v48, %v896_v24  ;;  %v902_v39 = vshrl.u32 %v7155_v53, %v896_v24  ;;  %v905_v58 = vshrl.u32 %v7159_v60, %v896_v24  ;;  %v1148_v40 = vsel %vm1146_vm14, %v1147_v43, %v4995_v13 }
 0x132   :  { %v908_v50 = vshrl.u32 %v7161_v14, %v896_v24  ;;  %v7267_v16 = vmov 1326507024   ;;  %v5022_v29 = vadd.s32 %v1148_v40, %v1144_v52  ;;  %v889_v6 = vor.u32 8388608, %v888_v44 }
 0x133   :  { %v911_v30 = vshrl.u32 %v7267_v16, %v896_v24  ;;  %v900_v37 = vor.u32 %v899_v26, %v898_v19  ;;  %v903_v63 = vor.u32 %v902_v39, %v901_v47  ;;  %v906_v3 = vor.u32 %v905_v58, %v904_v27 }
 0x134   :  { %v909_v45 = vor.u32 %v908_v50, %v907_v57  ;;  %v910_v53 = vshll.u32 %v7161_v14, %v895_v34  ;;  %v543_v48 = vmul.f32 %v4777_v22, %v495_v12  ;;  %v851_v13 = vshrl.u32 %v833_v33, %v849_v42 }
 0x135   :  { %v5027_v43 = vsub.s32 32, %v5003_v41  ;;  %v579_v60 = vadd.s32 1, %v3734_v23  ;;  %vm913_vm0 = vcmp.lt.s32.totalorder %v894_v9, 1  ;;  %v7269_v21 = vand.u32 2147483647, %v4784_v28 }
 0x136   :  { %v855_v44 = vshll.u32 %v854_v55, 23  ;;  %v912_v19 = vor.u32 %v911_v30, %v910_v53  ;;  %vm916_vm2 = vcmp.lt.s32.totalorder %v894_v9, 4  ;;  %v921_v47 = vsel %vm913_vm0, %v900_v37, %v903_v63 }
 0x137   :  { %7268 = vst [vmem:[#allocation21_spill] sm:$0xff] %v5027_v43  ;;  %vm5031_vm1 = vcmp.le.f32.partialorder %v7269_v21, 0.7853982  ;;  %v1150_v34 = vadd.s32 536870912, %v5022_v29  ;;  %vm915_vm3 = vcmp.lt.s32.totalorder %v894_v9, 3  ;;  %v929_v42 = vshll.u32 %v889_v6, 8 }
 0x138   :  { %v922_v33 = vsel %vm916_vm2, %v909_v45, 920167782  ;;  %vm914_vm4 = vcmp.lt.s32.totalorder %v894_v9, 2  ;;  %v918_v26 = vsel %vm916_vm2, %v906_v3, 2102212464  ;;  %v5038_v39 = vadd.f32 %v543_v48, %v459_v59 }
 0x139   :  { %v923_v23 = vsel %vm915_vm3, %v906_v3, %v922_v33  ;;  %v850_v21 = vshll.u32 %v4883_v8, %v4971_v2  ;;  %v897_v55 = vshrl.u32 %v7166_v46, %v896_v24  ;;  %v925_v27 = vsel %vm913_vm0, %v903_v63, %v906_v3 }
 0x13a   :  { %7272 = vst [vmem:[#allocation22_spill] sm:$0xff] %v5038_v39  ;;  %v924_v53 = vsel %vm914_vm4, %v921_v47, %v923_v23  ;;  %v856_v58 = vor.u32 4788187, %v855_v44  ;;  %v926_v12 = vsel %vm916_vm2, %v912_v19, 1326507024  ;;  %v5049_v50 = vshrl.u32 %v1150_v34, 30 }
 0x13b   :  { %v5045_v40 = vmul.u32.u64.low %v929_v42, %v924_v53  ;;  %v5046_v57 = vmul.u32.u64.high %v929_v42, %v924_v53, %v5045_v40  ;;  %v917_v48 = vsel %vm913_vm0, %v897_v55, %v900_v37  ;;  %v919_v59 = vsel %vm915_vm3, %v903_v63, %v918_v26  ;;  %v5061_v44 = vld [vmem:[#allocation5] sm:$0xff]  }
 0x13c   :  { %7273 = vst [vmem:[#allocation23_spill] sm:$0xff] %v5049_v50  ;;  %v927_v8 = vsel %vm915_vm3, %v909_v45, %v926_v12  ;;  %v852_v2 = vor.u32 %v851_v13, %v850_v21  ;;  %v7274_v24 = vsub.s32 4, %v4871_v56  ;;  %v1196_v3 = vand.u32 2139095040, %v5038_v39  ;;  %7275 = vst [vmem:[#allocation24_spill] sm:$0xff] %v5061_v44  ;;  %v487_v13 = vpop.permute.xlu0 %486  ;;  %3988 = vmatprep.subr.bf16.mxu0 %v5061_v44 }
 0x13d   :  { %v928_v6 = vsel %vm914_vm4, %v925_v27, %v927_v8  ;;  %v5064_v19 = vshrl.u32 %v4958_v17, 5  ;;  %v444_v37 = vmul.f32 %v4765_v15, %v4860_v49  ;;  %v857_v47 = vand.u32 2147483647, %v856_v58 }
 0x13e   :  { %v864_v30 = vsel %vm779_vm15, %v7274_v24, %v4871_v56  ;;  %v5068_v45 = vmul.u32.u64.low %v929_v42, %v928_v6  ;;  %v5069_v63 = vmul.u32.u64.high %v929_v42, %v928_v6, %v5068_v45  ;;  %v920_v34 = vsel %vm914_vm4, %v917_v48, %v919_v59 }
 0x13f   :  { %7276 = vst [vmem:[#allocation25_spill] sm:$0xff] %v5064_v19  ;;  %v939_v56 = vadd.s32 1, %v5046_v57  ;;  %v1197_v33 = vshrl.u32 %v1196_v3, 23  ;;  %v866_v26 = vsel %vm5031_vm1, 0, %v864_v30  ;;  %v700_v17 = vshrl.u32 %v7161_v14, %v5027_v43 }
 0x140   :  { %vm580_vm5 = vcmp.gt.s32.totalorder %v579_v60, 0  ;;  %v1152_v49 = vshll.u32 %v5049_v50, 30  ;;  %v859_v23 = vcvt.s32.f32 %v852_v2  ;;  %v703_v21 = vshrl.u32 %v7267_v16, %v5027_v43 }
 0x141   :  { %v3758_v9 = vadd.s32 4294967169, %v1197_v33  ;;  %v541_v55 = vmul.f32 %v4777_v22, %v487_v13  ;;  %v7277_v53 = vmov 2102212464   ;;  %v702_v58 = vshll.u32 %v7161_v14, %v5003_v41 }
 0x142   :  { %v699_v27 = vshll.u32 %v7277_v53, %v5003_v41  ;;  %v936_v12 = vmul.u32 %v929_v42, %v920_v34  ;;  %vm938_vm6 = vc.u32 %v5069_v63, %v5045_v40  ;;  %v860_v48 = vmul.f32 %v859_v23, %v857_v47 }
 0x143   :  { %v581_v59 = vsel %vm580_vm5, %v579_v60, 0  ;;  %v940_v8 = vsel %vm938_vm6, %v939_v56, %v5046_v57  ;;  %v1203_v2 = vadd.s32 1, %v3758_v9  ;;  %v870_v24 = vadd.s32 3, %v866_v26 }
 0x144   :  { %v5089_v30 = vor.u32 %v700_v17, %v699_v27  ;;  %v5092_v6 = vsub.s32 %v5022_v29, %v1152_v49  ;;  %v941_v3 = vadd.s32 %v940_v8, %v936_v12  ;;  %v704_v45 = vor.u32 %v703_v21, %v702_v58 }
 0x145   :  { %v5096_v13 = vmul.f32 %v4765_v15, %v4850_v32  ;;  %vm1204_vm7 = vcmp.gt.s32.totalorder %v1203_v2, 0  ;;  %v5099_v42 = vadd.f32 %v541_v55, %v4960_v10  ;;  %v460_v60 = vadd.f32 %v444_v37, %v4956_v0  ;;  %v499_v37 = vpop.permute.xlu0 %498 }
 0x146   :  { %7278 = vst [vmem:[#allocation26_spill] sm:$0xff] %v5089_v30  ;;  %v5102_v57 = vand.u32 31, %v581_v59  ;;  %v942_v47 = vadd.s32 536870912, %v941_v3  ;;  %v1205_v34 = vsel %vm1204_vm7, %v1203_v2, 0  ;;  %v861_v56 = vxor.u32 2147483648, %v860_v48 }
 0x147   :  { %7279 = vst [vmem:[#allocation27_spill] sm:$0xff] %v5096_v13  ;;  %7280 = vst [vmem:[#allocation28_spill] sm:$0xff] %v5099_v42  ;;  %vm708_vm8 = vcmp.lt.s32.totalorder %v5064_v19, 4  ;;  %v1207_v29 = vand.u32 31, %v1205_v34  ;;  %v5106_v26 = vand.u32 3, %v870_v24  ;;  %v1155_v10 = vsub.s32 0, %v5092_v6  ;;  %v5151_v19 = vpop.permute.xlu1 %189 }
 0x148   :  { %7281 = vst [vmem:[#allocation29_spill] sm:$0xff] %v5102_v57  ;;  %v5111_v32 = vsel %vm708_vm8, %v5089_v30, 920167782  ;;  %v5114_v0 = vshrl.u32 %v942_v47, 30  ;;  %v5118_v17 = vsel %vm708_vm8, %v704_v45, 1326507024  ;;  %v5129_v27 = vshll.u32 %v7277_v53, %v5102_v57 }
 0x149   :  { %7282 = vst [vmem:[#allocation30_spill] sm:$0xff] %v5111_v32  ;;  %7283 = vst [vmem:[#allocation31_spill] sm:$0xff] %v5118_v17  ;;  %v1208_v23 = vsub.s32 32, %v1207_v29  ;;  %v988_v21 = vand.u32 2139095040, %v5099_v42  ;;  %v5122_v9 = vshrl.u32 %v581_v59, 5  ;;  %v5125_v55 = vsub.s32 32, %v5102_v57 }
 0x14a   :  { %v944_v58 = vshll.u32 %v5114_v0, 30  ;;  %v862_v12 = vsel %vm779_vm15, %v861_v56, %v860_v48  ;;  %v7285_v8 = vmov 2475754826   ;;  %v7286_v24 = vmov 2131351028  }
 0x14b   :  { %7284 = vst [vmem:[#allocation32_spill] sm:$0xff] %v5125_v55  ;;  %v1211_v2 = vshrl.u32 %v7285_v8, %v1208_v23  ;;  %v1214_v45 = vshrl.u32 %v7286_v24, %v1208_v23  ;;  %v544_v47 = vmul.f32 %v4777_v22, %v499_v37  ;;  %v3755_v59 = vmin.u32 %v1155_v10, %v5092_v6 }
 0x14c   :  { %v5138_v33 = vsub.s32 %v941_v3, %v944_v58  ;;  %v1210_v14 = vshll.u32 %v7166_v46, %v1207_v29  ;;  %v1213_v49 = vshll.u32 %v7285_v8, %v1207_v29  ;;  %v7287_v61 = vand.u32 2147483647, %v5038_v39 }
 0x14d   :  { %v1206_v38 = vshrl.u32 %v1205_v34, 5  ;;  %v1217_v48 = vshrl.u32 %v7277_v53, %v1208_v23  ;;  %v989_v56 = vshrl.u32 %v988_v21, 23  ;;  %v1216_v37 = vshll.u32 %v7286_v24, %v1207_v29 }
 0x14e   :  { %v1200_v13 = vand.u32 8388607, %v7287_v61  ;;  %v947_v25 = vsub.s32 0, %v5138_v33  ;;  %v1212_v32 = vor.u32 %v1211_v2, %v1210_v14  ;;  %v1215_v30 = vor.u32 %v1214_v45, %v1213_v49 }
 0x14f   :  { %v1219_v3 = vshll.u32 %v7277_v53, %v1207_v29  ;;  %v7288_v10 = vmov 920167782   ;;  %v1223_v17 = vshrl.u32 %v7267_v16, %v1208_v23  ;;  %v1157_v14 = vclz %v3755_v59 }
 0x150   :  { %v1220_v58 = vshrl.u32 %v7288_v10, %v1208_v23  ;;  %v1222_v46 = vshll.u32 %v7288_v10, %v1207_v29  ;;  %v596_v61 = vshrl.u32 %v7288_v10, %v5125_v55  ;;  %v5157_v34 = vshll.u32 %v7288_v10, %v5102_v57 }
 0x151   :  { %v3747_v49 = vmin.u32 %v947_v25, %v5138_v33  ;;  %v5163_v21 = vsel %vm5031_vm1, %v4784_v28, %v862_v12  ;;  %v1218_v29 = vor.u32 %v1217_v48, %v1216_v37  ;;  %v1201_v43 = vor.u32 8388608, %v1200_v13 }
 0x152   :  { %v1221_v2 = vor.u32 %v1220_v58, %v1219_v3  ;;  %v1224_v45 = vor.u32 %v1223_v17, %v1222_v46  ;;  %vm1225_vm9 = vcmp.lt.s32.totalorder %v1206_v38, 1  ;;  %vm1228_vm10 = vcmp.lt.s32.totalorder %v1206_v38, 4  ;;  %v5170_v17 = vpop.permute.xlu1 %199 }
 0x153   :  { %v949_v41 = vclz %v3747_v49  ;;  %v1233_v57 = vsel %vm1225_vm9, %v1212_v32, %v1215_v30  ;;  %v3750_v51 = vadd.s32 4294967169, %v989_v56  ;;  %v5167_v59 = vadd.f32 %v544_v47, %v460_v60  ;;  %7290 = vst [vmem:[#allocation34_spill] sm:$0xff] %v5170_v17 }
 0x154   :  { %v3756_v25 = vadd.s32 4294967294, %v1157_v14  ;;  %vm1227_vm11 = vcmp.lt.s32.totalorder %v1206_v38, 3  ;;  %v1234_v52 = vsel %vm1228_vm10, %v1221_v2, 920167782  ;;  %vm1226_vm12 = vcmp.lt.s32.totalorder %v1206_v38, 2 }
 0x155   :  { %7289 = vst [vmem:[#allocation33_spill] sm:$0xff] %v5167_v59  ;;  %v3748_v31 = vadd.s32 4294967294, %v949_v41  ;;  %v1230_v12 = vsel %vm1228_vm10, %v1218_v29, 2102212464  ;;  %v1235_v48 = vsel %vm1227_vm11, %v1218_v29, %v1234_v52  ;;  %v1238_v46 = vsel %vm1228_vm10, %v1224_v45, 1326507024 }
 0x156   :  { %v7291_v13 = vmov 683565275   ;;  %v1236_v3 = vsel %vm1226_vm12, %v1233_v57, %v1235_v48  ;;  %v1237_v56 = vsel %vm1225_vm9, %v1215_v30, %v1218_v29  ;;  %v1239_v47 = vsel %vm1227_vm11, %v1221_v2, %v1238_v46 }
 0x157   :  { %vm3749_vm13 = vcmp.lt.s32.totalorder %v3748_v31, 0  ;;  %v1209_v37 = vshrl.u32 %v7291_v13, %v1208_v23  ;;  %v1241_v41 = vshll.u32 %v1201_v43, 8  ;;  %v995_v58 = vadd.s32 1, %v3750_v51 }
 0x158   :  { %v952_v60 = vsel %vm3749_vm13, 0, %v3748_v31  ;;  %vm3757_vm14 = vcmp.lt.s32.totalorder %v3756_v25, 0  ;;  %v1231_v45 = vsel %vm1227_vm11, %v1215_v30, %v1230_v12  ;;  %v1240_v52 = vsel %vm1226_vm12, %v1237_v56, %v1239_v47  ;;  %v5196_v12 = vpop.permute.xlu1 %204 }
 0x159   :  { %v957_v14 = vsub.s32 4294967266, %v952_v60  ;;  %v1229_v49 = vsel %vm1225_vm9, %v1209_v37, %v1212_v32  ;;  %v5179_v1 = vmul.u32.u64.low %v1241_v41, %v1236_v3  ;;  %v5180_v44 = vmul.u32.u64.high %v1241_v41, %v1236_v3, %v5179_v1 }
 0x15a   :  { %v7292_v57 = vand.u32 2147483647, %v5099_v42  ;;  %v5187_v31 = vshrl.u32 %v7267_v16, %v5125_v55  ;;  %v5189_v51 = vmul.u32.u64.low %v1241_v41, %v1240_v52  ;;  %v5190_v43 = vmul.u32.u64.high %v1241_v41, %v1240_v52, %v5189_v51 }
 0x15b   :  { %v1300_v32 = vand.u32 2139095040, %v5167_v59  ;;  %v5193_v29 = vsel %vm3757_vm14, 0, %v3756_v25  ;;  %v953_v30 = vsub.s32 32, %v952_v60  ;;  %v1232_v2 = vsel %vm1226_vm12, %v1229_v49, %v1231_v45 }
 0x15c   :  { %v992_v23 = vand.u32 8388607, %v7292_v57  ;;  %vm996_vm15 = vcmp.gt.s32.totalorder %v995_v58, 0  ;;  %4325 = vcosq.f32 %v5163_v21  ;;  %v5200_v48 = vor.u32 %v596_v61, %v5129_v27 }
 0x15d   :  { %v958_v46 = vadd.s32 127, %v957_v14  ;;  %v997_v37 = vsel %vm996_vm15, %v995_v58, 0  ;;  %v937_v3 = vadd.s32 %v5045_v40, %v5069_v63  ;;  %v1251_v56 = vadd.s32 1, %v5180_v44 }
 0x15e   :  { %7293 = vst [vmem:[#allocation35_spill] sm:$0xff] %v5200_v48  ;;  %v993_v25 = vor.u32 8388608, %v992_v23  ;;  %v999_v47 = vand.u32 31, %v997_v37  ;;  %v1165_v38 = vsub.s32 4294967266, %v5193_v29  ;;  %v954_v49 = vshll.u32 %v5138_v33, %v952_v60 }
 0x15f   :  { %v1248_v45 = vmul.u32 %v1241_v41, %v1232_v2  ;;  %vm1250_vm0 = vc.u32 %v5190_v43, %v5179_v1  ;;  %v955_v52 = vshrl.u32 %v937_v3, %v953_v30  ;;  %v1301_v58 = vshrl.u32 %v1300_v32, 23  ;;  %v5217_v41 = vpop.permute.xlu1 %306 }
 0x160   :  { %v1252_v27 = vsel %vm1250_vm0, %v1251_v56, %v5180_v44  ;;  %v1000_v61 = vsub.s32 32, %v999_v47  ;;  %v959_v14 = vshll.u32 %v958_v46, 23  ;;  %v5210_v40 = vshrl.u32 %v997_v37, 5 }
 0x161   :  { %v1253_v57 = vadd.s32 %v1252_v27, %v1248_v45  ;;  %v1002_v63 = vshll.u32 %v7291_v13, %v999_v47  ;;  %v1005_v51 = vshll.u32 %v7285_v8, %v999_v47  ;;  %v1008_v44 = vshll.u32 %v7286_v24, %v999_v47 }
 0x162   :  { %v1003_v23 = vshrl.u32 %v7285_v8, %v1000_v61  ;;  %v1006_v33 = vshrl.u32 %v7286_v24, %v1000_v61  ;;  %v1009_v60 = vshrl.u32 %v7277_v53, %v1000_v61  ;;  %v1011_v32 = vshll.u32 %v7277_v53, %v999_v47 }
 0x163   :  { %v1254_v30 = vadd.s32 536870912, %v1253_v57  ;;  %v1012_v2 = vshrl.u32 %v7288_v10, %v1000_v61  ;;  %v956_v46 = vor.u32 %v955_v52, %v954_v49  ;;  %v1015_v56 = vshrl.u32 %v7267_v16, %v1000_v61 }
 0x164   :  { %v1004_v37 = vor.u32 %v1003_v23, %v1002_v63  ;;  %v1007_v3 = vor.u32 %v1006_v33, %v1005_v51  ;;  %v1010_v27 = vor.u32 %v1009_v60, %v1008_v44  ;;  %v1014_v42 = vshll.u32 %v7288_v10, %v999_v47 }
 0x165   :  { %v5223_v45 = vshrl.u32 %v1254_v30, 30  ;;  %v1013_v55 = vor.u32 %v1012_v2, %v1011_v32  ;;  %4327 = vsinq.f32 %v5163_v21  ;;  %v1166_v39 = vadd.s32 127, %v1165_v38  ;;  %v5238_v38 = vpop.permute.xlu1 %310 }
 0x166   :  { %v960_v50 = vor.u32 4788187, %v959_v14  ;;  %v5227_v28 = vshll.u32 %v993_v25, 8  ;;  %v5229_v17 = vpop.eup %4325  ;;  %v1016_v52 = vor.u32 %v1015_v56, %v1014_v42  ;;  %vm1017_vm1 = vcmp.lt.s32.totalorder %v5210_v40, 1 }
 0x167   :  { %7294 = vst [vmem:[#allocation36_spill] sm:$0xff] %v5223_v45  ;;  %v1256_v49 = vshll.u32 %v5223_v45, 30  ;;  %vm1020_vm2 = vcmp.lt.s32.totalorder %v5210_v40, 4  ;;  %v963_v63 = vcvt.s32.f32 %v956_v46  ;;  %v1025_v23 = vsel %vm1017_vm1, %v1004_v37, %v1007_v3  ;;  %v503_v45 = vpop.permute.xlu0 %502 }
 0x168   :  { %v1026_v21 = vsel %vm1020_vm2, %v1013_v55, 920167782  ;;  %v3762_v47 = vadd.s32 4294967169, %v1301_v58  ;;  %v1001_v14 = vshrl.u32 %v7291_v13, %v1000_v61  ;;  %vm1019_vm3 = vcmp.lt.s32.totalorder %v5210_v40, 3 }
 0x169   :  { %v5240_v25 = vsub.s32 %v1253_v57, %v1256_v49  ;;  %v1022_v42 = vsel %vm1020_vm2, %v1010_v27, 2102212464  ;;  %v961_v51 = vand.u32 2147483647, %v960_v50  ;;  %vm1018_vm4 = vcmp.lt.s32.totalorder %v5210_v40, 2 }
 0x16a   :  { %v1027_v33 = vsel %vm1019_vm3, %v1010_v27, %v1026_v21  ;;  %v1029_v60 = vsel %vm1017_vm1, %v1007_v3, %v1010_v27  ;;  %vm604_vm5 = vcmp.lt.s32.totalorder %v5122_v9, 4  ;;  %vm883_vm6 = vcmp.lt.s32.totalorder %v4902_v18, 0 }
 0x16b   :  { %v1259_v58 = vsub.s32 0, %v5240_v25  ;;  %v1021_v61 = vsel %vm1017_vm1, %v1001_v14, %v1004_v37  ;;  %v1028_v57 = vsel %vm1018_vm4, %v1025_v23, %v1027_v33  ;;  %v1030_v50 = vsel %vm1020_vm2, %v1016_v52, 1326507024  ;;  %v5279_v14 = vpop.permute.xlu1 %402 }
 0x16c   :  { %v1023_v30 = vsel %vm1019_vm3, %v1007_v3, %v1022_v42  ;;  %v1031_v44 = vsel %vm1019_vm3, %v1013_v55, %v1030_v50  ;;  %v5259_v32 = vmul.u32.u64.low %v5227_v28, %v1028_v57  ;;  %v5260_v2 = vmul.u32.u64.high %v5227_v28, %v1028_v57, %v5259_v32 }
 0x16d   :  { %vm876_vm7 = vcmp.eq.s32.totalorder %v5106_v26, 2  ;;  %v3759_v46 = vmin.u32 %v1259_v58, %v5240_v25  ;;  %v1032_v37 = vsel %vm1018_vm4, %v1029_v60, %v1031_v44  ;;  %v7191_v56 = vand.u32 2147483647, %v5167_v59 }
 0x16e   :  { %v1307_v27 = vadd.s32 1, %v3762_v47  ;;  %v1161_v49 = vsub.s32 32, %v5193_v29  ;;  %v7295_v3 = vand.u32 2147483647, %v4902_v18  ;;  %v964_v52 = vmul.f32 %v963_v63, %v961_v51 }
 0x16f   :  { %v5276_v23 = vmul.u32.u64.low %v5227_v28, %v1032_v37  ;;  %v5277_v21 = vmul.u32.u64.high %v5227_v28, %v1032_v37, %v5276_v23  ;;  %v1167_v42 = vshll.u32 %v1166_v39, 23  ;;  %v1261_v33 = vclz %v3759_v46  ;;  %v5283_v60 = vpop.eup %4327 }
 0x170   :  { %vm5271_vm9 = vcmp.le.f32.partialorder %v7295_v3, 0.7853982  ;;  %v1024_v47 = vsel %vm1018_vm4, %v1021_v61, %v1023_v30  ;;  %vm1308_vm10 = vcmp.gt.s32.totalorder %v1307_v27, 0  ;;  %v967_v58 = vsub.s32 4, %v5114_v0 }
 0x171   :  { %v1043_v57 = vadd.s32 1, %v5260_v2  ;;  %v1309_v50 = vsel %vm1308_vm10, %v1307_v27, 0  ;;  %v239_v63 = vmul.f32 %v4742_v5, %v5151_v19  ;;  %v1145_v51 = vadd.s32 %v4994_v62, %v4990_v7 }
 0x172   :  { %v3760_v44 = vadd.s32 4294967294, %v1261_v33  ;;  %v1304_v39 = vand.u32 8388607, %v7191_v56  ;;  %v1311_v40 = vand.u32 31, %v1309_v50  ;;  %v877_v61 = vxor.u32 2147483648, %v5229_v17  ;;  %v5312_v33 = vpop.permute.xlu1 %410 }
 0x173   :  { %v965_v30 = vxor.u32 2147483648, %v964_v52  ;;  %v1040_v46 = vmul.u32 %v5227_v28, %v1024_v47  ;;  %vm1042_vm11 = vc.u32 %v5277_v21, %v5259_v32  ;;  %v1163_v19 = vshrl.u32 %v1145_v51, %v1161_v49  ;;  %7299 = vst [vmem:[#allocation38_spill] sm:$0xff] %v5312_v33 }
 0x174   :  { %v5299_v27 = vor.u32 4788187, %v1167_v42  ;;  %v1044_v7 = vsel %vm1042_vm11, %v1043_v57, %v5260_v2  ;;  %v5305_v62 = vsel %vm604_vm5, %v5200_v48, 920167782  ;;  %v5310_v28 = vsel %vm883_vm6, %v967_v58, %v5114_v0  ;;  %v5327_v57 = vld [vmem:[%s7136_s5] ss:$0 sm:$0xff] }
 0x175   :  { %7298 = vst [vmem:[#allocation37_spill] sm:$0xff] %v5305_v62  ;;  %v1045_v3 = vadd.s32 %v1044_v7, %v1040_v46  ;;  %v1312_v23 = vsub.s32 32, %v1311_v40  ;;  %v1162_v42 = vshll.u32 %v5092_v6, %v5193_v29  ;;  %vm3761_vm12 = vcmp.lt.s32.totalorder %v3760_v44, 0 }
 0x176   :  { %v1305_v2 = vor.u32 8388608, %v1304_v39  ;;  %v5320_v47 = vsel %vm876_vm7, %v877_v61, %v5283_v60  ;;  %v966_v0 = vsel %vm883_vm6, %v965_v30, %v964_v52  ;;  %v261_v51 = vadd.f32 %v5327_v57, %v239_v63  ;;  %v5356_v37 = vpop.permute.xlu1 %414 }
 0x177   :  { %v1046_v58 = vadd.s32 536870912, %v1045_v3  ;;  %v5330_v46 = vor.u32 %v1163_v19, %v1162_v42  ;;  %v5338_v39 = vadd.s32 %v5179_v1, %v5190_v43  ;;  %v5340_v52 = vsel %vm3761_vm12, 0, %v3760_v44 }
 0x178   :  { %v1315_v30 = vshrl.u32 %v7285_v8, %v1312_v23  ;;  %v1318_v63 = vshrl.u32 %v7286_v24, %v1312_v23  ;;  %v969_v19 = vsel %vm5271_vm9, %v4902_v18, %v966_v0  ;;  %v1310_v7 = vshrl.u32 %v1309_v50, 5 }
 0x179   :  { %v5342_v61 = vshrl.u32 %v1046_v58, 30  ;;  %v1314_v42 = vshll.u32 %v7291_v13, %v1311_v40  ;;  %v5350_v56 = vshll.u32 %v1305_v2, 8  ;;  %v1317_v43 = vshll.u32 %v7285_v8, %v1311_v40 }
 0x17a   :  { %v1320_v44 = vshll.u32 %v7286_v24, %v1311_v40  ;;  %v1321_v58 = vshrl.u32 %v7277_v53, %v1312_v23  ;;  %v1269_v29 = vsub.s32 4294967266, %v5340_v52  ;;  %v1323_v6 = vshll.u32 %v7277_v53, %v1311_v40 }
 0x17b   :  { %7300 = vst [vmem:[#allocation39_spill] sm:$0xff] %v5342_v61  ;;  %v1048_v1 = vshll.u32 %v5342_v61, 30  ;;  %v1324_v50 = vshrl.u32 %v7288_v10, %v1312_v23  ;;  %v242_v2 = vmul.f32 %v4742_v5, %v5196_v12  ;;  %v1316_v49 = vor.u32 %v1315_v30, %v1314_v42 }
 0x17c   :  { %v1319_v62 = vor.u32 %v1318_v63, %v1317_v43  ;;  %v1322_v48 = vor.u32 %v1321_v58, %v1320_v44  ;;  %v1326_v24 = vshll.u32 %v7288_v10, %v1311_v40  ;;  %v1327_v59 = vshrl.u32 %v7267_v16, %v1312_v23 }
 0x17d   :  { %v5363_v0 = vsub.s32 %v1045_v3, %v1048_v1  ;;  %v1325_v8 = vor.u32 %v1324_v50, %v1323_v6  ;;  %v346_v61 = vmul.f32 %v4753_v11, %v5217_v41  ;;  %v1313_v33 = vshrl.u32 %v7291_v13, %v1312_v23  ;;  %v507_v41 = vpop.permute.xlu1 %506 }
 0x17e   :  { %vm1332_vm13 = vcmp.lt.s32.totalorder %v1310_v7, 4  ;;  %v545_v12 = vmul.f32 %v4777_v22, %v503_v45  ;;  %v1270_v3 = vadd.s32 127, %v1269_v29  ;;  %v1328_v30 = vor.u32 %v1327_v59, %v1326_v24 }
 0x17f   :  { %v1051_v53 = vsub.s32 0, %v5363_v0  ;;  %vm1329_vm14 = vcmp.lt.s32.totalorder %v1310_v7, 1  ;;  %v1334_v6 = vsel %vm1332_vm13, %v1322_v48, 2102212464  ;;  %vm1331_vm15 = vcmp.lt.s32.totalorder %v1310_v7, 3 }
 0x180   :  { %v1337_v63 = vsel %vm1329_vm14, %v1316_v49, %v1319_v62  ;;  %v1338_v42 = vsel %vm1332_vm13, %v1325_v8, 920167782  ;;  %vm1330_vm0 = vcmp.lt.s32.totalorder %v1310_v7, 2  ;;  %v1333_v1 = vsel %vm1329_vm14, %v1313_v33, %v1316_v49 }
 0x181   :  { %v3751_v40 = vmin.u32 %v1051_v53, %v5363_v0  ;;  %v1339_v43 = vsel %vm1331_vm15, %v1322_v48, %v1338_v42  ;;  %v1341_v44 = vsel %vm1329_vm14, %v1319_v62, %v1322_v48  ;;  %v1335_v58 = vsel %vm1331_vm15, %v1319_v62, %v1334_v6 }
 0x182   :  { %v1340_v45 = vsel %vm1330_vm0, %v1337_v63, %v1339_v43  ;;  %v1342_v24 = vsel %vm1332_vm13, %v1328_v30, 1326507024  ;;  %vm873_vm1 = vcmp.eq.s32.totalorder %v5106_v26, 0  ;;  %v361_v50 = vadd.f32 %v4931_v36, %v261_v51  ;;  %v5394_v51 = vpop.permute.xlu1 %510 }
 0x183   :  { %v1053_v23 = vclz %v3751_v40  ;;  %v1343_v59 = vsel %vm1331_vm15, %v1325_v8, %v1342_v24  ;;  %v5379_v53 = vmul.u32.u64.low %v5350_v56, %v1340_v45  ;;  %v5380_v29 = vmul.u32.u64.high %v5350_v56, %v1340_v45, %v5379_v53 }
 0x184   :  { %v1265_v33 = vsub.s32 32, %v5340_v52  ;;  %v1344_v48 = vsel %vm1330_vm0, %v1341_v44, %v1343_v59  ;;  %v445_v62 = vmul.f32 %v4765_v15, %v5279_v14  ;;  %v1336_v30 = vsel %vm1330_vm0, %v1333_v1, %v1335_v58  ;;  %v515_v44 = vpop.permute.xlu0 %514 }
 0x185   :  { %v3752_v49 = vadd.s32 4294967294, %v1053_v23  ;;  %v5390_v6 = vmul.u32.u64.low %v5350_v56, %v1344_v48  ;;  %v5391_v8 = vmul.u32.u64.high %v5350_v56, %v1344_v48, %v5390_v6  ;;  %v264_v40 = vadd.f32 %v5327_v57, %v242_v2 }
 0x186   :  { %4329 = vcosq.f32 %v969_v19  ;;  %v1271_v63 = vshll.u32 %v1270_v3, 23  ;;  %v461_v36 = vadd.f32 %v445_v62, %v361_v50  ;;  %vm872_vm3 = vcmp.lt.s32.totalorder %v5106_v26, 2 }
 0x187   :  { %vm3753_vm2 = vcmp.lt.s32.totalorder %v3752_v49, 0  ;;  %4331 = vsinq.f32 %v969_v19  ;;  %v1355_v14 = vadd.s32 1, %v5380_v29  ;;  %v362_v7 = vadd.f32 %v346_v61, %v4906_v54 }
 0x188   :  { %v5397_v42 = vsel %vm3753_vm2, 0, %v3752_v49  ;;  %v1267_v1 = vshrl.u32 %v5338_v39, %v1265_v33  ;;  %v1352_v2 = vmul.u32 %v5350_v56, %v1336_v30  ;;  %v5404_v3 = vadd.f32 %v545_v12, %v461_v36 }
 0x189   :  { %v1061_v43 = vsub.s32 4294967266, %v5397_v42  ;;  %vm1354_vm4 = vc.u32 %v5391_v8, %v5379_v53  ;;  %v548_v19 = vmul.f32 %v4777_v22, %v515_v44  ;;  %v364_v23 = vadd.f32 %v4938_v20, %v264_v40 }
 0x18a   :  { %7301 = vst [vmem:[#allocation40_spill] sm:$0xff] %v5404_v3  ;;  %v448_v58 = vmul.f32 %v4765_v15, %v5356_v37  ;;  %v1266_v54 = vshll.u32 %v5240_v25, %v5340_v52  ;;  %v1272_v39 = vor.u32 4788187, %v1271_v63  ;;  %v1356_v61 = vsel %vm1354_vm4, %v1355_v14, %v5380_v29  ;;  %v5424_v52 = vpop.permute.xlu1 %209 }
 0x18b   :  { %v1404_v56 = vand.u32 2139095040, %v5404_v3  ;;  %v1062_v12 = vadd.s32 127, %v1061_v43  ;;  %v1357_v45 = vadd.s32 %v1356_v61, %v1352_v2  ;;  %v462_v59 = vadd.f32 %v4964_v35, %v362_v7  ;;  %v7309_v43 = vld [vmem:[#allocation13_spill] sm:$0xff] }
 0x18c   :  { %v464_v24 = vadd.f32 %v448_v58, %v364_v23  ;;  %v7302_v50 = vxor.u32 2147483648, %v5283_v60  ;;  %v1171_v37 = vcvt.s32.f32 %v5330_v46  ;;  %v546_v25 = vmul.f32 %v4777_v22, %v507_v41 }
 0x18d   :  { %v1405_v33 = vshrl.u32 %v1404_v56, 23  ;;  %vm1091_vm6 = vcmp.lt.s32.totalorder %v4888_v4, 0  ;;  %v1268_v29 = vor.u32 %v1267_v1, %v1266_v54  ;;  %v1057_v49 = vsub.s32 32, %v5397_v42 }
 0x18e   :  { %v875_v20 = vsel %vm873_vm1, %v5229_v17, %v7302_v50  ;;  %v1358_v48 = vadd.s32 536870912, %v1357_v45  ;;  %v5428_v35 = vadd.f32 %v548_v19, %v464_v24  ;;  %v7304_v60 = vand.u32 2147483647, %v5299_v27 }
 0x18f   :  { %v7305_v17 = vsel %vm5271_vm9, 0, %v5310_v28  ;;  %v1041_v41 = vadd.s32 %v5259_v32, %v5277_v21  ;;  %v3766_v30 = vadd.s32 4294967169, %v1405_v33  ;;  %v1273_v6 = vand.u32 2147483647, %v1272_v39  ;;  %v7307_v32 = vld [vmem:[#allocation34_spill] sm:$0xff]  ;;  %v5465_v39 = vpop.permute.xlu1 %219  ;;  %v7313_v33 = vld [vmem:[#allocation23_spill] sm:$0xff] }
 0x190   :  { %7303 = vst [vmem:[#allocation41_spill] sm:$0xff] %v5428_v35  ;;  %v1172_v62 = vmul.f32 %v1171_v37, %v7304_v60  ;;  %v974_v46 = vadd.s32 3, %v7305_v17  ;;  %v1063_v40 = vshll.u32 %v1062_v12, 23  ;;  %v5438_v63 = vshrl.u32 %v1358_v48, 30  ;;  %v4330_v14 = vpop.eup %4329  ;;  %v7314_v60 = vld [vmem:[#allocation38_spill] sm:$0xff] }
 0x191   :  { %v1716_v36 = vand.u32 2139095040, %v5428_v35  ;;  %v879_v27 = vsel %vm872_vm3, %v875_v20, %v5320_v47  ;;  %v7306_v55 = vor.u32 %v5187_v31, %v5157_v34  ;;  %v241_v21 = vmul.f32 %v4742_v5, %v7307_v32  ;;  %v4332_v1 = vpop.eup %4331 }
 0x192   :  { %v5453_v7 = vadd.f32 %v546_v25, %v462_v59  ;;  %vm869_vm7 = vweird.f32 %v7309_v43  ;;  %v1275_v2 = vcvt.s32.f32 %v1268_v29  ;;  %v1059_v44 = vshrl.u32 %v1041_v41, %v1057_v49 }
 0x193   :  { %v5449_v28 = vsel %vm604_vm5, %v7306_v55, 1326507024  ;;  %v1360_v26 = vshll.u32 %v5438_v63, 30  ;;  %v1717_v47 = vshrl.u32 %v1716_v36, 23  ;;  %v7310_v19 = vand.u32 2147483647, %v4888_v4 }
 0x194   :  { %7308 = vst [vmem:[#allocation34_spill] sm:$0xff] %v5453_v7  ;;  %v1173_v31 = vxor.u32 2147483648, %v1172_v62  ;;  %v975_v23 = vand.u32 3, %v974_v46  ;;  %v347_v58 = vmul.f32 %v4753_v11, %v5238_v38  ;;  %v1411_v54 = vadd.s32 1, %v3766_v30 }
 0x195   :  { %vm5459_vm9 = vcmp.le.f32.partialorder %v7310_v19, 0.7853982  ;;  %v1276_v61 = vmul.f32 %v1275_v2, %v1273_v6  ;;  %v1058_v56 = vshll.u32 %v5363_v0, %v5397_v42  ;;  %v1064_v12 = vor.u32 4788187, %v1063_v40  ;;  %v5480_v40 = vpop.permute.xlu1 %224 }
 0x196   :  { %v5469_v24 = vsub.s32 %v1357_v45, %v1360_v26  ;;  %v978_v59 = vxor.u32 2147483648, %v4332_v1  ;;  %v981_v50 = vxor.u32 2147483648, %v4330_v14  ;;  %v3778_v20 = vadd.s32 4294967169, %v1717_v47 }
 0x197   :  { %v1508_v37 = vand.u32 2139095040, %v5453_v7  ;;  %v1175_v25 = vsub.s32 4, %v7313_v33  ;;  %v1060_v29 = vor.u32 %v1059_v44, %v1058_v56  ;;  %v263_v49 = vadd.f32 %v5327_v57, %v241_v21 }
 0x198   :  { %v1363_v38 = vsub.s32 0, %v5469_v24  ;;  %v1174_v48 = vsel %vm1091_vm6, %v1173_v31, %v1172_v62  ;;  %vm973_vm10 = vweird.f32 %v4902_v18  ;;  %vm977_vm11 = vcmp.eq.s32.totalorder %v975_v23, 0  ;;  %v2243_v18 = vld [vmem:[%s7134_s3 + $0x8] sm:$0xff] }
 0x199   :  { %vm980_vm12 = vcmp.eq.s32.totalorder %v975_v23, 2  ;;  %vm1412_vm13 = vcmp.gt.s32.totalorder %v1411_v54, 0  ;;  %v1277_v0 = vxor.u32 2147483648, %v1276_v61  ;;  %v1065_v42 = vand.u32 2147483647, %v1064_v12  ;;  %v7324_v12 = vld [vmem:[#allocation28_spill] sm:$0xff] }
 0x19a   :  { %v363_v45 = vadd.f32 %v347_v58, %v263_v49  ;;  %v447_v17 = vmul.f32 %v4765_v15, %v7314_v60  ;;  %v979_v46 = vsel %vm977_vm11, %v4330_v14, %v978_v59  ;;  %v982_v41 = vsel %vm980_vm12, %v981_v50, %v4332_v1  ;;  %v7316_v1 = vld [vmem:[#allocation22_spill] sm:$0xff] }
 0x19b   :  { %v1723_v30 = vadd.s32 1, %v3778_v20  ;;  %v1509_v6 = vshrl.u32 %v1508_v37, 23  ;;  %v1067_v36 = vcvt.s32.f32 %v1060_v29  ;;  %v3763_v62 = vmin.u32 %v1363_v38, %v5469_v24  ;;  %v7328_v20 = vld [vmem:[#allocation39_spill] sm:$0xff] }
 0x19c   :  { %v1413_v55 = vsel %vm1412_vm13, %v1411_v54, 0  ;;  %v547_v32 = vmul.f32 %v4777_v22, %v5394_v51  ;;  %v5487_v21 = vsel %vm869_vm7, nan, %v879_v27  ;;  %v5492_v14 = vsel %vm1091_vm6, %v1175_v25, %v7313_v33  ;;  %v519_v33 = vpop.permute.xlu0 %518  ;;  %v5522_v25 = vpop.permute.xlu1 %322 }
 0x19d   :  { %7315 = vst [vmem:[#allocation13_spill] sm:$0xff] %v5487_v21  ;;  %vm976_vm14 = vcmp.lt.s32.totalorder %v975_v23, 2  ;;  %vm1195_vm15 = vcmp.lt.s32.totalorder %v7316_v1, 0  ;;  %v1177_v2 = vsel %vm5459_vm9, %v4888_v4, %v1174_v48  ;;  %v1068_v51 = vmul.f32 %v1067_v36, %v1065_v42  ;;  %v7322_v23 = vld [vmem:[#allocation36_spill] sm:$0xff]  ;;  %v7330_v48 = vld [vmem:[#allocation33_spill] sm:$0xff] }
 0x19e   :  { %v1278_v44 = vsel %vm1195_vm15, %v1277_v0, %v1276_v61  ;;  %v463_v26 = vadd.f32 %v447_v17, %v363_v45  ;;  %v983_v43 = vsel %vm976_vm14, %v979_v46, %v982_v41  ;;  %v5500_v27 = vand.u32 31, %v1413_v55  ;;  %v2242_v45 = vld [vmem:[%s7134_s3] sm:$0xff]  ;;  %v2244_v36 = vld [vmem:[%s7134_s3 + $0x10] sm:$0xff] }
 0x19f   :  { %vm1724_vm0 = vcmp.gt.s32.totalorder %v1723_v30, 0  ;;  %v3770_v47 = vadd.s32 4294967169, %v1509_v6  ;;  %v7318_v19 = vand.u32 2147483647, %v7316_v1  ;;  %v7319_v31 = vmov 0 }
 0x1a0   :  { %7317 = vst [vmem:[#allocation23_spill] sm:$0xff] %v5500_v27  ;;  %v1279_v58 = vsub.s32 4, %v7322_v23  ;;  %v1365_v54 = vclz %v3763_v62  ;;  %v5509_v56 = vadd.f32 %v547_v32, %v463_v26  ;;  %v7325_v59 = vand.u32 2147483647, %v7324_v12  ;;  %v2245_v62 = vld [vmem:[%s7134_s3 + $0x18] sm:$0xff] }
 0x1a1   :  { %vm5504_vm1 = vcmp.le.f32.partialorder %v7318_v19, 0.7853982  ;;  %vm987_vm3 = vcmp.lt.s32.totalorder %v7324_v12, 0  ;;  %v1071_v37 = vsub.s32 4, %v7328_v20  ;;  %4333 = vcosq.f32 %v1177_v2  ;;  %v531_v19 = vpop.permute.xlu0 %530 }
 0x1a2   :  { %v7320_v31 = vsel %vm5504_vm1, 4294967295, %v7319_v31  ;;  %7323 = vst [vmem:[#allocation36_spill] sm:$0xff] %v5509_v56  ;;  %v1281_v61 = vsel %vm5504_vm1, %v7316_v1, %v1278_v44  ;;  %vm5516_vm2 = vcmp.le.f32.partialorder %v7325_v59, 0.7853982  ;;  %v5526_v29 = vsel %vm973_vm10, nan, %v983_v43  ;;  %v2247_v59 = vld [vmem:[%s7134_s3 + $0x28] sm:$0xff] }
 0x1a3   :  { %7321 = vst [vmem:[#allocation38_spill] sm:$0xff] %v7320_v31  ;;  %7329 = vst [vmem:[#allocation28_spill] sm:$0xff] %v5526_v29  ;;  %v1069_v38 = vxor.u32 2147483648, %v1068_v51  ;;  %v5528_v49 = vsel %vm1724_vm0, %v1723_v30, 0  ;;  %4335 = vsinq.f32 %v1177_v2  ;;  %vm1299_vm4 = vcmp.lt.s32.totalorder %v7330_v48, 0 }
 0x1a4   :  { %v5532_v0 = vsub.s32 32, %v5500_v27  ;;  %v1515_v42 = vadd.s32 1, %v3770_v47  ;;  %v5543_v60 = vsel %vm1195_vm15, %v1279_v58, %v7322_v23  ;;  %4337 = vcosq.f32 %v1281_v61  ;;  %v5574_v58 = vpop.permute.xlu1 %326 }
 0x1a5   :  { %7332 = vst [vmem:[#allocation33_spill] sm:$0xff] %v5543_v60  ;;  %v3764_v17 = vadd.s32 4294967294, %v1365_v54  ;;  %v1612_v46 = vand.u32 2139095040, %v5509_v56  ;;  %4339 = vsinq.f32 %v1281_v61  ;;  %v5551_v30 = vsel %vm987_vm3, %v1071_v37, %v7328_v20  ;;  %v4292_v20 = vld [vmem:[#allocation5 + $0x8] sm:$0xff]  }
 0x1a6   :  { %7331 = vst [vmem:[#allocation39_spill] sm:$0xff] %v5532_v0  ;;  %v5554_v6 = vand.u32 31, %v5528_v49  ;;  %v1070_v32 = vsel %vm987_vm3, %v1069_v38, %v1068_v51  ;;  %v1383_v2 = vsub.s32 4, %v5438_v63  ;;  %v5566_v44 = vmul.f32 %v4777_v22, %v519_v33 }
 0x1a7   :  { %v2258_v26 = vpack.c.bf16 %v2243_v18, %v2242_v45  ;;  %v5568_v43 = vshrl.u32 %v1413_v55, 5  ;;  %v1428_v47 = vshrl.u32 %v7288_v10, %v5532_v0  ;;  %vm1516_vm6 = vcmp.gt.s32.totalorder %v1515_v42, 0  ;;  %v2246_v55 = vld [vmem:[%s7134_s3 + $0x20] sm:$0xff] }
 0x1a8   :  { %7333 = vst [vmem:[#allocation42_spill] sm:$0xff] %v5554_v6  ;;  %v243_v23 = vmul.f32 %v4742_v5, %v5424_v52  ;;  %vm3765_vm7 = vcmp.lt.s32.totalorder %v3764_v17, 0  ;;  %v1431_v51 = vshrl.u32 %v7267_v16, %v5532_v0  ;;  %v1613_v54 = vshrl.u32 %v1612_v46, 23 }
 0x1a9   :  { %7334 = vst [vmem:[#allocation43_spill] sm:$0xff] %v5568_v43  ;;  %3972 = vmatprep.mubr.bf16.mxu0 %v2258_v26  ;;  %v2259_v61 = vpack.c.bf16 %v2245_v62, %v2244_v36  ;;  %v1073_v52 = vsel %vm5516_vm2, %v7324_v12, %v1070_v32  ;;  %v1353_v37 = vadd.s32 %v5379_v53, %v5391_v8  ;;  %v7335_v33 = vmov 2102212464  }
 0x1aa   :  { %v1427_v38 = vshll.u32 %v7335_v33, %v5500_v27  ;;  %v5592_v45 = vsub.s32 32, %v5554_v6  ;;  %v5597_v18 = vsel %vm1299_vm4, %v1383_v2, %v5438_v63  ;;  %v1430_v46 = vshll.u32 %v7288_v10, %v5500_v27  ;;  %v2248_v63 = vld [vmem:[%s7134_s3 + $0x30] sm:$0xff]  ;;  %v2249_v2 = vld [vmem:[%s7134_s3 + $0x38] sm:$0xff] }
 0x1ab   :  { %7337 = vst [vmem:[#allocation45_spill] sm:$0xff] %v5597_v18  ;;  %v5602_v36 = vmul.f32 %v4777_v22, %v531_v19  ;;  %v1517_v62 = vsel %vm1516_vm6, %v1515_v42, 0  ;;  %3973 = vmatmul.mubr.bf16.vlgmr.msra.gmra.mrb[0].mxu0 %v2259_v61  ;;  %v5606_v53 = vsel %vm3765_vm7, 0, %v3764_v17  ;;  %v265_v32 = vadd.f32 %v5327_v57, %v243_v23  ;;  %v7339_v19 = vld [vmem:[#allocation24_spill] sm:$0xff]  ;;  %v5618_v42 = vpop.eup %4333  ;;  %v2250_v23 = vld [vmem:[%s7134_s3 + $0x40] sm:$0xff]  ;;  %v2251_v61 = vld [vmem:[%s7134_s3 + $0x48] sm:$0xff] }
 0x1ac   :  { %7336 = vst [vmem:[#allocation44_spill] sm:$0xff] %v5592_v45  ;;  %v5608_v8 = vor.u32 %v1428_v47, %v1427_v38  ;;  %v2260_v26 = vpack.c.bf16 %v2247_v59, %v2246_v55  ;;  %3989 = vmatpush3.bf16.msra.mxu0 %v7339_v19  ;;  %7340 = vst [vmem:[#allocation24_spill] sm:$0xff] %v5618_v42  ;;  %4341 = vcosq.f32 %v1073_v52  ;;  %vm1436_vm10 = vcmp.lt.s32.totalorder %v5568_v43, 4  ;;  %v419_v38 = vpop.permute.xlu1 %418 }
 0x1ad   :  { %v1432_v17 = vor.u32 %v1431_v51, %v1430_v46  ;;  %v3774_v47 = vadd.s32 4294967169, %v1613_v54  ;;  %3990 = vmatprep.subr.bf16.mxu0 %v4292_v20  ;;  %v5627_v55 = vpop.eup %4335  ;;  %4343 = vsinq.f32 %v1073_v52  ;;  %v1740_v59 = vshrl.u32 %v7288_v10, %v5592_v45 }
 0x1ae   :  { %7338 = vst [vmem:[#allocation46_spill] sm:$0xff] %v5608_v8  ;;  %v5633_v51 = vshrl.u32 %v7267_v16, %v5592_v45  ;;  %v5635_v54 = vand.u32 31, %v1517_v62  ;;  %3976 = vmatprep.mubr.bf16.mxu0 %v2260_v26  ;;  %v5637_v46 = vpop.eup %4337  ;;  %v1373_v19 = vsub.s32 4294967266, %v5606_v53  ;;  %v5641_v41 = vshrl.u32 %v5528_v49, 5 }
 0x1af   :  { %7342 = vst [vmem:[#allocation48_spill] sm:$0xff] %v5637_v46  ;;  %v1739_v52 = vshll.u32 %v7335_v33, %v5554_v6  ;;  %v2261_v35 = vpack.c.bf16 %v2249_v2, %v2248_v63  ;;  %v5645_v56 = vpop.eup %4339  ;;  %v1369_v45 = vsub.s32 32, %v5606_v53  ;;  %v5651_v26 = vsel %vm1436_vm10, %v5608_v8, 920167782 }
 0x1b0   :  { %7341 = vst [vmem:[#allocation47_spill] sm:$0xff] %v5635_v54  ;;  %7343 = vst [vmem:[#allocation49_spill] sm:$0xff] %v5645_v56  ;;  %v5655_v21 = vshll.u32 %v7288_v10, %v5554_v6  ;;  %v2262_v29 = vpack.c.bf16 %v2251_v61, %v2250_v23  ;;  %3991 = vmatpush3.bf16.msra.mxu0 %v4292_v20  ;;  %v5659_v49 = vsel %vm1436_vm10, %v1432_v17, 1326507024  ;;  %v5661_v63 = vshrl.u32 %v1517_v62, 5  ;;  %v7348_v62 = vld [vmem:[#allocation18_spill] sm:$0xff] }
 0x1b1   :  { %7344 = vst [vmem:[#allocation50_spill] sm:$0xff] %v5651_v26  ;;  %7345 = vst [vmem:[#allocation51_spill] sm:$0xff] %v5659_v49  ;;  %v1619_v2 = vadd.s32 1, %v3774_v47  ;;  %v449_v7 = vmul.f32 %v4765_v15, %v419_v38  ;;  %v1370_v0 = vshll.u32 %v5469_v24, %v5606_v53  ;;  %v5666_v8 = vor.u32 %v1740_v59, %v1739_v52  ;;  %v7349_v61 = vld [vmem:[#allocation17_spill] sm:$0xff]  ;;  %v2252_v59 = vld [vmem:[%s7134_s3 + $0x50] sm:$0xff] }
 0x1b2   :  { %v5671_v23 = vsub.s32 32, %v5635_v54  ;;  %v1374_v20 = vadd.s32 127, %v1373_v19  ;;  %v5675_v17 = vshll.u32 %v7335_v33, %v5635_v54  ;;  %v365_v47 = vadd.f32 %v7348_v62, %v265_v32  ;;  %v2253_v19 = vld [vmem:[%s7134_s3 + $0x58] sm:$0xff] }
 0x1b3   :  { %7346 = vst [vmem:[#allocation52_spill] sm:$0xff] %v5666_v8  ;;  %3977 = vmatmul.mubr.bf16.gmra.mrb[4].mxu0 %v2261_v35  ;;  %v7350_v38 = vand.u32 2147483647, %v7349_v61  ;;  %v1371_v24 = vshrl.u32 %v1353_v37, %v1369_v45  ;;  %v5682_v53 = vshll.u32 %v7288_v10, %v5635_v54  ;;  %v7351_v35 = vld [vmem:[#allocation29_spill] sm:$0xff]  ;;  %v7352_v52 = vld [vmem:[#allocation32_spill] sm:$0xff]  ;;  %vm7244_vm11 = vcmp.lt.s32.totalorder %v5641_v41, 4 }
 0x1b4   :  { %7347 = vst [vmem:[#allocation53_spill] sm:$0xff] %v5671_v23  ;;  %3980 = vmatprep.mubr.bf16.mxu0 %v2262_v29  ;;  %v586_v32 = vshll.u32 %v7291_v13, %v7351_v35  ;;  %v7353_v62 = vmov 2475754826   ;;  %vm1620_vm12 = vcmp.gt.s32.totalorder %v1619_v2, 0  ;;  %v465_v37 = vadd.f32 %v449_v7, %v365_v47  ;;  %v2254_v29 = vld [vmem:[%s7134_s3 + $0x60] sm:$0xff]  ;;  %v2255_v45 = vld [vmem:[%s7134_s3 + $0x68] sm:$0xff] }
 0x1b5   :  { %v576_v26 = vand.u32 8388607, %v7350_v38  ;;  %v587_v38 = vshrl.u32 %v7353_v62, %v7352_v52  ;;  %v589_v6 = vshll.u32 %v7353_v62, %v7351_v35  ;;  %v7354_v54 = vmov 2131351028  }
 0x1b6   :  { %v590_v49 = vshrl.u32 %v7354_v54, %v7352_v52  ;;  %v592_v1 = vshll.u32 %v7354_v54, %v7351_v35  ;;  %v593_v7 = vshrl.u32 %v7335_v33, %v7352_v52  ;;  %v5709_v47 = vpop.eup %4341  ;;  %v1375_v46 = vshll.u32 %v1374_v20, 23 }
 0x1b7   :  { %v577_v43 = vor.u32 8388608, %v576_v26  ;;  %v588_v27 = vor.u32 %v587_v38, %v586_v32  ;;  %v2263_v56 = vpack.c.bf16 %v2253_v19, %v2252_v59  ;;  %vm603_vm13 = vcmp.lt.s32.totalorder %v5122_v9, 3  ;;  %v5712_v18 = vpop.eup %4343  ;;  %v7355_v26 = vld [vmem:[#allocation35_spill] sm:$0xff] }
 0x1b8   :  { %v591_v3 = vor.u32 %v590_v49, %v589_v6  ;;  %v2264_v4 = vpack.c.bf16 %v2255_v45, %v2254_v29  ;;  %v594_v31 = vor.u32 %v593_v7, %v592_v1  ;;  %vm601_vm14 = vcmp.lt.s32.totalorder %v5122_v9, 1  ;;  %v7357_v1 = vld [vmem:[#allocation37_spill] sm:$0xff]  ;;  %v2256_v29 = vld [vmem:[%s7134_s3 + $0x70] sm:$0xff] }
 0x1b9   :  { %v615_v35 = vsel %vm603_vm13, %v7355_v26, %v5449_v28  ;;  %v5720_v32 = vadd.f32 %v5566_v44, %v465_v37  ;;  %v585_v20 = vshrl.u32 %v7291_v13, %v7352_v52  ;;  %vm602_vm15 = vcmp.lt.s32.totalorder %v5122_v9, 2 }
 0x1ba   :  { %v609_v6 = vsel %vm601_vm14, %v588_v27, %v591_v3  ;;  %v606_v49 = vsel %vm604_vm5, %v594_v31, 2102212464  ;;  %v611_v59 = vsel %vm603_vm13, %v594_v31, %v7357_v1  ;;  %v613_v19 = vsel %vm601_vm14, %v591_v3, %v594_v31  ;;  %v2257_v31 = vld [vmem:[%s7134_s3 + $0x78] sm:$0xff]  ;;  %s2601_s3 = sld [smem:[#allocation2]] }
 0x1bb   :  { %7356 = vst [vmem:[#allocation18_spill] sm:$0xff] %v5720_v32  ;;  %v617_v38 = vshll.u32 %v577_v43, 8  ;;  %v5731_v28 = vsel %vm1620_vm12, %v1619_v2, 0  ;;  %3981 = vmatmul.mubr.bf16.gmra.mrb[8].mxu0 %v2263_v56  ;;  %v605_v44 = vsel %vm601_vm14, %v585_v20, %v588_v27  ;;  %v612_v52 = vsel %vm602_vm15, %v609_v6, %v611_v59  ;;  %v7358_v2 = vld [vmem:[#allocation14_spill] sm:$0xff] }
 0x1bc   :  { %v616_v37 = vsel %vm602_vm15, %v613_v19, %v615_v35  ;;  %3984 = vmatprep.mubr.bf16.mxu0 %v2264_v4  ;;  %v607_v43 = vsel %vm603_vm13, %v591_v3, %v606_v49  ;;  %v7235_v45 = vand.u32 2147483647, %v7358_v2  ;;  %v5749_v7 = vor.u32 %v1371_v24, %v1370_v0  ;;  %v7360_v0 = vld [vmem:[#allocation21_spill] sm:$0xff] }
 0x1bd   :  { %v5745_v56 = vmul.u32.u64.low %v617_v38, %v616_v37  ;;  %v5746_v27 = vmul.u32.u64.high %v617_v38, %v616_v37, %v5745_v56  ;;  %v1820_v4 = vand.u32 2139095040, %v5720_v32  ;;  %v5759_v20 = vsel %vm7244_vm11, %v5666_v8, 920167782  ;;  %v7361_v37 = vld [vmem:[#allocation20_spill] sm:$0xff] }
 0x1be   :  { %v5752_v26 = vmul.u32.u64.low %v617_v38, %v612_v52  ;;  %v5753_v35 = vmul.u32.u64.high %v617_v38, %v612_v52, %v5752_v26  ;;  %7359 = vst [vmem:[#allocation17_spill] sm:$0xff] %v5759_v20  ;;  %v5763_v3 = vshrl.u32 %v7288_v10, %v5671_v23  ;;  %v5766_v6 = vand.u32 31, %v5731_v28 }
 0x1bf   :  { %v691_v24 = vshrl.u32 %v7353_v62, %v7360_v0  ;;  %v1376_v49 = vor.u32 4788187, %v1375_v46  ;;  %v2265_v1 = vpack.c.bf16 %v2257_v31, %v2256_v29  ;;  %v608_v59 = vsel %vm602_vm15, %v605_v44, %v607_v43  ;;  %v5790_v43 = vpop.permute.xlu1 %426 }
 0x1c0   :  { %v694_v19 = vshrl.u32 %v7354_v54, %v7360_v0  ;;  %vm626_vm5 = vc.u32 %v5746_v27, %v5752_v26  ;;  %v680_v52 = vand.u32 8388607, %v7235_v45  ;;  %v690_v56 = vshll.u32 %v7291_v13, %v7361_v37 }
 0x1c1   :  { %v693_v32 = vshll.u32 %v7353_v62, %v7361_v37  ;;  %v1379_v46 = vcvt.s32.f32 %v5749_v7  ;;  %v5785_v9 = vshrl.u32 %v7267_v16, %v5671_v23  ;;  %v1821_v44 = vshrl.u32 %v1820_v4, 23 }
 0x1c2   :  { %v627_v29 = vadd.s32 1, %v5753_v35  ;;  %v246_v31 = vmul.f32 %v4742_v5, %v5480_v40  ;;  %v624_v45 = vmul.u32 %v617_v38, %v608_v59  ;;  %v692_v8 = vor.u32 %v691_v24, %v690_v56  ;;  %v7362_v59 = vld [vmem:[#allocation25_spill] sm:$0xff]  ;;  %v7364_v56 = vld [vmem:[#allocation26_spill] sm:$0xff] }
 0x1c3   :  { %v695_v20 = vor.u32 %v694_v19, %v693_v32  ;;  %v5793_v60 = vsub.s32 32, %v5766_v6  ;;  %3985 = vmatmul.mubr.bf16.gmra.mrb[12].mxu0 %v2265_v1  ;;  %v696_v23 = vshll.u32 %v7354_v54, %v7361_v37  ;;  %v697_v4 = vshrl.u32 %v7335_v33, %v7360_v0  ;;  %v7363_v37 = vld [vmem:[#allocation31_spill] sm:$0xff] }
 0x1c4   :  { %v628_v7 = vsel %vm626_vm5, %v627_v29, %v5753_v35  ;;  %v1377_v62 = vand.u32 2147483647, %v1376_v49  ;;  %v350_v40 = vmul.f32 %v4753_v11, %v5522_v25  ;;  %v681_v38 = vor.u32 8388608, %v680_v52  ;;  %v7366_v29 = vld [vmem:[#allocation16_spill] sm:$0xff] }
 0x1c5   :  { %v629_v42 = vadd.s32 %v628_v7, %v624_v45  ;;  %v3782_v24 = vadd.s32 4294967169, %v1821_v44  ;;  %v698_v32 = vor.u32 %v697_v4, %v696_v23  ;;  %vm705_vm0 = vcmp.lt.s32.totalorder %v7362_v59, 1  ;;  %v7365_v45 = vld [vmem:[#allocation30_spill] sm:$0xff] }
 0x1c6   :  { %vm707_vm3 = vcmp.lt.s32.totalorder %v7362_v59, 3  ;;  %v268_v35 = vadd.f32 %v5327_v57, %v246_v31  ;;  %v713_v19 = vsel %vm705_vm0, %v692_v8, %v695_v20  ;;  %v689_v25 = vshrl.u32 %v7291_v13, %v7360_v0 }
 0x1c7   :  { %v630_v1 = vadd.s32 536870912, %v629_v42  ;;  %v719_v49 = vsel %vm707_vm3, %v7364_v56, %v7363_v37  ;;  %v710_v23 = vsel %vm708_vm8, %v698_v32, 2102212464  ;;  %v715_v52 = vsel %vm707_vm3, %v698_v32, %v7365_v45  ;;  %v431_v37 = vpop.permute.xlu1 %430 }
 0x1c8   :  { %v717_v44 = vsel %vm705_vm0, %v695_v20, %v698_v32  ;;  %v366_v31 = vadd.f32 %v350_v40, %v7366_v29  ;;  %vm706_vm6 = vcmp.lt.s32.totalorder %v7362_v59, 2  ;;  %v721_v4 = vshll.u32 %v681_v38, 8 }
 0x1c9   :  { %v5821_v7 = vshrl.u32 %v630_v1, 30  ;;  %v1827_v56 = vadd.s32 1, %v3782_v24  ;;  %v709_v0 = vsel %vm705_vm0, %v689_v25, %v692_v8  ;;  %v716_v54 = vsel %vm706_vm6, %v713_v19, %v715_v52  ;;  %v7367_v24 = vld [vmem:[#allocation19_spill] sm:$0xff] }
 0x1ca   :  { %v720_v45 = vsel %vm706_vm6, %v717_v44, %v719_v49  ;;  %v711_v40 = vsel %vm707_vm3, %v695_v20, %v710_v23  ;;  %v5836_v38 = vmul.u32.u64.low %v721_v4, %v716_v54  ;;  %v5837_v13 = vmul.u32.u64.high %v721_v4, %v716_v54, %v5836_v38  ;;  %v7369_v23 = vld [vmem:[#allocation27_spill] sm:$0xff] }
 0x1cb   :  { %v632_v32 = vshll.u32 %v5821_v7, 30  ;;  %v5833_v1 = vmul.u32.u64.low %v721_v4, %v720_v45  ;;  %v5834_v29 = vmul.u32.u64.high %v721_v4, %v720_v45, %v5833_v1  ;;  %v368_v8 = vadd.f32 %v7367_v24, %v268_v35 }
 0x1cc   :  { %v452_v25 = vmul.f32 %v4765_v15, %v431_v37  ;;  %v7368_v19 = vor.u32 %v5633_v51, %v5655_v21  ;;  %vm1540_vm8 = vcmp.lt.s32.totalorder %v5661_v63, 4  ;;  %v466_v52 = vadd.f32 %v7369_v23, %v366_v31 }
 0x1cd   :  { %v5850_v20 = vsub.s32 %v629_v42, %v632_v32  ;;  %v1380_v54 = vmul.f32 %v1379_v46, %v1377_v62  ;;  %v5855_v44 = vor.u32 %v5763_v3, %v5675_v17  ;;  %v1636_v35 = vshrl.u32 %v7288_v10, %v5793_v60  ;;  %v523_v46 = vpop.permute.xlu1 %522 }
 0x1ce   :  { %v5847_v49 = vsel %vm7244_vm11, %v7368_v19, 1326507024  ;;  %v468_v37 = vadd.f32 %v452_v25, %v368_v8  ;;  %vm1828_vm7 = vcmp.gt.s32.totalorder %v1827_v56, 0  ;;  %v712_v51 = vsel %vm706_vm6, %v709_v0, %v711_v40 }
 0x1cf   :  { %v635_v21 = vsub.s32 0, %v5850_v20  ;;  %vm730_vm12 = vc.u32 %v5834_v29, %v5836_v38  ;;  %v1536_v42 = vor.u32 %v5785_v9, %v5682_v53  ;;  %v5867_v62 = vshrl.u32 %v5731_v28, 5 }
 0x1d0   :  { %v245_v17 = vmul.f32 %v4742_v5, %v5465_v39  ;;  %v731_v3 = vadd.s32 1, %v5837_v13  ;;  %v7370_v31 = vand.u32 2147483647, %v7330_v48  ;;  %v1635_v0 = vshll.u32 %v7335_v33, %v5766_v6 }
 0x1d1   :  { %v1638_v53 = vshll.u32 %v7288_v10, %v5766_v6  ;;  %v1639_v28 = vshrl.u32 %v7267_v16, %v5793_v60  ;;  %v3735_v5 = vmin.u32 %v635_v21, %v5850_v20  ;;  %v1829_v39 = vsel %vm1828_vm7, %v1827_v56, 0  ;;  %v527_v34 = vpop.permute.xlu1 %526 }
 0x1d2   :  { %vm5874_vm13 = vcmp.le.f32.partialorder %v7370_v31, 0.7853982  ;;  %v728_v9 = vmul.u32 %v721_v4, %v712_v51  ;;  %v732_v45 = vsel %vm730_vm12, %v731_v3, %v5837_v13  ;;  %v5887_v32 = vadd.f32 %v5602_v36, %v468_v37 }
 0x1d3   :  { %v1381_v40 = vxor.u32 2147483648, %v1380_v54  ;;  %v5889_v1 = vor.u32 %v1636_v35, %v1635_v0  ;;  %v637_v24 = vclz %v3735_v5  ;;  %v550_v8 = vmul.f32 %v4777_v22, %v523_v46 }
 0x1d4   :  { %7373 = vst [vmem:[#allocation29_spill] sm:$0xff] %v5887_v32  ;;  %v5895_v25 = vsel %vm1540_vm8, %v5855_v44, 920167782  ;;  %v5899_v56 = vsel %vm1540_vm8, %v1536_v42, 1326507024  ;;  %vm1644_vm14 = vcmp.lt.s32.totalorder %v5867_v62, 4  ;;  %v733_v13 = vadd.s32 %v732_v45, %v728_v9 }
 0x1d5   :  { %v1640_v36 = vor.u32 %v1639_v28, %v1638_v53  ;;  %v267_v4 = vadd.f32 %v5327_v57, %v245_v17  ;;  %v5903_v19 = vand.u32 31, %v1829_v39  ;;  %v3736_v23 = vadd.s32 4294967294, %v637_v24 }
 0x1d6   :  { %v351_v35 = vmul.f32 %v4753_v11, %v5574_v58  ;;  %v655_v37 = vsub.s32 4, %v5821_v7  ;;  %v734_v21 = vadd.s32 536870912, %v733_v13  ;;  %v2132_v51 = vand.u32 2139095040, %v5887_v32 }
 0x1d7   :  { %v1382_v42 = vsel %vm1299_vm4, %v1381_v40, %v1380_v54  ;;  %v5914_v3 = vsel %vm1644_vm14, %v5889_v1, 920167782  ;;  %vm3737_vm15 = vcmp.lt.s32.totalorder %v3736_v23, 0  ;;  %v5916_v57 = vadd.f32 %v550_v8, %v466_v52 }
 0x1d8   :  { %v451_v17 = vmul.f32 %v4765_v15, %v5790_v43  ;;  %vm571_vm5 = vcmp.lt.s32.totalorder %v7349_v61, 0  ;;  %v640_v11 = vsel %vm3737_vm15, 0, %v3736_v23  ;;  %v5921_v58 = vshrl.u32 %v734_v21, 30 }
 0x1d9   :  { %v5924_v46 = vsub.s32 32, %v5903_v19  ;;  %v625_v54 = vadd.s32 %v5752_v26, %v5746_v27  ;;  %v641_v31 = vsub.s32 32, %v640_v11  ;;  %v645_v0 = vsub.s32 4294967266, %v640_v11 }
 0x1da   :  { %v1385_v52 = vsel %vm5874_vm13, %v7330_v48, %v1382_v42  ;;  %v656_v15 = vsel %vm571_vm5, %v655_v37, %v5821_v7  ;;  %v736_v43 = vshll.u32 %v5921_v58, 30  ;;  %v2133_v53 = vshrl.u32 %v2132_v51, 23 }
 0x1db   :  { %v642_v28 = vshll.u32 %v5850_v20, %v640_v11  ;;  %v643_v5 = vshrl.u32 %v625_v54, %v641_v31  ;;  %v646_v9 = vadd.s32 127, %v645_v0  ;;  %v1924_v45 = vand.u32 2139095040, %v5916_v57 }
 0x1dc   :  { %v5939_v27 = vsel %vm1644_vm14, %v1640_v36, 1326507024  ;;  %v367_v26 = vadd.f32 %v351_v35, %v267_v4  ;;  %v7374_v40 = vand.u32 2147483647, %v7349_v61  ;;  %v5947_v7 = vsub.s32 %v733_v13, %v736_v43 }
 0x1dd   :  { %4345 = vcosq.f32 %v1385_v52  ;;  %v1844_v20 = vshrl.u32 %v7288_v10, %v5924_v46  ;;  %v644_v8 = vor.u32 %v643_v5, %v642_v28  ;;  %v647_v23 = vshll.u32 %v646_v9, 23 }
 0x1de   :  { %vm5943_vm4 = vcmp.le.f32.partialorder %v7374_v40, 0.7853982  ;;  %v5951_v37 = vadd.f32 %v451_v17, %v367_v26  ;;  %v739_v4 = vsub.s32 0, %v5947_v7  ;;  %v3794_v35 = vadd.s32 4294967169, %v2133_v53 }
 0x1df   :  { %v658_v36 = vsel %vm5943_vm4, 0, %v656_v15  ;;  %4347 = vsinq.f32 %v1385_v52  ;;  %v1843_v21 = vshll.u32 %v7335_v33, %v5903_v19  ;;  %v648_v13 = vor.u32 4788187, %v647_v23 }
 0x1e0   :  { %v1925_v51 = vshrl.u32 %v1924_v45, 23  ;;  %v5958_v42 = vshrl.u32 %v1829_v39, 5  ;;  %v1847_v11 = vshrl.u32 %v7267_v16, %v5924_v46  ;;  %v3739_v17 = vmin.u32 %v739_v4, %v5947_v7 }
 0x1e1   :  { %v1074_v54 = vsel %vm5516_vm2, 0, %v5551_v30  ;;  %v5966_v31 = vor.u32 %v1844_v20, %v1843_v21  ;;  %v649_v0 = vand.u32 2147483647, %v648_v13  ;;  %v651_v52 = vcvt.s32.f32 %v644_v8 }
 0x1e2   :  { %v662_v15 = vadd.s32 3, %v658_v36  ;;  %v1846_v43 = vshll.u32 %v7288_v10, %v5903_v19  ;;  %vm675_vm0 = vcmp.lt.s32.totalorder %v7358_v2, 0  ;;  %v741_v39 = vclz %v3739_v17 }
 0x1e3   :  { %v2139_v53 = vadd.s32 1, %v3794_v35  ;;  %v652_v28 = vmul.f32 %v651_v52, %v649_v0  ;;  %v7377_v5 = vand.u32 2147483647, %v7358_v2  ;;  %v3786_v50 = vadd.s32 4294967169, %v1925_v51 }
 0x1e4   :  { %v1078_v30 = vadd.s32 3, %v1074_v54  ;;  %v1848_v45 = vor.u32 %v1847_v11, %v1846_v43  ;;  %vm7243_vm2 = vcmp.lt.s32.totalorder %v5958_v42, 4  ;;  %v3740_v26 = vadd.s32 4294967294, %v741_v39 }
 0x1e5   :  { %vm5973_vm3 = vcmp.le.f32.partialorder %v7377_v5, 0.7853982  ;;  %v759_v40 = vsub.s32 4, %v5921_v58  ;;  %v5982_v20 = vsel %vm7243_vm2, %v5966_v31, 920167782  ;;  %v653_v8 = vxor.u32 2147483648, %v652_v28 }
 0x1e6   :  { %v5984_v23 = vand.u32 3, %v662_v15  ;;  %v729_v36 = vadd.s32 %v5836_v38, %v5834_v29  ;;  %vm3741_vm6 = vcmp.lt.s32.totalorder %v3740_v26, 0  ;;  %vm2140_vm7 = vcmp.gt.s32.totalorder %v2139_v53, 0 }
 0x1e7   :  { %v1082_v4 = vxor.u32 2147483648, %v5712_v18  ;;  %v1178_v35 = vsel %vm5459_vm9, 0, %v5492_v14  ;;  %v5992_v21 = vpop.eup %4345  ;;  %v654_v13 = vsel %vm571_vm5, %v653_v8, %v652_v28  ;;  %v744_v51 = vsel %vm3741_vm6, 0, %v3740_v26 }
 0x1e8   :  { %v1931_v11 = vadd.s32 1, %v3786_v50  ;;  %v1079_v17 = vand.u32 3, %v1078_v30  ;;  %v657_v29 = vsel %vm5943_vm4, %v7349_v61, %v654_v13  ;;  %v745_v38 = vsub.s32 32, %v744_v51  ;;  %v7381_v13 = vld [vmem:[#allocation24_spill] sm:$0xff] }
 0x1e9   :  { %v749_v54 = vsub.s32 4294967266, %v744_v51  ;;  %v760_v0 = vsel %vm675_vm0, %v759_v40, %v5921_v58  ;;  %v6002_v14 = vpop.eup %4347  ;;  %4349 = vcosq.f32 %v657_v29  ;;  %v2141_v52 = vsel %vm2140_vm7, %v2139_v53, 0 }
 0x1ea   :  { %v1085_v15 = vxor.u32 2147483648, %v5709_v47  ;;  %v1182_v43 = vadd.s32 3, %v1178_v35  ;;  %4351 = vsinq.f32 %v657_v29  ;;  %v746_v39 = vshll.u32 %v5947_v7, %v744_v51 }
 0x1eb   :  { %v747_v28 = vshrl.u32 %v729_v36, %v745_v38  ;;  %v750_v24 = vadd.s32 127, %v749_v54  ;;  %v6008_v5 = vsel %vm7243_vm2, %v1848_v45, 1326507024  ;;  %v762_v58 = vsel %vm5973_vm3, 0, %v760_v0  ;;  %v7383_v38 = vld [vmem:[#allocation33_spill] sm:$0xff] }
 0x1ec   :  { %vm1932_vm9 = vcmp.gt.s32.totalorder %v1931_v11, 0  ;;  %v551_v50 = vmul.f32 %v4777_v22, %v527_v34  ;;  %vm1077_vm12 = vweird.f32 %v7324_v12  ;;  %vm1081_vm15 = vcmp.eq.s32.totalorder %v1079_v17, 0 }
 0x1ed   :  { %v748_v30 = vor.u32 %v747_v28, %v746_v39  ;;  %v751_v53 = vshll.u32 %v750_v24, 23  ;;  %vm668_vm5 = vcmp.eq.s32.totalorder %v5984_v23, 2  ;;  %v6015_v7 = vand.u32 31, %v2141_v52  ;;  %v7388_v28 = vld [vmem:[#allocation45_spill] sm:$0xff] }
 0x1ee   :  { %v1083_v26 = vsel %vm1081_vm15, %v5709_v47, %v1082_v4  ;;  %vm1084_vm4 = vcmp.eq.s32.totalorder %v1079_v17, 2  ;;  %v1183_v45 = vand.u32 3, %v1182_v43  ;;  %vm665_vm6 = vcmp.eq.s32.totalorder %v5984_v23, 0  ;;  %v7387_v43 = vld [vmem:[#allocation15_spill] sm:$0xff] }
 0x1ef   :  { %7380 = vst [vmem:[#allocation32_spill] sm:$0xff] %v6015_v7  ;;  %v752_v40 = vor.u32 4788187, %v751_v53  ;;  %v766_v8 = vadd.s32 3, %v762_v58  ;;  %v1933_v36 = vsel %vm1932_vm9, %v1931_v11, 0  ;;  %v1086_v22 = vsel %vm1084_vm4, %v1085_v15, %v5712_v18 }
 0x1f0   :  { %vm664_vm7 = vcmp.lt.s32.totalorder %v5984_v23, 2  ;;  %v1186_v35 = vxor.u32 2147483648, %v5627_v55  ;;  %v1189_v51 = vxor.u32 2147483648, %v7381_v13  ;;  %v6024_v29 = vadd.f32 %v551_v50, %v5951_v37 }
 0x1f1   :  { %v1282_v4 = vsel %vm5504_vm1, 0, %v7383_v38  ;;  %vm661_vm15 = vweird.f32 %v7349_v61  ;;  %v753_v54 = vand.u32 2147483647, %v752_v40  ;;  %v755_v0 = vcvt.s32.f32 %v748_v30 }
 0x1f2   :  { %7382 = vst [vmem:[#allocation35_spill] sm:$0xff] %v6024_v29  ;;  %v6030_v11 = vshrl.u32 %v2141_v52, 5  ;;  %vm1080_vm9 = vcmp.lt.s32.totalorder %v1079_v17, 2  ;;  %v6033_v18 = vsub.s32 32, %v6015_v7  ;;  %v6035_v34 = vand.u32 31, %v1933_v36 }
 0x1f3   :  { %v1087_v15 = vsel %vm1080_vm9, %v1083_v26, %v1086_v22  ;;  %vm1181_vm4 = vweird.f32 %v7387_v43  ;;  %vm1185_vm2 = vcmp.eq.s32.totalorder %v1183_v45, 0  ;;  %v756_v37 = vmul.f32 %v755_v0, %v753_v54  ;;  %v4350_v58 = vpop.eup %4349  ;;  %v7389_v54 = vld [vmem:[#allocation40_spill] sm:$0xff] }
 0x1f4   :  { %7385 = vst [vmem:[#allocation37_spill] sm:$0xff] %v6030_v11  ;;  %7386 = vst [vmem:[#allocation14_spill] sm:$0xff] %v6033_v18  ;;  %vm1188_vm11 = vcmp.eq.s32.totalorder %v1183_v45, 2  ;;  %v1286_v39 = vadd.s32 3, %v1282_v4  ;;  %v1386_v24 = vsel %vm5874_vm13, 0, %v7388_v28  ;;  %v6041_v52 = vand.u32 3, %v766_v8  ;;  %v4352_v53 = vpop.eup %4351 }
 0x1f5   :  { %v1187_v17 = vsel %vm1185_vm2, %v7381_v13, %v1186_v35  ;;  %v1190_v50 = vsel %vm1188_vm11, %v1189_v51, %v5627_v55  ;;  %v2028_v30 = vand.u32 2139095040, %v6024_v29  ;;  %v669_v26 = vxor.u32 2147483648, %v4350_v58  ;;  %v7398_v18 = vld [vmem:[#allocation43_spill] sm:$0xff]  ;;  %v7402_v29 = vld [vmem:[#allocation50_spill] sm:$0xff] }
 0x1f6   :  { %v757_v40 = vxor.u32 2147483648, %v756_v37  ;;  %v6046_v22 = vshrl.u32 %v1933_v36, 5  ;;  %v6050_v38 = vsel %vm1077_vm12, nan, %v1087_v15  ;;  %v666_v59 = vxor.u32 2147483648, %v4352_v53  ;;  %v7390_v15 = vld [vmem:[#allocation49_spill] sm:$0xff] }
 0x1f7   :  { %v6053_v47 = vsub.s32 32, %v6035_v34  ;;  %vm1184_vm1 = vcmp.lt.s32.totalorder %v1183_v45, 2  ;;  %v1390_v8 = vadd.s32 3, %v1386_v24  ;;  %v670_v55 = vsel %vm668_vm5, %v669_v26, %v4352_v53  ;;  %v7391_v24 = vld [vmem:[#allocation48_spill] sm:$0xff] }
 0x1f8   :  { %v758_v35 = vsel %vm675_vm0, %v757_v40, %v756_v37  ;;  %v1191_v13 = vsel %vm1184_vm1, %v1187_v17, %v1190_v50  ;;  %v1287_v51 = vand.u32 3, %v1286_v39  ;;  %v667_v36 = vsel %vm665_vm6, %v4350_v58, %v666_v59  ;;  %v7392_v59 = vld [vmem:[#allocation22_spill] sm:$0xff] }
 0x1f9   :  { %v761_v12 = vsel %vm5973_vm3, %v7358_v2, %v758_v35  ;;  %v2029_v4 = vshrl.u32 %v2028_v30, 23  ;;  %v7245_v0 = vand.u32 2147483647, %v7389_v54  ;;  %v671_v45 = vsel %vm664_vm7, %v667_v36, %v670_v55 }
 0x1fa   :  { %4353 = vcosq.f32 %v761_v12  ;;  %v1290_v28 = vxor.u32 2147483648, %v7390_v15  ;;  %v1293_v37 = vxor.u32 2147483648, %v7391_v24  ;;  %v6071_v39 = vsel %vm661_vm15, nan, %v671_v45 }
 0x1fb   :  { %4355 = vsinq.f32 %v761_v12  ;;  %v6075_v9 = vshll.u32 %v7335_v33, %v6035_v34  ;;  %v1391_v58 = vand.u32 3, %v1390_v8  ;;  %3570 = vxpose.xlu0.b32.start [1/16] (narrow) %v6071_v39, 32  ;;  %v6080_v23 = vshrl.u32 %v7288_v10, %v6053_v47  ;;  %v7393_v8 = vld [vmem:[#allocation23_spill] sm:$0xff] }
 0x1fc   :  { %v6084_v17 = vsel %vm1181_vm4, nan, %v1191_v13  ;;  %v1394_v61 = vxor.u32 2147483648, %v6002_v14  ;;  %v1397_v50 = vxor.u32 2147483648, %v5992_v21  ;;  %v3790_v30 = vadd.s32 4294967169, %v2029_v4  ;;  %v7395_v13 = vld [vmem:[#allocation39_spill] sm:$0xff] }
 0x1fd   :  { %vm1289_vm11 = vcmp.eq.s32.totalorder %v1287_v51, 0  ;;  %vm1292_vm13 = vcmp.eq.s32.totalorder %v1287_v51, 2  ;;  %v1408_v53 = vand.u32 8388607, %v7245_v0  ;;  %vm772_vm0 = vcmp.eq.s32.totalorder %v6041_v52, 2 }
 0x1fe   :  { %vm1288_vm3 = vcmp.lt.s32.totalorder %v1287_v51, 2  ;;  %v1291_v43 = vsel %vm1289_vm11, %v7391_v24, %v1290_v28  ;;  %v1294_v40 = vsel %vm1292_vm13, %v1293_v37, %v7390_v15  ;;  %vm769_vm2 = vcmp.eq.s32.totalorder %v6041_v52, 0 }
 0x1ff   :  { %vm1285_vm12 = vweird.f32 %v7392_v59  ;;  %vm1393_vm5 = vcmp.eq.s32.totalorder %v1391_v58, 0  ;;  %vm1396_vm6 = vcmp.eq.s32.totalorder %v1391_v58, 2  ;;  %v7394_v55 = vmov 683565275  }
 0x200   :  { %v1418_v35 = vshll.u32 %v7394_v55, %v7393_v8  ;;  %v7396_v36 = vmov 2475754826   ;;  %vm768_vm7 = vcmp.lt.s32.totalorder %v6041_v52, 2  ;;  %vm1389_vm15 = vweird.f32 %v7330_v48 }
 0x201   :  { %v1419_v12 = vshrl.u32 %v7396_v36, %v7395_v13  ;;  %v1395_v4 = vsel %vm1393_vm5, %v5992_v21, %v1394_v61  ;;  %v1398_v45 = vsel %vm1396_vm6, %v1397_v50, %v6002_v14  ;;  %v1421_v15 = vshll.u32 %v7396_v36, %v7393_v8 }
 0x202   :  { %v7397_v28 = vmov 2131351028   ;;  %vm765_vm9 = vweird.f32 %v7358_v2  ;;  %v6110_v37 = vadd.s32 1, %v3790_v30  ;;  %v1295_v0 = vsel %vm1288_vm3, %v1291_v43, %v1294_v40  ;;  %v7400_v43 = vld [vmem:[#allocation46_spill] sm:$0xff] }
 0x203   :  { %v1422_v24 = vshrl.u32 %v7397_v28, %v7395_v13  ;;  %v1409_v26 = vor.u32 8388608, %v1408_v53  ;;  %v1420_v32 = vor.u32 %v1419_v12, %v1418_v35  ;;  %vm2443_vm4 = vcmask 261120   ;;  %v7399_v53 = vld [vmem:[#allocation51_spill] sm:$0xff] }
 0x204   :  { %vm1392_vm1 = vcmp.lt.s32.totalorder %v1391_v58, 2  ;;  %v1424_v21 = vshll.u32 %v7397_v28, %v7393_v8  ;;  %v1425_v14 = vshrl.u32 %v7335_v33, %v7395_v13  ;;  %v1417_v50 = vshrl.u32 %v7394_v55, %v7395_v13  ;;  %v4354_v51 = vpop.eup %4353 }
 0x205   :  { %v1423_v11 = vor.u32 %v1422_v24, %v1421_v15  ;;  %v1399_v61 = vsel %vm1392_vm1, %v1395_v4, %v1398_v45  ;;  %vm1433_vm11 = vcmp.lt.s32.totalorder %v7398_v18, 1  ;;  %vm1435_vm13 = vcmp.lt.s32.totalorder %v7398_v18, 3  ;;  %v4356_v8 = vpop.eup %4355  ;;  %v7401_v45 = vld [vmem:[#allocation34_spill] sm:$0xff] }
 0x206   :  { %v1426_v30 = vor.u32 %v1425_v14, %v1424_v21  ;;  %vm1434_vm3 = vcmp.lt.s32.totalorder %v7398_v18, 2  ;;  %v1447_v40 = vsel %vm1435_vm13, %v7400_v43, %v7399_v53  ;;  %v773_v35 = vxor.u32 2147483648, %v4354_v51 }
 0x207   :  { %v1441_v58 = vsel %vm1433_vm11, %v1420_v32, %v1423_v11  ;;  %v1437_v12 = vsel %vm1433_vm11, %v1417_v50, %v1420_v32  ;;  %v1449_v4 = vshll.u32 %v1409_v26, 8  ;;  %v1505_v13 = vand.u32 2147483647, %v7401_v45 }
 0x208   :  { %v770_v15 = vxor.u32 2147483648, %v4356_v8  ;;  %v1438_v24 = vsel %vm1436_vm10, %v1426_v30, 2102212464  ;;  %v1443_v21 = vsel %vm1435_vm13, %v1426_v30, %v7402_v29  ;;  %v1445_v14 = vsel %vm1433_vm11, %v1423_v11, %v1426_v30 }
 0x209   :  { %v774_v7 = vsel %vm772_vm0, %v773_v35, %v4356_v8  ;;  %v1439_v53 = vsel %vm1435_vm13, %v1423_v11, %v1438_v24  ;;  %v1444_v32 = vsel %vm1434_vm3, %v1441_v58, %v1443_v21  ;;  %v1448_v26 = vsel %vm1434_vm3, %v1445_v14, %v1447_v40 }
 0x20a   :  { %v771_v50 = vsel %vm769_vm2, %v4354_v51, %v770_v15  ;;  %v6144_v43 = vsel %vm1285_vm12, nan, %v1295_v0  ;;  %v6146_v29 = vmul.u32.u64.low %v1449_v4, %v1448_v26  ;;  %v6147_v30 = vmul.u32.u64.high %v1449_v4, %v1448_v26, %v6146_v29  ;;  %v7406_v26 = vld [vmem:[#allocation13_spill] sm:$0xff] }
 0x20b   :  { %v775_v8 = vsel %vm768_vm7, %v771_v50, %v774_v7  ;;  %v6153_v11 = vsel %vm1389_vm15, nan, %v1399_v61  ;;  %v6155_v58 = vmul.u32.u64.low %v1449_v4, %v1444_v32  ;;  %v6156_v35 = vmul.u32.u64.high %v1449_v4, %v1444_v32, %v6155_v58  ;;  %v7403_v7 = vld [vmem:[#allocation47_spill] sm:$0xff]  ;;  %v7404_v61 = vld [vmem:[#allocation53_spill] sm:$0xff]  ;;  %v7405_v32 = vld [vmem:[#allocation28_spill] sm:$0xff] }
 0x20c   :  { %v776_v51 = vsel %vm765_vm9, nan, %v775_v8  ;;  %vm2036_vm10 = vcmp.gt.s32.totalorder %v6110_v37, 0  ;;  %v1440_v0 = vsel %vm1434_vm3, %v1437_v12, %v1439_v53  ;;  %v1512_v52 = vand.u32 8388607, %v1505_v13 }
 0x20d   :  { %v1522_v48 = vshll.u32 %v7394_v55, %v7403_v7  ;;  %v2233_v59 = vpack.c.bf16 %v776_v51, %v6071_v39  ;;  %3571 = vxpose.xlu0.b32.cont [2/16] (narrow) %v776_v51, 32  ;;  %v1523_v40 = vshrl.u32 %v7396_v36, %v7404_v61  ;;  %v1525_v2 = vshll.u32 %v7396_v36, %v7403_v7 }
 0x20e   :  { %v1526_v15 = vshrl.u32 %v7397_v28, %v7404_v61  ;;  %v2236_v18 = vpack.c.bf16 %v6153_v11, %v6144_v43  ;;  %vm1458_vm0 = vc.u32 %v6147_v30, %v6155_v58  ;;  %v1513_v12 = vor.u32 8388608, %v1512_v52 }
 0x20f   :  { %v1528_v39 = vshll.u32 %v7397_v28, %v7403_v7  ;;  %3992 = vmatprep.mubr.msk.bf16.mxu0 %vm2443_vm4, %v2233_v59  ;;  %v1459_v24 = vadd.s32 1, %v6156_v35  ;;  %v1524_v21 = vor.u32 %v1523_v40, %v1522_v48  ;;  %v1529_v53 = vshrl.u32 %v7335_v33, %v7404_v61 }
 0x210   :  { %v1527_v14 = vor.u32 %v1526_v15, %v1525_v2  ;;  %v7407_v50 = vpack.c.bf16 %v7405_v32, %v7406_v26  ;;  %v1456_v29 = vmul.u32 %v1449_v4, %v1440_v0  ;;  %v1521_v8 = vshrl.u32 %v7394_v55, %v7404_v61 }
 0x211   :  { %vm1537_vm2 = vcmp.lt.s32.totalorder %v5661_v63, 1  ;;  %vm1538_vm12 = vcmp.lt.s32.totalorder %v5661_v63, 2  ;;  %3572 = vxpose.xlu0.b32.cont [3/16] (narrow) %v7406_v26, 32  ;;  %v7408_v51 = vpack.c.bf16 %v6084_v17, %v6050_v38  ;;  %v1460_v52 = vsel %vm1458_vm0, %v1459_v24, %v6156_v35  ;;  %v7409_v26 = vld [vmem:[#allocation36_spill] sm:$0xff] }
 0x212   :  { %3993 = vmatmul.mubr.msk.bf16.vlgmr.msra.gmra.mrb[0].mxu0 %vm2443_vm4, %v7407_v50  ;;  %v1530_v7 = vor.u32 %v1529_v53, %v1528_v39  ;;  %vm1539_vm5 = vcmp.lt.s32.totalorder %v5661_v63, 3  ;;  %v1553_v4 = vshll.u32 %v1513_v12, 8  ;;  %v1461_v0 = vadd.s32 %v1460_v52, %v1456_v29 }
 0x213   :  { %3996 = vmatprep.mubr.msk.bf16.mxu0 %vm2443_vm4, %v7408_v51  ;;  %v1541_v48 = vsel %vm1537_vm2, %v1521_v8, %v1524_v21  ;;  %v1545_v59 = vsel %vm1537_vm2, %v1524_v21, %v1527_v14  ;;  %v1551_v61 = vsel %vm1539_vm5, %v5855_v44, %v5899_v56  ;;  %v1609_v50 = vand.u32 2147483647, %v7409_v26 }
 0x214   :  { %v1542_v40 = vsel %vm1540_vm8, %v1530_v7, 2102212464  ;;  %v1547_v2 = vsel %vm1539_vm5, %v1530_v7, %v5895_v25  ;;  %v1549_v15 = vsel %vm1537_vm2, %v1527_v14, %v1530_v7  ;;  %v1462_v51 = vadd.s32 536870912, %v1461_v0 }
 0x215   :  { %v1543_v35 = vsel %vm1539_vm5, %v1527_v14, %v1542_v40  ;;  %v1548_v39 = vsel %vm1538_vm12, %v1545_v59, %v1547_v2  ;;  %v1552_v12 = vsel %vm1538_vm12, %v1549_v15, %v1551_v61  ;;  %v6212_v24 = vshll.u32 %v7288_v10, %v6035_v34  ;;  %3573 = vxpose.xlu0.b32.cont [4/16] (narrow) %v7405_v32, 32 }
 0x216   :  { %v6216_v44 = vshrl.u32 %v7267_v16, %v6053_v47  ;;  %v6219_v25 = vmul.u32.u64.low %v1553_v4, %v1552_v12  ;;  %v6220_v56 = vmul.u32.u64.high %v1553_v4, %v1552_v12, %v6219_v25  ;;  %v6224_v21 = vor.u32 %v6080_v23, %v6075_v9 }
 0x217   :  { %v1463_v14 = vshrl.u32 %v1462_v51, 30  ;;  %v6226_v53 = vmul.u32.u64.low %v1553_v4, %v1548_v39  ;;  %v6227_v29 = vmul.u32.u64.high %v1553_v4, %v1548_v39, %v6226_v53  ;;  %v6233_v8 = vsel %vm2036_vm10, %v6110_v37, 0 }
 0x218   :  { %v1544_v32 = vsel %vm1538_vm12, %v1541_v48, %v1543_v35  ;;  %v1616_v52 = vand.u32 8388607, %v1609_v50  ;;  %v1627_v9 = vshrl.u32 %v7396_v36, %v5793_v60  ;;  %v1626_v7 = vshll.u32 %v7394_v55, %v5766_v6 }
 0x219   :  { %v1464_v23 = vshll.u32 %v1463_v14, 30  ;;  %v1629_v59 = vshll.u32 %v7396_v36, %v5766_v6  ;;  %v1630_v37 = vshrl.u32 %v7397_v28, %v5793_v60  ;;  %v1952_v63 = vor.u32 %v6216_v44, %v6212_v24  ;;  %3574 = vxpose.xlu0.b32.cont [5/16] (narrow) %v6050_v38, 32 }
 0x21a   :  { %3997 = vmatmul.mubr.msk.bf16.gmra.mrb[4].mxu0 %vm2443_vm4, %v2236_v18  ;;  %vm1403_vm8 = vcmp.lt.s32.totalorder %v7389_v54, 0  ;;  %v1487_v48 = vsub.s32 4, %v1463_v14  ;;  %vm1562_vm6 = vc.u32 %v6220_v56, %v6226_v53  ;;  %v1563_v61 = vadd.s32 1, %v6227_v29 }
 0x21b   :  { %v6254_v18 = vsub.s32 %v1461_v0, %v1464_v23  ;;  %v1628_v40 = vor.u32 %v1627_v9, %v1626_v7  ;;  %v1631_v2 = vor.u32 %v1630_v37, %v1629_v59  ;;  %vm1956_vm7 = vcmp.lt.s32.totalorder %v6046_v22, 4  ;;  %v7422_v0 = vld [vmem:[#allocation17_spill] sm:$0xff] }
 0x21c   :  { %v6259_v15 = vand.u32 31, %v6233_v8  ;;  %v1560_v51 = vmul.u32 %v1553_v4, %v1544_v32  ;;  %v1632_v38 = vshll.u32 %v7397_v28, %v5766_v6  ;;  %v1633_v35 = vshrl.u32 %v7335_v33, %v5793_v60 }
 0x21d   :  { %v7411_v39 = vand.u32 2147483647, %v7389_v54  ;;  %v1467_v12 = vsub.s32 0, %v6254_v18  ;;  %v1564_v24 = vsel %vm1562_vm6, %v1563_v61, %v6227_v29  ;;  %v1617_v44 = vor.u32 8388608, %v1616_v52  ;;  %3575 = vxpose.xlu0.b32.cont [6/16] (narrow) %v6084_v17, 32 }
 0x21e   :  { %7410 = vst [vmem:[#allocation21_spill] sm:$0xff] %v6259_v15  ;;  %v1565_v4 = vadd.s32 %v1564_v24, %v1560_v51  ;;  %v1634_v25 = vor.u32 %v1633_v35, %v1632_v38  ;;  %vm1641_vm9 = vcmp.lt.s32.totalorder %v5867_v62, 1  ;;  %vm1643_vm1 = vcmp.lt.s32.totalorder %v5867_v62, 3 }
 0x21f   :  { %vm6267_vm15 = vcmp.le.f32.partialorder %v7411_v39, 0.7853982  ;;  %v3767_v6 = vmin.u32 %v1467_v12, %v6254_v18  ;;  %v1488_v32 = vsel %vm1403_vm8, %v1487_v48, %v1463_v14  ;;  %v1649_v9 = vsel %vm1641_vm9, %v1628_v40, %v1631_v2 }
 0x220   :  { %v1655_v29 = vsel %vm1643_vm1, %v5889_v1, %v5939_v27  ;;  %v1566_v17 = vadd.s32 536870912, %v1565_v4  ;;  %v1625_v52 = vshrl.u32 %v7394_v55, %v5793_v60  ;;  %v1651_v23 = vsel %vm1643_vm1, %v1634_v25, %v5914_v3 }
 0x221   :  { %v1653_v7 = vsel %vm1641_vm9, %v1631_v2, %v1634_v25  ;;  %v1469_v14 = vclz %v3767_v6  ;;  %vm1642_vm11 = vcmp.lt.s32.totalorder %v5867_v62, 2  ;;  %v1646_v59 = vsel %vm1644_vm14, %v1634_v25, 2102212464  ;;  %3576 = vxpose.xlu0.b32.cont [7/16] (narrow) %v6144_v43, 32 }
 0x222   :  { %v1657_v37 = vshll.u32 %v1617_v44, 8  ;;  %v1490_v1 = vsel %vm6267_vm15, 0, %v1488_v32  ;;  %v1567_v60 = vshrl.u32 %v1566_v17, 30  ;;  %v1652_v27 = vsel %vm1642_vm11, %v1649_v9, %v1651_v23 }
 0x223   :  { %v1656_v3 = vsel %vm1642_vm11, %v1653_v7, %v1655_v29  ;;  %vm1507_vm13 = vcmp.lt.s32.totalorder %v7401_v45, 0  ;;  %v3768_v48 = vadd.s32 4294967294, %v1469_v14  ;;  %v1645_v61 = vsel %vm1641_vm9, %v1625_v52, %v1628_v40  ;;  %v7414_v7 = vld [vmem:[#allocation41_spill] sm:$0xff] }
 0x224   :  { %v6305_v51 = vmul.u32.u64.low %v1657_v37, %v1656_v3  ;;  %v6306_v38 = vmul.u32.u64.high %v1657_v37, %v1656_v3, %v6305_v51  ;;  %v1568_v43 = vshll.u32 %v1567_v60, 30  ;;  %v1647_v35 = vsel %vm1643_vm1, %v1631_v2, %v1646_v59 }
 0x225   :  { %v6310_v39 = vmul.u32.u64.low %v1657_v37, %v1652_v27  ;;  %v6311_v12 = vmul.u32.u64.high %v1657_v37, %v1652_v27, %v6310_v39  ;;  %v6317_v24 = vsel %vm1956_vm7, %v6224_v21, 920167782  ;;  %v6321_v44 = vsel %vm1956_vm7, %v1952_v63, 1326507024  ;;  %3577 = vxpose.xlu0.b32.cont [8/16] (narrow) %v6153_v11, 32 }
 0x226   :  { %v6324_v40 = vsub.s32 32, %v6259_v15  ;;  %vm3769_vm14 = vcmp.lt.s32.totalorder %v3768_v48, 0  ;;  %v6328_v2 = vshll.u32 %v7335_v33, %v6259_v15  ;;  %v1457_v25 = vadd.s32 %v6155_v58, %v6147_v30 }
 0x227   :  { %v1472_v6 = vsel %vm3769_vm14, 0, %v3768_v48  ;;  %v6333_v32 = vsub.s32 %v1565_v4, %v1568_v43  ;;  %v1494_v63 = vadd.s32 3, %v1490_v1  ;;  %v1648_v17 = vsel %vm1642_vm11, %v1645_v61, %v1647_v35 }
 0x228   :  { %v1473_v9 = vsub.s32 32, %v1472_v6  ;;  %v1477_v29 = vsub.s32 4294967266, %v1472_v6  ;;  %v1591_v23 = vsub.s32 4, %v1567_v60  ;;  %vm1666_vm3 = vc.u32 %v6306_v38, %v6310_v39 }
 0x229   :  { %v1571_v52 = vsub.s32 0, %v6333_v32  ;;  %v7254_v11 = vand.u32 2147483647, %v7414_v7  ;;  %v1474_v14 = vshll.u32 %v6254_v18, %v1472_v6  ;;  %v1667_v4 = vadd.s32 1, %v6311_v12 }
 0x22a   :  { %v1475_v30 = vshrl.u32 %v1457_v25, %v1473_v9  ;;  %v1478_v58 = vadd.s32 127, %v1477_v29  ;;  %v6345_v59 = vshrl.u32 %v7288_v10, %v6324_v40  ;;  %v6349_v62 = vshll.u32 %v7288_v10, %v6259_v15  ;;  %v7417_v29 = vld [vmem:[#allocation44_spill] sm:$0xff] }
 0x22b   :  { %vm6353_vm10 = vcmp.le.f32.partialorder %v1505_v13, 0.7853982  ;;  %v3771_v18 = vmin.u32 %v1571_v52, %v6333_v32  ;;  %v1664_v48 = vmul.u32 %v1657_v37, %v1648_v17  ;;  %v1668_v61 = vsel %vm1666_vm3, %v1667_v4, %v6311_v12 }
 0x22c   :  { %v1476_v27 = vor.u32 %v1475_v30, %v1474_v14  ;;  %v1479_v3 = vshll.u32 %v1478_v58, 23  ;;  %v6359_v51 = vand.u32 3, %v1494_v63  ;;  %v1561_v43 = vadd.s32 %v6226_v53, %v6220_v56  ;;  %v7418_v63 = vld [vmem:[#allocation42_spill] sm:$0xff] }
 0x22d   :  { %v1573_v35 = vclz %v3771_v18  ;;  %v1592_v25 = vsel %vm1507_vm13, %v1591_v23, %v1567_v60  ;;  %v1669_v6 = vadd.s32 %v1668_v61, %v1664_v48  ;;  %v1720_v9 = vand.u32 8388607, %v7254_v11 }
 0x22e   :  { %v1480_v13 = vor.u32 4788187, %v1479_v3  ;;  %v1729_v52 = vshrl.u32 %v7394_v55, %v7417_v29  ;;  %v1483_v37 = vcvt.s32.f32 %v1476_v27  ;;  %v1731_v12 = vshrl.u32 %v7396_v36, %v7417_v29 }
 0x22f   :  { %v3772_v17 = vadd.s32 4294967294, %v1573_v35  ;;  %v1734_v56 = vshrl.u32 %v7397_v28, %v7417_v29  ;;  %vm1611_vm0 = vcmp.lt.s32.totalorder %v7409_v26, 0  ;;  %v1670_v60 = vadd.s32 536870912, %v1669_v6 }
 0x230   :  { %v1481_v53 = vand.u32 2147483647, %v1480_v13  ;;  %v1736_v23 = vshll.u32 %v7397_v28, %v7418_v63  ;;  %v1737_v14 = vshrl.u32 %v7335_v33, %v7417_v29  ;;  %v1594_v30 = vsel %vm6353_vm10, 0, %v1592_v25 }
 0x231   :  { %vm3773_vm2 = vcmp.lt.s32.totalorder %v3772_v17, 0  ;;  %v1730_v58 = vshll.u32 %v7394_v55, %v7418_v63  ;;  %v1733_v4 = vshll.u32 %v7396_v36, %v7418_v63  ;;  %v1671_v3 = vshrl.u32 %v1670_v60, 30 }
 0x232   :  { %v1484_v18 = vmul.f32 %v1483_v37, %v1481_v53  ;;  %v1576_v27 = vsel %vm3773_vm2, 0, %v3772_v17  ;;  %v1738_v48 = vor.u32 %v1737_v14, %v1736_v23  ;;  %vm6386_vm12 = vcmp.le.f32.partialorder %v1609_v50, 0.7853982 }
 0x233   :  { %v1577_v61 = vsub.s32 32, %v1576_v27  ;;  %v1581_v35 = vsub.s32 4294967266, %v1576_v27  ;;  %v1732_v29 = vor.u32 %v1731_v12, %v1730_v58  ;;  %v1735_v25 = vor.u32 %v1734_v56, %v1733_v4 }
 0x234   :  { %v1485_v11 = vxor.u32 2147483648, %v1484_v18  ;;  %v1672_v15 = vshll.u32 %v1671_v3, 30  ;;  %v1721_v10 = vor.u32 8388608, %v1720_v9  ;;  %vm1745_vm5 = vcmp.lt.s32.totalorder %v5641_v41, 1 }
 0x235   :  { %v1578_v37 = vshll.u32 %v6333_v32, %v1576_v27  ;;  %v1579_v17 = vshrl.u32 %v1561_v43, %v1577_v61  ;;  %v1582_v53 = vadd.s32 127, %v1581_v35  ;;  %v1695_v60 = vsub.s32 4, %v1671_v3 }
 0x236   :  { %v1486_v63 = vsel %vm1403_vm8, %v1485_v11, %v1484_v18  ;;  %v6394_v23 = vsub.s32 %v1669_v6, %v1672_v15  ;;  %vm1746_vm6 = vcmp.lt.s32.totalorder %v5641_v41, 2  ;;  %vm7421_vm9 = vcmp.lt.s32.totalorder %v5641_v41, 4 }
 0x237   :  { %v1750_v50 = vsel %vm7421_vm9, %v1738_v48, 2102212464  ;;  %v1489_v9 = vsel %vm6267_vm15, %v7389_v54, %v1486_v63  ;;  %v1580_v12 = vor.u32 %v1579_v17, %v1578_v37  ;;  %v1583_v56 = vshll.u32 %v1582_v53, 23 }
 0x238   :  { %v1753_v32 = vsel %vm1745_vm5, %v1732_v29, %v1735_v25  ;;  %4357 = vcosq.f32 %v1489_v9  ;;  %v1675_v43 = vsub.s32 0, %v6394_v23  ;;  %vm1747_vm8 = vcmp.lt.s32.totalorder %v5641_v41, 3 }
 0x239   :  { %v1749_v15 = vsel %vm1745_vm5, %v1729_v52, %v1732_v29  ;;  %4359 = vsinq.f32 %v1489_v9  ;;  %v1584_v11 = vor.u32 4788187, %v1583_v56  ;;  %v1696_v6 = vsel %vm1611_vm0, %v1695_v60, %v1671_v3  ;;  %v7423_v52 = vld [vmem:[#allocation52_spill] sm:$0xff] }
 0x23a   :  { %v1755_v14 = vsel %vm1747_vm8, %v1738_v48, %v7422_v0  ;;  %v3775_v58 = vmin.u32 %v1675_v43, %v6394_v23  ;;  %v1751_v4 = vsel %vm1747_vm8, %v1735_v25, %v1750_v50  ;;  %v1757_v27 = vsel %vm1745_vm5, %v1735_v25, %v1738_v48 }
 0x23b   :  { %v1756_v18 = vsel %vm1746_vm6, %v1753_v32, %v1755_v14  ;;  %v1585_v61 = vand.u32 2147483647, %v1584_v11  ;;  %v1587_v35 = vcvt.s32.f32 %v1580_v12  ;;  %v1759_v29 = vsel %vm1747_vm8, %v7423_v52, %v5847_v49 }
 0x23c   :  { %v1761_v37 = vshll.u32 %v1721_v10, 8  ;;  %v6420_v3 = vshrl.u32 %v7267_v16, %v6324_v40  ;;  %v1598_v17 = vadd.s32 3, %v1594_v30  ;;  %v1677_v53 = vclz %v3775_v58 }
 0x23d   :  { %v1698_v60 = vsel %vm6386_vm12, 0, %v1696_v6  ;;  %v1588_v63 = vmul.f32 %v1587_v35, %v1585_v61  ;;  %v1760_v50 = vsel %vm1746_vm6, %v1757_v27, %v1759_v29  ;;  %v1752_v10 = vsel %vm1746_vm6, %v1749_v15, %v1751_v4 }
 0x23e   :  { %v6426_v48 = vmul.u32.u64.low %v1761_v37, %v1756_v18  ;;  %v6427_v25 = vmul.u32.u64.high %v1761_v37, %v1756_v18, %v6426_v48  ;;  %v3776_v9 = vadd.s32 4294967294, %v1677_v53  ;;  %vm1493_vm15 = vweird.f32 %v7389_v54  ;;  %v7424_v18 = vld [vmem:[#allocation18_spill] sm:$0xff] }
 0x23f   :  { %v6432_v49 = vmul.u32.u64.low %v1761_v37, %v1760_v50  ;;  %v6433_v12 = vmul.u32.u64.high %v1761_v37, %v1760_v50, %v6432_v49  ;;  %vm1496_vm1 = vcmp.lt.s32.totalorder %v6359_v51, 2  ;;  %vm1497_vm11 = vcmp.eq.s32.totalorder %v6359_v51, 0 }
 0x240   :  { %vm1500_vm14 = vcmp.eq.s32.totalorder %v6359_v51, 2  ;;  %v1589_v30 = vxor.u32 2147483648, %v1588_v63  ;;  %v6439_v56 = vand.u32 3, %v1598_v17  ;;  %v1665_v32 = vadd.s32 %v6310_v39, %v6306_v38 }
 0x241   :  { %vm3777_vm3 = vcmp.lt.s32.totalorder %v3776_v9, 0  ;;  %v1702_v41 = vadd.s32 3, %v1698_v60  ;;  %v1768_v11 = vmul.u32 %v1761_v37, %v1752_v10  ;;  %v1771_v6 = vadd.s32 1, %v6427_v25 }
 0x242   :  { %v1590_v43 = vsel %vm1507_vm13, %v1589_v30, %v1588_v63  ;;  %v1680_v15 = vsel %vm3777_vm3, 0, %v3776_v9  ;;  %v4358_v0 = vpop.eup %4357  ;;  %v1817_v27 = vand.u32 2147483647, %v7424_v18  ;;  %vm1770_vm13 = vc.u32 %v6433_v12, %v6426_v48 }
 0x243   :  { %v1593_v14 = vsel %vm6353_vm10, %v7401_v45, %v1590_v43  ;;  %v1681_v58 = vsub.s32 32, %v1680_v15  ;;  %v1685_v4 = vsub.s32 4294967266, %v1680_v15  ;;  %v4360_v61 = vpop.eup %4359  ;;  %v1501_v38 = vxor.u32 2147483648, %v4358_v0 }
 0x244   :  { %4361 = vcosq.f32 %v1593_v14  ;;  %v1682_v39 = vshll.u32 %v6394_v23, %v1680_v15  ;;  %v1498_v35 = vxor.u32 2147483648, %v4360_v61  ;;  %v1772_v37 = vsel %vm1770_vm13, %v1771_v6, %v6427_v25 }
 0x245   :  { %4363 = vsinq.f32 %v1593_v14  ;;  %v1683_v52 = vshrl.u32 %v1665_v32, %v1681_v58  ;;  %v1686_v29 = vadd.s32 127, %v1685_v4  ;;  %v1502_v1 = vsel %vm1500_vm14, %v1501_v38, %v4360_v61 }
 0x246   :  { %v1834_v17 = vshll.u32 %v7394_v55, %v5903_v19  ;;  %v1835_v53 = vshrl.u32 %v7396_v36, %v5924_v46  ;;  %v1499_v23 = vsel %vm1497_vm11, %v4358_v0, %v1498_v35  ;;  %v1773_v50 = vadd.s32 %v1772_v37, %v1768_v11 }
 0x247   :  { %v1684_v60 = vor.u32 %v1683_v52, %v1682_v39  ;;  %v1687_v63 = vshll.u32 %v1686_v29, 23  ;;  %v1503_v9 = vsel %vm1496_vm1, %v1499_v23, %v1502_v1  ;;  %v1824_v10 = vand.u32 8388607, %v1817_v27 }
 0x248   :  { %v1837_v25 = vshll.u32 %v7396_v36, %v5903_v19  ;;  %v1838_v49 = vshrl.u32 %v7397_v28, %v5924_v46  ;;  %v6472_v30 = vsel %vm1493_vm15, nan, %v1503_v9  ;;  %vm1601_vm10 = vcmp.eq.s32.totalorder %v6439_v56, 0 }
 0x249   :  { %vm1604_vm2 = vcmp.eq.s32.totalorder %v6439_v56, 2  ;;  %v1688_v32 = vor.u32 4788187, %v1687_v63  ;;  %v1774_v51 = vadd.s32 536870912, %v1773_v50  ;;  %3578 = vxpose.xlu0.b32.cont [9/16] (narrow) %v6472_v30, 32  ;;  %vm1600_vm5 = vcmp.lt.s32.totalorder %v6439_v56, 2 }
 0x24a   :  { %v1836_v43 = vor.u32 %v1835_v53, %v1834_v17  ;;  %v1839_v15 = vor.u32 %v1838_v49, %v1837_v25  ;;  %v1840_v11 = vshll.u32 %v7397_v28, %v5903_v19  ;;  %v1841_v54 = vshrl.u32 %v7335_v33, %v5924_v46  ;;  %v4293_v49 = vld [vmem:[#allocation6] sm:$0xff]  }
 0x24b   :  { %vm1597_vm6 = vweird.f32 %v7401_v45  ;;  %v1689_v6 = vand.u32 2147483647, %v1688_v32  ;;  %v1691_v0 = vcvt.s32.f32 %v1684_v60  ;;  %v6483_v14 = vand.u32 3, %v1702_v41  ;;  %v4294_v32 = vld [vmem:[#allocation6 + $0x8] sm:$0xff]   ;;  %4008 = vmatprep.subr.bf16.mxu1 %v4293_v49  ;;  %v4295_v45 = vld [vmem:[#allocation6 + $0x10] sm:$0xff]  }
 0x24c   :  { %v1775_v58 = vshrl.u32 %v1774_v51, 30  ;;  %vm1715_vm9 = vcmp.lt.s32.totalorder %v7414_v7, 0  ;;  %v1825_v4 = vor.u32 8388608, %v1824_v10  ;;  %v1833_v61 = vshrl.u32 %v7394_v55, %v5924_v46  ;;  %4009 = vmatpush3.bf16.msra.mxu1 %v4293_v49 }
 0x24d   :  { %v1842_v38 = vor.u32 %v1841_v54, %v1840_v11  ;;  %vm1849_vm8 = vcmp.lt.s32.totalorder %v5958_v42, 1  ;;  %v1692_v19 = vmul.f32 %v1691_v0, %v1689_v6  ;;  %vm1850_vm15 = vcmp.lt.s32.totalorder %v5958_v42, 2  ;;  %4010 = vmatprep.subr.bf16.mxu1 %v4294_v32 }
 0x24e   :  { %v1776_v39 = vshll.u32 %v1775_v58, 30  ;;  %vm1851_vm1 = vcmp.lt.s32.totalorder %v5958_v42, 3  ;;  %v4362_v35 = vpop.eup %4361  ;;  %v1853_v52 = vsel %vm1849_vm8, %v1833_v61, %v1836_v43  ;;  %vm7425_vm11 = vcmp.lt.s32.totalorder %v5958_v42, 4 }
 0x24f   :  { %v1854_v41 = vsel %vm7425_vm11, %v1842_v38, 2102212464  ;;  %v1857_v29 = vsel %vm1849_vm8, %v1836_v43, %v1839_v15  ;;  %v1863_v46 = vsel %vm1851_vm1, %v5966_v31, %v6008_v5  ;;  %v4364_v1 = vpop.eup %4363  ;;  %v1605_v37 = vxor.u32 2147483648, %v4362_v35 }
 0x250   :  { %v1693_v17 = vxor.u32 2147483648, %v1692_v19  ;;  %v6497_v53 = vsub.s32 %v1773_v50, %v1776_v39  ;;  %v1861_v23 = vsel %vm1849_vm8, %v1839_v15, %v1842_v38  ;;  %v1602_v60 = vxor.u32 2147483648, %v4364_v1  ;;  %4011 = vmatpush3.bf16.msra.mxu1 %v4294_v32 }
 0x251   :  { %v1799_v63 = vsub.s32 4, %v1775_v58  ;;  %v1859_v9 = vsel %vm1851_vm1, %v1842_v38, %v5982_v20  ;;  %v6502_v10 = vshll.u32 %v1825_v4, 8  ;;  %v1606_v25 = vsel %vm1604_vm2, %v1605_v37, %v4364_v1  ;;  %4012 = vmatprep.subr.bf16.mxu1 %v4295_v45 }
 0x252   :  { %v1694_v31 = vsel %vm1611_vm0, %v1693_v17, %v1692_v19  ;;  %v1779_v5 = vsub.s32 0, %v6497_v53  ;;  %v1921_v50 = vand.u32 2147483647, %v5916_v57  ;;  %v1603_v51 = vsel %vm1601_vm10, %v4362_v35, %v1602_v60 }
 0x253   :  { %v1697_v20 = vsel %vm6386_vm12, %v7409_v26, %v1694_v31  ;;  %v1855_v43 = vsel %vm1851_vm1, %v1839_v15, %v1854_v41  ;;  %v1864_v11 = vsel %vm1850_vm15, %v1861_v23, %v1863_v46  ;;  %v1607_v54 = vsel %vm1600_vm5, %v1603_v51, %v1606_v25 }
 0x254   :  { %4365 = vcosq.f32 %v1697_v20  ;;  %v3779_v6 = vmin.u32 %v1779_v5, %v6497_v53  ;;  %v1860_v0 = vsel %vm1850_vm15, %v1857_v29, %v1859_v9  ;;  %v1608_v13 = vsel %vm1597_vm6, nan, %v1607_v54  ;;  %4013 = vmatpush3.bf16.msra.mxu1 %v4295_v45 }
 0x255   :  { %4367 = vsinq.f32 %v1697_v20  ;;  %v6527_v4 = vmul.u32.u64.low %v6502_v10, %v1864_v11  ;;  %v6528_v15 = vmul.u32.u64.high %v6502_v10, %v1864_v11, %v6527_v4  ;;  %3579 = vxpose.xlu0.b32.cont [10/16] (narrow) %v1608_v13, 32  ;;  %v2237_v56 = vpack.c.bf16 %v1608_v13, %v6472_v30 }
 0x256   :  { %v1781_v61 = vclz %v3779_v6  ;;  %v6533_v38 = vsel %vm1715_vm9, %v1799_v63, %v1775_v58  ;;  %v1856_v19 = vsel %vm1850_vm15, %v1853_v52, %v1855_v43  ;;  %v6538_v39 = vshrl.u32 %v6233_v8, 5  ;;  %v4297_v6 = vld [vmem:[#allocation6 + $0x20] sm:$0xff]   ;;  %v7433_v52 = vld [vmem:[#allocation21_spill] sm:$0xff] }
 0x257   :  { %v6542_v35 = vor.u32 %v6345_v59, %v6328_v2  ;;  %v6545_v41 = vmul.u32.u64.low %v6502_v10, %v1860_v0  ;;  %v6546_v30 = vmul.u32.u64.high %v6502_v10, %v1860_v0, %v6545_v41  ;;  %v2056_v58 = vor.u32 %v6420_v3, %v6349_v62  ;;  %4000 = vmatprep.mubr.msk.bf16.mxu0 %vm2443_vm4, %v2237_v56 }
 0x258   :  { %v7426_v42 = vand.u32 2147483647, %v7414_v7  ;;  %v3780_v8 = vadd.s32 4294967294, %v1781_v61  ;;  %v6560_v2 = vand.u32 8388607, %v1921_v50  ;;  %vm1705_vm12 = vcmp.eq.s32.totalorder %v6483_v14, 0 }
 0x259   :  { %vm1708_vm14 = vcmp.eq.s32.totalorder %v6483_v14, 2  ;;  %v1769_v59 = vadd.s32 %v6426_v48, %v6433_v12  ;;  %v1872_v46 = vmul.u32 %v6502_v10, %v1856_v19  ;;  %vm1704_vm3 = vcmp.lt.s32.totalorder %v6483_v14, 2  ;;  %v4296_v48 = vld [vmem:[#allocation6 + $0x18] sm:$0xff]  }
 0x25a   :  { %vm6554_vm0 = vcmp.le.f32.partialorder %v7426_v42, 0.7853982  ;;  %vm3781_vm13 = vcmp.lt.s32.totalorder %v3780_v8, 0  ;;  %vm1874_vm10 = vc.u32 %v6528_v15, %v6545_v41  ;;  %v1937_v1 = vshrl.u32 %v7394_v55, %v6053_v47  ;;  %4014 = vmatprep.subr.bf16.mxu1 %v4296_v48 }
 0x25b   :  { %v1802_v29 = vsel %vm6554_vm0, 0, %v6533_v38  ;;  %v1942_v37 = vshrl.u32 %v7397_v28, %v6053_v47  ;;  %vm1701_vm2 = vweird.f32 %v7409_v26  ;;  %v1784_v12 = vsel %vm3781_vm13, 0, %v3780_v8  ;;  %4015 = vmatpush3.bf16.msra.mxu1 %v4296_v48 }
 0x25c   :  { %v1875_v17 = vadd.s32 1, %v6546_v30  ;;  %v1938_v23 = vshll.u32 %v7394_v55, %v6035_v34  ;;  %v1939_v60 = vshrl.u32 %v7396_v36, %v6053_v47  ;;  %v1785_v63 = vsub.s32 32, %v1784_v12  ;;  %4016 = vmatprep.subr.bf16.mxu1 %v4297_v6 }
 0x25d   :  { %v1789_v9 = vsub.s32 4294967266, %v1784_v12  ;;  %v1929_v10 = vor.u32 8388608, %v6560_v2  ;;  %v1941_v25 = vshll.u32 %v7396_v36, %v6035_v34  ;;  %v1786_v31 = vshll.u32 %v6497_v53, %v1784_v12 }
 0x25e   :  { %v1876_v5 = vsel %vm1874_vm10, %v1875_v17, %v6546_v30  ;;  %v1944_v49 = vshll.u32 %v7397_v28, %v6035_v34  ;;  %v1945_v32 = vshrl.u32 %v7335_v33, %v6053_v47  ;;  %v4366_v51 = vpop.eup %4365  ;;  %v1787_v20 = vshrl.u32 %v1769_v59, %v1785_v63 }
 0x25f   :  { %v1790_v43 = vadd.s32 127, %v1789_v9  ;;  %v1877_v11 = vadd.s32 %v1876_v5, %v1872_v46  ;;  %v1943_v54 = vor.u32 %v1942_v37, %v1941_v25  ;;  %v4368_v0 = vpop.eup %4367  ;;  %v1709_v13 = vxor.u32 2147483648, %v4366_v51  ;;  %4017 = vmatpush3.bf16.msra.mxu1 %v4297_v6 }
 0x260   :  { %v1940_v4 = vor.u32 %v1939_v60, %v1938_v23  ;;  %v1946_v53 = vor.u32 %v1945_v32, %v1944_v49  ;;  %vm1953_vm5 = vcmp.lt.s32.totalorder %v6046_v22, 1  ;;  %v1706_v56 = vxor.u32 2147483648, %v4368_v0 }
 0x261   :  { %v1788_v61 = vor.u32 %v1787_v20, %v1786_v31  ;;  %v1791_v34 = vshll.u32 %v1790_v43, 23  ;;  %v1878_v19 = vadd.s32 536870912, %v1877_v11  ;;  %v1710_v47 = vsel %vm1708_vm14, %v1709_v13, %v4368_v0  ;;  %v7431_v20 = vld [vmem:[#allocation14_spill] sm:$0xff] }
 0x262   :  { %vm1954_vm6 = vcmp.lt.s32.totalorder %v6046_v22, 2  ;;  %vm1955_vm8 = vcmp.lt.s32.totalorder %v6046_v22, 3  ;;  %v1958_v45 = vsel %vm1956_vm7, %v1946_v53, 2102212464  ;;  %v1707_v30 = vsel %vm1705_vm12, %v4366_v51, %v1706_v56  ;;  %v4298_v56 = vld [vmem:[#allocation6 + $0x28] sm:$0xff]  }
 0x263   :  { %v1792_v42 = vor.u32 4788187, %v1791_v34  ;;  %v6601_v8 = vshrl.u32 %v1878_v19, 30  ;;  %v1965_v2 = vsel %vm1953_vm5, %v1943_v54, %v1946_v53  ;;  %v1711_v59 = vsel %vm1704_vm3, %v1707_v30, %v1710_v47  ;;  %4018 = vmatprep.subr.bf16.mxu1 %v4298_v56 }
 0x264   :  { %v1961_v46 = vsel %vm1953_vm5, %v1940_v4, %v1943_v54  ;;  %v1963_v37 = vsel %vm1955_vm8, %v1946_v53, %v6317_v24  ;;  %v1967_v48 = vsel %vm1955_vm8, %v6224_v21, %v6321_v44  ;;  %v6618_v12 = vsel %vm1701_vm2, nan, %v1711_v59  ;;  %4019 = vmatpush3.bf16.msra.mxu1 %v4298_v56 }
 0x265   :  { %v1793_v17 = vand.u32 2147483647, %v1792_v42  ;;  %v1795_v23 = vcvt.s32.f32 %v1788_v61  ;;  %v1880_v14 = vshll.u32 %v6601_v8, 30  ;;  %3580 = vxpose.xlu0.b32.cont [11/16] (narrow) %v6618_v12, 32  ;;  %v1957_v60 = vsel %vm1953_vm5, %v1937_v1, %v1940_v4  ;;  %v7429_v1 = vld [vmem:[#allocation32_spill] sm:$0xff] }
 0x266   :  { %v1959_v24 = vsel %vm1955_vm8, %v1943_v54, %v1958_v45  ;;  %v1968_v63 = vsel %vm1954_vm6, %v1965_v2, %v1967_v48  ;;  %v1969_v21 = vshll.u32 %v1929_v10, 8  ;;  %v1806_v44 = vadd.s32 3, %v1802_v29  ;;  %v7430_v29 = vld [vmem:[#allocation35_spill] sm:$0xff] }
 0x267   :  { %v1796_v26 = vmul.f32 %v1795_v23, %v1793_v17  ;;  %v6632_v9 = vsub.s32 %v1877_v11, %v1880_v14  ;;  %v1964_v25 = vsel %vm1954_vm6, %v1961_v46, %v1963_v37  ;;  %v6638_v31 = vshll.u32 %v7335_v33, %v7429_v1 }
 0x268   :  { %vm2060_vm7 = vcmp.lt.s32.totalorder %v6538_v39, 4  ;;  %v6641_v5 = vmul.u32.u64.low %v1969_v21, %v1968_v63  ;;  %v6642_v10 = vmul.u32.u64.high %v1969_v21, %v1968_v63, %v6641_v5  ;;  %v1960_v38 = vsel %vm1954_vm6, %v1957_v60, %v1959_v24 }
 0x269   :  { %v1797_v49 = vxor.u32 2147483648, %v1796_v26  ;;  %v1883_v32 = vsub.s32 0, %v6632_v9  ;;  %v2025_v51 = vand.u32 2147483647, %v7430_v29  ;;  %v7432_v43 = vmov 920167782  }
 0x26a   :  { %v6650_v11 = vshrl.u32 %v7432_v43, %v7431_v20  ;;  %v2066_v54 = vsel %vm2060_vm7, %v6542_v35, 920167782  ;;  %v6655_v6 = vmul.u32.u64.low %v1969_v21, %v1964_v25  ;;  %v6656_v0 = vmul.u32.u64.high %v1969_v21, %v1964_v25, %v6655_v6  ;;  %v4300_v25 = vld [vmem:[#allocation6 + $0x38] sm:$0xff]  }
 0x26b   :  { %v2070_v22 = vsel %vm2060_vm7, %v2056_v58, 1326507024  ;;  %v1798_v13 = vsel %vm1715_vm9, %v1797_v49, %v1796_v26  ;;  %v6666_v4 = vand.u32 3, %v1806_v44  ;;  %v3783_v53 = vmin.u32 %v1883_v32, %v6632_v9 }
 0x26c   :  { %v1801_v61 = vsel %vm6554_vm0, %v7414_v7, %v1798_v13  ;;  %v1873_v34 = vadd.s32 %v6545_v41, %v6528_v15  ;;  %v1903_v62 = vsub.s32 4, %v6601_v8  ;;  %v1976_v3 = vmul.u32 %v1969_v21, %v1960_v38  ;;  %v4299_v41 = vld [vmem:[#allocation6 + $0x30] sm:$0xff]  }
 0x26d   :  { %4369 = vcosq.f32 %v1801_v61  ;;  %v1885_v58 = vclz %v3783_v53  ;;  %vm1978_vm9 = vc.u32 %v6642_v10, %v6655_v6  ;;  %v2032_v19 = vand.u32 8388607, %v2025_v51  ;;  %4020 = vmatprep.subr.bf16.mxu1 %v4299_v41 }
 0x26e   :  { %4371 = vsinq.f32 %v1801_v61  ;;  %v1979_v47 = vadd.s32 1, %v6656_v0  ;;  %v2042_v45 = vshll.u32 %v7394_v55, %v7433_v52  ;;  %v2043_v15 = vshrl.u32 %v7396_v36, %v6324_v40  ;;  %4021 = vmatpush3.bf16.msra.mxu1 %v4299_v41 }
 0x26f   :  { %v3784_v30 = vadd.s32 4294967294, %v1885_v58  ;;  %v2041_v42 = vshrl.u32 %v7394_v55, %v6324_v40  ;;  %v2045_v2 = vshll.u32 %v7396_v36, %v7433_v52  ;;  %v2046_v59 = vshrl.u32 %v7397_v28, %v6324_v40  ;;  %4022 = vmatprep.subr.bf16.mxu1 %v4300_v25 }
 0x270   :  { %vm1819_vm15 = vcmp.lt.s32.totalorder %v7424_v18, 0  ;;  %v1980_v46 = vsel %vm1978_vm9, %v1979_v47, %v6656_v0  ;;  %v2044_v37 = vor.u32 %v2043_v15, %v2042_v45  ;;  %v2048_v48 = vshll.u32 %v7397_v28, %v7433_v52 }
 0x271   :  { %v2049_v17 = vshrl.u32 %v7335_v33, %v6324_v40  ;;  %vm1812_vm1 = vcmp.eq.s32.totalorder %v6666_v4, 2  ;;  %vm3785_vm11 = vcmp.lt.s32.totalorder %v3784_v30, 0  ;;  %v1981_v23 = vadd.s32 %v1980_v46, %v1976_v3 }
 0x272   :  { %v2033_v14 = vor.u32 8388608, %v2032_v19  ;;  %v2047_v60 = vor.u32 %v2046_v59, %v2045_v2  ;;  %vm1809_vm0 = vcmp.eq.s32.totalorder %v6666_v4, 0  ;;  %v1888_v24 = vsel %vm3785_vm11, 0, %v3784_v30  ;;  %4023 = vmatpush3.bf16.msra.mxu1 %v4300_v25 }
 0x273   :  { %v2050_v63 = vor.u32 %v2049_v17, %v2048_v48  ;;  %vm2057_vm12 = vcmp.lt.s32.totalorder %v6538_v39, 1  ;;  %vm2058_vm14 = vcmp.lt.s32.totalorder %v6538_v39, 2  ;;  %vm1808_vm3 = vcmp.lt.s32.totalorder %v6666_v4, 2 }
 0x274   :  { %vm6703_vm13 = vcmp.le.f32.partialorder %v1817_v27, 0.7853982  ;;  %v1889_v21 = vsub.s32 32, %v1888_v24  ;;  %v1893_v26 = vsub.s32 4294967266, %v1888_v24  ;;  %v1982_v44 = vadd.s32 536870912, %v1981_v23 }
 0x275   :  { %vm2059_vm10 = vcmp.lt.s32.totalorder %v6538_v39, 3  ;;  %v1890_v5 = vshll.u32 %v6632_v9, %v1888_v24  ;;  %v2062_v49 = vsel %vm2060_vm7, %v2050_v63, 2102212464  ;;  %v2065_v32 = vsel %vm2057_vm12, %v2044_v37, %v2047_v60 }
 0x276   :  { %v2067_v27 = vsel %vm2059_vm10, %v2050_v63, %v2066_v54  ;;  %v1891_v38 = vshrl.u32 %v1873_v34, %v1889_v21  ;;  %v1894_v0 = vadd.s32 127, %v1893_v26  ;;  %v6715_v13 = vshrl.u32 %v1982_v44, 30 }
 0x277   :  { %v2069_v53 = vsel %vm2057_vm12, %v2047_v60, %v2050_v63  ;;  %v2061_v9 = vsel %vm2057_vm12, %v2041_v42, %v2044_v37  ;;  %v2068_v56 = vsel %vm2058_vm14, %v2065_v32, %v2067_v27  ;;  %v2071_v61 = vsel %vm2059_vm10, %v6542_v35, %v2070_v22  ;;  %v4370_v54 = vpop.eup %4369 }
 0x278   :  { %v2073_v3 = vshll.u32 %v2033_v14, 8  ;;  %v1892_v34 = vor.u32 %v1891_v38, %v1890_v5  ;;  %v1895_v58 = vshll.u32 %v1894_v0, 23  ;;  %v1984_v19 = vshll.u32 %v6715_v13, 30  ;;  %v4372_v52 = vpop.eup %4371 }
 0x279   :  { %v2063_v47 = vsel %vm2059_vm10, %v2047_v60, %v2062_v49  ;;  %v1813_v45 = vxor.u32 2147483648, %v4370_v54  ;;  %v2072_v15 = vsel %vm2058_vm14, %v2069_v53, %v2071_v61  ;;  %v1810_v35 = vxor.u32 2147483648, %v4372_v52 }
 0x27a   :  { %v6731_v41 = vmul.u32.u64.low %v2073_v3, %v2068_v56  ;;  %v6732_v30 = vmul.u32.u64.high %v2073_v3, %v2068_v56, %v6731_v41  ;;  %v1896_v22 = vor.u32 4788187, %v1895_v58  ;;  %v1904_v42 = vsel %vm1819_vm15, %v1903_v62, %v6601_v8 }
 0x27b   :  { %v6740_v2 = vsub.s32 %v1981_v23, %v1984_v19  ;;  %v1814_v59 = vsel %vm1812_vm1, %v1813_v45, %v4372_v52  ;;  %v2064_v46 = vsel %vm2058_vm14, %v2061_v9, %v2063_v47  ;;  %v1811_v17 = vsel %vm1809_vm0, %v4370_v54, %v1810_v35  ;;  %v7437_v54 = vld [vmem:[#allocation29_spill] sm:$0xff] }
 0x27c   :  { %v6746_v37 = vmul.u32.u64.low %v2073_v3, %v2072_v15  ;;  %v6747_v48 = vmul.u32.u64.high %v2073_v3, %v2072_v15, %v6746_v37  ;;  %v1897_v14 = vand.u32 2147483647, %v1896_v22  ;;  %v1899_v60 = vcvt.s32.f32 %v1892_v34 }
 0x27d   :  { %v1987_v24 = vsub.s32 0, %v6740_v2  ;;  %vm1805_vm2 = vweird.f32 %v7414_v7  ;;  %v1815_v8 = vsel %vm1808_vm3, %v1811_v17, %v1814_v59  ;;  %v1906_v62 = vsel %vm6703_vm13, 0, %v1904_v42 }
 0x27e   :  { %v2083_v39 = vadd.s32 1, %v6732_v30  ;;  %v2159_v23 = vshrl.u32 %v7267_v16, %v7431_v20  ;;  %v1816_v63 = vsel %vm1805_vm2, nan, %v1815_v8  ;;  %v1900_v21 = vmul.f32 %v1899_v60, %v1897_v14 }
 0x27f   :  { %v3787_v26 = vmin.u32 %v1987_v24, %v6740_v2  ;;  %v6763_v44 = vor.u32 %v6650_v11, %v6638_v31  ;;  %v2238_v7 = vpack.c.bf16 %v1816_v63, %v6618_v12  ;;  %3581 = vxpose.xlu0.b32.cont [12/16] (narrow) %v1816_v63, 32  ;;  %v2080_v4 = vmul.u32 %v2073_v3, %v2064_v46  ;;  %v7436_v31 = vld [vmem:[#allocation37_spill] sm:$0xff] }
 0x280   :  { %vm2082_vm5 = vc.u32 %v6747_v48, %v6731_v41  ;;  %v1901_v25 = vxor.u32 2147483648, %v1900_v21  ;;  %v1910_v5 = vadd.s32 3, %v1906_v62  ;;  %v2158_v32 = vshll.u32 %v7432_v43, %v7429_v1 }
 0x281   :  { %v1989_v49 = vclz %v3787_v26  ;;  %v2084_v16 = vsel %vm2082_vm5, %v2083_v39, %v6732_v30  ;;  %4001 = vmatmul.mubr.msk.bf16.gmra.mrb[8].mxu0 %vm2443_vm4, %v2238_v7  ;;  %vm2164_vm6 = vcmp.lt.s32.totalorder %v7436_v31, 4  ;;  %vm1923_vm8 = vcmp.lt.s32.totalorder %v5916_v57, 0 }
 0x282   :  { %v2085_v27 = vadd.s32 %v2084_v16, %v2080_v4  ;;  %v1902_v12 = vsel %vm1819_vm15, %v1901_v25, %v1900_v21  ;;  %v2160_v38 = vor.u32 %v2159_v23, %v2158_v32  ;;  %v2170_v0 = vsel %vm2164_vm6, %v6763_v44, 920167782 }
 0x283   :  { %v3788_v11 = vadd.s32 4294967294, %v1989_v49  ;;  %v1905_v43 = vsel %vm6703_vm13, %v7424_v18, %v1902_v12  ;;  %v6782_v9 = vand.u32 3, %v1910_v5  ;;  %v1977_v56 = vadd.s32 %v6655_v6, %v6642_v10 }
 0x284   :  { %v2086_v53 = vadd.s32 536870912, %v2085_v27  ;;  %4373 = vcosq.f32 %v1905_v43  ;;  %v2129_v34 = vand.u32 2147483647, %v7437_v54  ;;  %v2007_v47 = vsub.s32 4, %v6715_v13 }
 0x285   :  { %vm3789_vm7 = vcmp.lt.s32.totalorder %v3788_v11, 0  ;;  %4375 = vsinq.f32 %v1905_v43  ;;  %v2147_v40 = vshrl.u32 %v7396_v36, %v7431_v20  ;;  %v2149_v10 = vshll.u32 %v7396_v36, %v7429_v1 }
 0x286   :  { %v1992_v61 = vsel %vm3789_vm7, 0, %v3788_v11  ;;  %v6786_v3 = vshrl.u32 %v2086_v53, 30  ;;  %v2150_v6 = vshrl.u32 %v7397_v28, %v7431_v20  ;;  %v2152_v35 = vshll.u32 %v7397_v28, %v7429_v1 }
 0x287   :  { %v1993_v58 = vsub.s32 32, %v1992_v61  ;;  %v1997_v19 = vsub.s32 4294967266, %v1992_v61  ;;  %v1994_v52 = vshll.u32 %v6740_v2, %v1992_v61  ;;  %v2153_v22 = vshrl.u32 %v7335_v33, %v7431_v20 }
 0x288   :  { %v2088_v45 = vshll.u32 %v6786_v3, 30  ;;  %v2174_v42 = vsel %vm2164_vm6, %v2160_v38, 1326507024  ;;  %v2136_v59 = vand.u32 8388607, %v2129_v34  ;;  %v2146_v36 = vshll.u32 %v7394_v55, %v7429_v1 }
 0x289   :  { %v1995_v15 = vshrl.u32 %v1977_v56, %v1993_v58  ;;  %v1998_v30 = vadd.s32 127, %v1997_v19  ;;  %v2151_v17 = vor.u32 %v2150_v6, %v2149_v10  ;;  %v2154_v14 = vor.u32 %v2153_v22, %v2152_v35 }
 0x28a   :  { %v6804_v2 = vsub.s32 %v2085_v27, %v2088_v45  ;;  %vm1909_vm9 = vweird.f32 %v7424_v18  ;;  %vm1912_vm15 = vcmp.lt.s32.totalorder %v6782_v9, 2  ;;  %vm1913_vm1 = vcmp.eq.s32.totalorder %v6782_v9, 0 }
 0x28b   :  { %v1996_v46 = vor.u32 %v1995_v15, %v1994_v52  ;;  %v1999_v37 = vshll.u32 %v1998_v30, 23  ;;  %v2148_v28 = vor.u32 %v2147_v40, %v2146_v36  ;;  %vm1916_vm11 = vcmp.eq.s32.totalorder %v6782_v9, 2 }
 0x28c   :  { %v2091_v33 = vsub.s32 0, %v6804_v2  ;;  %vm6817_vm0 = vcmp.le.f32.partialorder %v1921_v50, 0.7853982  ;;  %v2008_v24 = vsel %vm1923_vm8, %v2007_v47, %v6715_v13  ;;  %v2081_v8 = vadd.s32 %v6731_v41, %v6747_v48 }
 0x28d   :  { %v2000_v1 = vor.u32 4788187, %v1999_v37  ;;  %v2137_v39 = vor.u32 8388608, %v2136_v59  ;;  %v2145_v23 = vshrl.u32 %v7394_v55, %v7431_v20  ;;  %vm2161_vm12 = vcmp.lt.s32.totalorder %v7436_v31, 1 }
 0x28e   :  { %v3791_v62 = vmin.u32 %v2091_v33, %v6804_v2  ;;  %v4374_v50 = vpop.eup %4373  ;;  %v2003_v21 = vcvt.s32.f32 %v1996_v46  ;;  %vm2163_vm14 = vcmp.lt.s32.totalorder %v7436_v31, 3  ;;  %v2173_v26 = vsel %vm2161_vm12, %v2151_v17, %v2154_v14 }
 0x28f   :  { %v2001_v63 = vand.u32 2147483647, %v2000_v1  ;;  %v4376_v13 = vpop.eup %4375  ;;  %v1917_v7 = vxor.u32 2147483648, %v4374_v50  ;;  %v2169_v41 = vsel %vm2161_vm12, %v2148_v28, %v2151_v17  ;;  %v2171_v48 = vsel %vm2163_vm14, %v2154_v14, %v2170_v0 }
 0x290   :  { %v2093_v4 = vclz %v3791_v62  ;;  %v1914_v55 = vxor.u32 2147483648, %v4376_v13  ;;  %vm2162_vm3 = vcmp.lt.s32.totalorder %v7436_v31, 2  ;;  %v2175_v25 = vsel %vm2163_vm14, %v6763_v44, %v2174_v42 }
 0x291   :  { %v2004_v20 = vmul.f32 %v2003_v21, %v2001_v63  ;;  %v1918_v5 = vsel %vm1916_vm11, %v1917_v7, %v4376_v13  ;;  %v2176_v16 = vsel %vm2162_vm3, %v2173_v26, %v2175_v25  ;;  %v2177_v32 = vshll.u32 %v2137_v39, 8 }
 0x292   :  { %v3792_v49 = vadd.s32 4294967294, %v2093_v4  ;;  %v1915_v27 = vsel %vm1913_vm1, %v4374_v50, %v1914_v55  ;;  %v2166_v11 = vsel %vm2164_vm6, %v2154_v14, 2102212464  ;;  %v2172_v38 = vsel %vm2162_vm3, %v2169_v41, %v2171_v48 }
 0x293   :  { %v2005_v12 = vxor.u32 2147483648, %v2004_v20  ;;  %v1919_v44 = vsel %vm1912_vm15, %v1915_v27, %v1918_v5  ;;  %v6853_v0 = vmul.u32.u64.low %v2177_v32, %v2176_v16  ;;  %v6854_v43 = vmul.u32.u64.high %v2177_v32, %v2176_v16, %v6853_v0 }
 0x294   :  { %vm3793_vm13 = vcmp.lt.s32.totalorder %v3792_v49, 0  ;;  %v6858_v53 = vsel %vm1909_vm9, nan, %v1919_v44  ;;  %v2165_v58 = vsel %vm2161_vm12, %v2145_v23, %v2148_v28  ;;  %v2167_v18 = vsel %vm2163_vm14, %v2151_v17, %v2166_v11 }
 0x295   :  { %v2006_v56 = vsel %vm1923_vm8, %v2005_v12, %v2004_v20  ;;  %v2096_v61 = vsel %vm3793_vm13, 0, %v3792_v49  ;;  %3582 = vxpose.xlu0.b32.cont [13/16] (narrow) %v6858_v53, 32  ;;  %v2010_v40 = vsel %vm6817_vm0, 0, %v2008_v24  ;;  %v2168_v30 = vsel %vm2162_vm3, %v2165_v58, %v2167_v18 }
 0x296   :  { %v2009_v9 = vsel %vm6817_vm0, %v5916_v57, %v2006_v56  ;;  %v2097_v19 = vsub.s32 32, %v2096_v61  ;;  %v2101_v47 = vsub.s32 4294967266, %v2096_v61  ;;  %v2098_v10 = vshll.u32 %v6804_v2, %v2096_v61 }
 0x297   :  { %4377 = vcosq.f32 %v2009_v9  ;;  %v6872_v52 = vmul.u32.u64.low %v2177_v32, %v2172_v38  ;;  %v6873_v45 = vmul.u32.u64.high %v2177_v32, %v2172_v38, %v6872_v52  ;;  %v2014_v42 = vadd.s32 3, %v2010_v40 }
 0x298   :  { %4379 = vsinq.f32 %v2009_v9  ;;  %v2099_v6 = vshrl.u32 %v2081_v8, %v2097_v19  ;;  %v2102_v15 = vadd.s32 127, %v2101_v47  ;;  %v2184_v46 = vmul.u32 %v2177_v32, %v2168_v30 }
 0x299   :  { %vm2186_vm10 = vc.u32 %v6854_v43, %v6872_v52  ;;  %v2187_v59 = vadd.s32 1, %v6873_v45  ;;  %v2015_v2 = vand.u32 3, %v2014_v42  ;;  %v2111_v28 = vsub.s32 4, %v6786_v3 }
 0x29a   :  { %v2100_v35 = vor.u32 %v2099_v6, %v2098_v10  ;;  %v2103_v22 = vshll.u32 %v2102_v15, 23  ;;  %vm2027_vm2 = vcmp.lt.s32.totalorder %v7430_v29, 0  ;;  %vm6885_vm6 = vcmp.le.f32.partialorder %v2025_v51, 0.7853982 }
 0x29b   :  { %v2188_v37 = vsel %vm2186_vm10, %v2187_v59, %v6873_v45  ;;  %vm2020_vm5 = vcmp.eq.s32.totalorder %v2015_v2, 2  ;;  %v2112_v63 = vsel %vm2027_vm2, %v2111_v28, %v6786_v3  ;;  %vm2017_vm8 = vcmp.eq.s32.totalorder %v2015_v2, 0 }
 0x29c   :  { %v2104_v36 = vor.u32 4788187, %v2103_v22  ;;  %v2107_v14 = vcvt.s32.f32 %v2100_v35  ;;  %v2189_v33 = vadd.s32 %v2188_v37, %v2184_v46  ;;  %vm2013_vm7 = vweird.f32 %v5916_v57 }
 0x29d   :  { %vm2016_vm9 = vcmp.lt.s32.totalorder %v2015_v2, 2  ;;  %v2114_v51 = vsel %vm6885_vm6, 0, %v2112_v63  ;;  %v2185_v44 = vadd.s32 %v6872_v52, %v6854_v43  ;;  %vm2117_vm12 = vweird.f32 %v7430_v29 }
 0x29e   :  { %v2105_v17 = vand.u32 2147483647, %v2104_v36  ;;  %v2190_v31 = vadd.s32 536870912, %v2189_v33  ;;  %v2118_v25 = vadd.s32 3, %v2114_v51  ;;  %vm2131_vm14 = vcmp.lt.s32.totalorder %v7437_v54, 0 }
 0x29f   :  { %vm2130_vm3 = vcmp.le.f32.partialorder %v2129_v34, 0.7853982 }
 0x2a0   :  { %v2108_v60 = vmul.f32 %v2107_v14, %v2105_v17  ;;  %v2191_v39 = vshrl.u32 %v2190_v31, 30  ;;  %v2119_v49 = vand.u32 3, %v2118_v25  ;;  %v6909_v31 = vld [vmem:[%s7140_s9] sm:$0x1f]  ;;  %s3824_s9 = sld [smem:[#allocation2 + $0x1]] }
 0x2a1   :  { %v4378_v1 = vpop.eup %4377 }
 0x2a2   :  { %v4380_v24 = vpop.eup %4379  ;;  %v2021_v8 = vxor.u32 2147483648, %v4378_v1  ;;  %v2109_v62 = vxor.u32 2147483648, %v2108_v60  ;;  %v2192_v13 = vshll.u32 %v2191_v39, 30  ;;  %vm2124_vm1 = vcmp.eq.s32.totalorder %v2119_v49, 2 }
 0x2a3   :  { %v2018_v23 = vxor.u32 2147483648, %v4380_v24  ;;  %vm2120_vm11 = vcmp.lt.s32.totalorder %v2119_v49, 2  ;;  %vm2121_vm0 = vcmp.eq.s32.totalorder %v2119_v49, 0  ;;  %v2215_v52 = vsub.s32 4, %v2191_v39 }
 0x2a4   :  { %v2022_v21 = vsel %vm2020_vm5, %v2021_v8, %v4380_v24  ;;  %v2110_v26 = vsel %vm2027_vm2, %v2109_v62, %v2108_v60  ;;  %v2193_v48 = vsub.s32 %v2189_v33, %v2192_v13  ;;  %vm2221_vm5 = vweird.f32 %v7437_v54 }
 0x2a5   :  { %v2019_v7 = vsel %vm2017_vm8, %v4378_v1, %v2018_v23  ;;  %v2113_v4 = vsel %vm6885_vm6, %v7430_v29, %v2110_v26  ;;  %v2216_v22 = vsel %vm2131_vm14, %v2215_v52, %v2191_v39  ;;  %v7442_v1 = vld [vmem:[#allocation12_spill] sm:$0xff]  ;;  %v6916_v39 = vstv %s2601_s3 }
 0x2a6   :  { %v2023_v41 = vsel %vm2016_vm9, %v2019_v7, %v2022_v21  ;;  %4381 = vcosq.f32 %v2113_v4  ;;  %v2195_v20 = vsub.s32 0, %v2193_v48  ;;  %v2218_v42 = vsel %vm2130_vm3, 0, %v2216_v22  ;;  %v4306_v52 = vld [vmem:[#allocation6 + $0x68] sm:$0xff]  }
 0x2a7   :  { %v2024_v55 = vsel %vm2013_vm7, nan, %v2023_v41  ;;  %4383 = vsinq.f32 %v2113_v4  ;;  %v2222_v59 = vadd.s32 3, %v2218_v42  ;;  %v7443_v24 = vsub.s32 0, %v7442_v1 }
 0x2a8   :  { %3583 = vxpose.xlu0.b32.cont [14/16] (narrow) %v2024_v55, 32  ;;  %v2239_v3 = vpack.c.bf16 %v2024_v55, %v6858_v53  ;;  %v3795_v57 = vmin.u32 %v2195_v20, %v2193_v48 }
 0x2a9   :  { %v2223_v36 = vand.u32 3, %v2222_v59  ;;  %v6914_v8 = vrot.slane %v6909_v31, %v7443_v24 }
 0x2aa   :  { %4004 = vmatprep.mubr.msk.bf16.mxu0 %vm2443_vm4, %v2239_v3  ;;  %v2197_v5 = vclz %v3795_v57 }
 0x2ab   :  { %vm2228_vm13 = vcmp.eq.s32.totalorder %v2223_v36, 2  ;;  %vm2225_vm10 = vcmp.eq.s32.totalorder %v2223_v36, 0  ;;  %vm2224_vm2 = vcmp.lt.s32.totalorder %v2223_v36, 2 }
 0x2ac   :  { %v3796_v16 = vadd.s32 4294967294, %v2197_v5 }
 0x2ae   :  { %vm3797_vm15 = vcmp.lt.s32.totalorder %v3796_v16, 0 }
 0x2af   :  { %v2200_v11 = vsel %vm3797_vm15, 0, %v3796_v16 }
 0x2b0   :  { %v4382_v32 = vpop.eup %4381  ;;  %v2201_v0 = vsub.s32 32, %v2200_v11  ;;  %v2205_v56 = vsub.s32 4294967266, %v2200_v11  ;;  %v2202_v58 = vshll.u32 %v2193_v48, %v2200_v11 }
 0x2b1   :  { %v4384_v27 = vpop.eup %4383  ;;  %v2125_v12 = vxor.u32 2147483648, %v4382_v32 }
 0x2b2   :  { %v2122_v38 = vxor.u32 2147483648, %v4384_v27  ;;  %v2203_v9 = vshrl.u32 %v2185_v44, %v2201_v0  ;;  %v2206_v19 = vadd.s32 127, %v2205_v56 }
 0x2b3   :  { %v2126_v53 = vsel %vm2124_vm1, %v2125_v12, %v4384_v27 }
 0x2b4   :  { %v2123_v61 = vsel %vm2121_vm0, %v4382_v32, %v2122_v38  ;;  %v2204_v40 = vor.u32 %v2203_v9, %v2202_v58  ;;  %v2207_v45 = vshll.u32 %v2206_v19, 23 }
 0x2b5   :  { %v2127_v47 = vsel %vm2120_vm11, %v2123_v61, %v2126_v53 }
 0x2b6   :  { %v2128_v18 = vsel %vm2117_vm12, nan, %v2127_v47  ;;  %v2208_v10 = vor.u32 4788187, %v2207_v45  ;;  %v2211_v15 = vcvt.s32.f32 %v2204_v40  ;;  %v7444_v40 = vmov 0   ;;  %v4301_v45 = vld [vmem:[#allocation6 + $0x40] sm:$0xff]  }
 0x2b7   :  { %3584 = vxpose.xlu0.b32.cont [15/16] (narrow) %v2128_v18, 32  ;;  %4040 = vmatprep.subr.bf16.mxu1 %v4301_v45 }
 0x2b8   :  { %v2209_v6 = vand.u32 2147483647, %v2208_v10  ;;  %v4302_v10 = vld [vmem:[#allocation6 + $0x48] sm:$0xff]  }
 0x2ba   :  { %v2212_v43 = vmul.f32 %v2211_v15, %v2209_v6  ;;  %v4303_v6 = vld [vmem:[#allocation6 + $0x50] sm:$0xff]   ;;  %v4304_v15 = vld [vmem:[#allocation6 + $0x58] sm:$0xff]  }
 0x2bc   :  { %v2213_v30 = vxor.u32 2147483648, %v2212_v43 }
 0x2be   :  { %v2214_v35 = vsel %vm2131_vm14, %v2213_v30, %v2212_v43  ;;  %v4305_v43 = vld [vmem:[#allocation6 + $0x60] sm:$0xff]   ;;  %v4307_v30 = vld [vmem:[#allocation6 + $0x70] sm:$0xff]  }
 0x2bf   :  { %v2217_v29 = vsel %vm2130_vm3, %v7437_v54, %v2214_v35  ;;  %v4308_v35 = vld [vmem:[#allocation6 + $0x78] sm:$0xff]  }
 0x2c0   :  { %4385 = vcosq.f32 %v2217_v29 }
 0x2c1   :  { %4387 = vsinq.f32 %v2217_v29 }
 0x2ca   :  { %v4386_v46 = vpop.eup %4385 }
 0x2cb   :  { %v4388_v37 = vpop.eup %4387  ;;  %v2229_v17 = vxor.u32 2147483648, %v4386_v46 }
 0x2cc   :  { %v2226_v14 = vxor.u32 2147483648, %v4388_v37 }
 0x2cd   :  { %v2230_v33 = vsel %vm2228_vm13, %v2229_v17, %v4388_v37 }
 0x2ce   :  { %v2227_v2 = vsel %vm2225_vm10, %v4386_v46, %v2226_v14 }
 0x2cf   :  { %v2231_v34 = vsel %vm2224_vm2, %v2227_v2, %v2230_v33 }
 0x2d0   :  { %v2232_v28 = vsel %vm2221_vm5, nan, %v2231_v34 }
 0x2d1   :  { %v2240_v60 = vpack.c.bf16 %v2232_v28, %v2128_v18  ;;  %3585 = vxpose.xlu0.b32.end [16/16] (narrow) %v2232_v28, 32 }
 0x2d3   :  { %4005 = vmatmul.mubr.msk.bf16.gmra.mrb[12].mxu0 %vm2443_vm4, %v2240_v60 }
 0x2e5   :  { %v3994_v62 = vpop.f32.mrb[0].mxu0 }
 0x2e6   :  { %v2571_v54 = vadd.f32 %v3994_v62, %v6914_v8  ;;  %v2502_v23 = vpop.f32.mrb[1].mxu0 }
 0x2e7   :  { %v2569_v50 = vadd.f32 %v6914_v8, %v2502_v23  ;;  %v3995_v63 = vpop.f32.mrb[2].mxu0 }
 0x2e8   :  { %v2605_v21 = vmul.f32 %v6916_v39, %v2571_v54  ;;  %v2572_v26 = vadd.f32 %v3995_v63, %v6914_v8  ;;  %v2505_v13 = vpop.f32.mrb[3].mxu0  ;;  %vm2587_vm6 = vcmp.gt.f32.partialorder %v2571_v54, 0.0 }
 0x2e9   :  { %v2603_v7 = vmul.f32 %v6916_v39, %v2569_v50  ;;  %v2570_v4 = vadd.f32 %v6914_v8, %v2505_v13  ;;  %vm2585_vm7 = vcmp.gt.f32.partialorder %v2569_v50, 0.0 }
 0x2ea   :  { %vm2588_vm8 = vcmp.gt.f32.partialorder %v2572_v26, 0.0  ;;  %v2606_v41 = vmul.f32 %v6916_v39, %v2572_v26  ;;  %v2621_v48 = vsel %vm2587_vm6, %v2571_v54, %v2605_v21 }
 0x2eb   :  { %v2604_v51 = vmul.f32 %v6916_v39, %v2570_v4  ;;  %vm2586_vm9 = vcmp.gt.f32.partialorder %v2570_v4, 0.0  ;;  %v2619_v20 = vsel %vm2585_vm7, %v2569_v50, %v2603_v7 }
 0x2ec   :  { %v2622_v55 = vsel %vm2588_vm8, %v2572_v26, %v2606_v41 }
 0x2ed   :  { %v3998_v3 = vpop.f32.mrb[4].mxu0  ;;  %v2620_v25 = vsel %vm2586_vm9, %v2570_v4, %v2604_v51  ;;  %v2636_v57 = vpack.c.bf16 %v2622_v55, %v2621_v48 }
 0x2ee   :  { %v2575_v5 = vadd.f32 %v3998_v3, %v6914_v8  ;;  %v2518_v49 = vpop.f32.mrb[5].mxu0  ;;  %v2635_v16 = vpack.c.bf16 %v2620_v25, %v2619_v20 }
 0x2ef   :  { %v2573_v32 = vadd.f32 %v6914_v8, %v2518_v49  ;;  %v3999_v27 = vpop.f32.mrb[6].mxu0 }
 0x2f0   :  { %v2609_v12 = vmul.f32 %v6916_v39, %v2575_v5  ;;  %v2576_v11 = vadd.f32 %v3999_v27, %v6914_v8  ;;  %v2521_v38 = vpop.f32.mrb[7].mxu0  ;;  %4024 = vmatprep.mubr.bf16.mxu1 %v2635_v16  ;;  %vm2591_vm15 = vcmp.gt.f32.partialorder %v2575_v5, 0.0 }
 0x2f1   :  { %v2607_v44 = vmul.f32 %v6916_v39, %v2573_v32  ;;  %v2574_v0 = vadd.f32 %v6914_v8, %v2521_v38  ;;  %4025 = vmatmul.mubr.bf16.vlgmr.msra.gmra.mrb[0].mxu1 %v2636_v57  ;;  %vm2589_vm1 = vcmp.gt.f32.partialorder %v2573_v32, 0.0 }
 0x2f2   :  { %vm2592_vm11 = vcmp.gt.f32.partialorder %v2576_v11, 0.0  ;;  %v2610_v56 = vmul.f32 %v6916_v39, %v2576_v11  ;;  %v2625_v61 = vsel %vm2591_vm15, %v2575_v5, %v2609_v12  ;;  %4041 = vmatpush3.bf16.msra.mxu1 %v4301_v45  ;;  %v6956_v12 = vstv %s3824_s9 }
 0x2f3   :  { %vm2590_vm0 = vcmp.gt.f32.partialorder %v2574_v0, 0.0  ;;  %v2608_v53 = vmul.f32 %v6916_v39, %v2574_v0  ;;  %v2623_v9 = vsel %vm2589_vm1, %v2573_v32, %v2607_v44  ;;  %4042 = vmatprep.subr.bf16.mxu1 %v4302_v10  ;;  %v7445_v32 = vsub.s32 1, %v7442_v1 }
 0x2f4   :  { %v2626_v58 = vsel %vm2592_vm11, %v2576_v11, %v2610_v56 }
 0x2f5   :  { %v2624_v19 = vsel %vm2590_vm0, %v2574_v0, %v2608_v53  ;;  %v2638_v47 = vpack.c.bf16 %v2626_v58, %v2625_v61 }
 0x2f6   :  { %v2637_v18 = vpack.c.bf16 %v2624_v19, %v2623_v9  ;;  %4043 = vmatpush3.bf16.msra.mxu1 %v4302_v10 }
 0x2f7   :  { %4044 = vmatprep.subr.bf16.mxu1 %v4303_v6 }
 0x2f8   :  { %4028 = vmatprep.mubr.bf16.mxu1 %v2637_v18 }
 0x2f9   :  { %4029 = vmatmul.mubr.bf16.gmra.mrb[4].mxu1 %v2638_v47 }
 0x2fa   :  { %4282 = vset.pattern.permute.xlu0 %v7444_v40  ;;  %4045 = vmatpush3.bf16.msra.mxu1 %v4303_v6 }
 0x2fb   :  { %4046 = vmatprep.subr.bf16.mxu1 %v4304_v15 }
 0x2fe   :  { %4047 = vmatpush3.bf16.msra.mxu1 %v4304_v15 }
 0x2ff   :  { %4048 = vmatprep.subr.bf16.mxu1 %v4305_v43 }
 0x302   :  { %4049 = vmatpush3.bf16.msra.mxu1 %v4305_v43 }
 0x303   :  { %4050 = vmatprep.subr.bf16.mxu1 %v4306_v52 }
 0x306   :  { %4051 = vmatpush3.bf16.msra.mxu1 %v4306_v52 }
 0x307   :  { %4052 = vmatprep.subr.bf16.mxu1 %v4307_v30 }
 0x30a   :  { %4053 = vmatpush3.bf16.msra.mxu1 %v4307_v30 }
 0x30b   :  { %4054 = vmatprep.subr.bf16.mxu1 %v4308_v35 }
 0x30e   :  { %4055 = vmatpush3.bf16.msra.mxu1 %v4308_v35 }
 0x354   :  { %v4002_v22 = vpop.f32.mrb[8].mxu0 }
 0x355   :  { %v2579_v29 = vadd.f32 %v4002_v22, %v6914_v8  ;;  %v2534_v42 = vpop.f32.mrb[9].mxu0 }
 0x356   :  { %v2577_v59 = vadd.f32 %v6914_v8, %v2534_v42  ;;  %v4003_v36 = vpop.f32.mrb[10].mxu0 }
 0x357   :  { %v2613_v46 = vmul.f32 %v6916_v39, %v2579_v29  ;;  %v2580_v37 = vadd.f32 %v4003_v36, %v6914_v8  ;;  %v2537_v17 = vpop.f32.mrb[11].mxu0  ;;  %vm2595_vm12 = vcmp.gt.f32.partialorder %v2579_v29, 0.0 }
 0x358   :  { %v2611_v14 = vmul.f32 %v6916_v39, %v2577_v59  ;;  %v2578_v33 = vadd.f32 %v6914_v8, %v2537_v17  ;;  %vm2593_vm14 = vcmp.gt.f32.partialorder %v2577_v59, 0.0 }
 0x359   :  { %vm2596_vm3 = vcmp.gt.f32.partialorder %v2580_v37, 0.0  ;;  %v2614_v2 = vmul.f32 %v6916_v39, %v2580_v37  ;;  %v2629_v28 = vsel %vm2595_vm12, %v2579_v29, %v2613_v46 }
 0x35a   :  { %vm2594_vm13 = vcmp.gt.f32.partialorder %v2578_v33, 0.0  ;;  %v2612_v34 = vmul.f32 %v6916_v39, %v2578_v33  ;;  %v2627_v24 = vsel %vm2593_vm14, %v2577_v59, %v2611_v14 }
 0x35b   :  { %v2630_v60 = vsel %vm2596_vm3, %v2580_v37, %v2614_v2 }
 0x35c   :  { %v2628_v62 = vsel %vm2594_vm13, %v2578_v33, %v2612_v34  ;;  %v2640_v54 = vpack.c.bf16 %v2630_v60, %v2629_v28  ;;  %v4309_v60 = vld [vmem:[#allocation6 + $0x80] sm:$0xff]  }
 0x35d   :  { %v2639_v23 = vpack.c.bf16 %v2628_v62, %v2627_v24  ;;  %v4310_v24 = vld [vmem:[#allocation6 + $0x88] sm:$0xff]   ;;  %4072 = vmatprep.subr.bf16.mxu0 %v4309_v60  ;;  %v4311_v62 = vld [vmem:[#allocation6 + $0x90] sm:$0xff]  }
 0x35e   :  { %4073 = vmatpush3.bf16.msra.mxu0 %v4309_v60 }
 0x35f   :  { %4032 = vmatprep.mubr.bf16.mxu1 %v2639_v23  ;;  %4074 = vmatprep.subr.bf16.mxu0 %v4310_v24  ;;  %v4313_v23 = vld [vmem:[#allocation6 + $0xa0] sm:$0xff]  }
 0x360   :  { %4033 = vmatmul.mubr.bf16.gmra.mrb[8].mxu1 %v2640_v54  ;;  %v4312_v54 = vld [vmem:[#allocation6 + $0x98] sm:$0xff]  }
 0x362   :  { %4075 = vmatpush3.bf16.msra.mxu0 %v4310_v24 }
 0x363   :  { %4076 = vmatprep.subr.bf16.mxu0 %v4311_v62 }
 0x366   :  { %4077 = vmatpush3.bf16.msra.mxu0 %v4311_v62 }
 0x367   :  { %4078 = vmatprep.subr.bf16.mxu0 %v4312_v54 }
 0x36a   :  { %4079 = vmatpush3.bf16.msra.mxu0 %v4312_v54 }
 0x36b   :  { %4080 = vmatprep.subr.bf16.mxu0 %v4313_v23 }
 0x36e   :  { %4081 = vmatpush3.bf16.msra.mxu0 %v4313_v23 }
 0x3a6   :  { %v4006_v50 = vpop.f32.mrb[12].mxu0 }
 0x3a7   :  { %v2583_v63 = vadd.f32 %v4006_v50, %v6914_v8  ;;  %v2550_v21 = vpop.f32.mrb[13].mxu0  ;;  %v4314_v50 = vld [vmem:[#allocation6 + $0xa8] sm:$0xff]  }
 0x3a8   :  { %v2581_v26 = vadd.f32 %v6914_v8, %v2550_v21  ;;  %v4007_v13 = vpop.f32.mrb[14].mxu0  ;;  %4082 = vmatprep.subr.bf16.mxu0 %v4314_v50  ;;  %v4316_v21 = vld [vmem:[#allocation6 + $0xb8] sm:$0xff]  }
 0x3a9   :  { %v2617_v7 = vmul.f32 %v6916_v39, %v2583_v63  ;;  %v2584_v4 = vadd.f32 %v4007_v13, %v6914_v8  ;;  %v2553_v41 = vpop.f32.mrb[15].mxu0  ;;  %vm2599_vm10 = vcmp.gt.f32.partialorder %v2583_v63, 0.0  ;;  %4083 = vmatpush3.bf16.msra.mxu0 %v4314_v50 }
 0x3aa   :  { %v2615_v51 = vmul.f32 %v6916_v39, %v2581_v26  ;;  %v2582_v48 = vadd.f32 %v6914_v8, %v2553_v41  ;;  %vm2597_vm2 = vcmp.gt.f32.partialorder %v2581_v26, 0.0  ;;  %v6954_v8 = vrot.slane %v6909_v31, %v7445_v32 }
 0x3ab   :  { %vm2600_vm5 = vcmp.gt.f32.partialorder %v2584_v4, 0.0  ;;  %v2618_v55 = vmul.f32 %v6916_v39, %v2584_v4  ;;  %v2633_v20 = vsel %vm2599_vm10, %v2583_v63, %v2617_v7  ;;  %v4315_v63 = vld [vmem:[#allocation6 + $0xb0] sm:$0xff]  }
 0x3ac   :  { %vm2598_vm6 = vcmp.gt.f32.partialorder %v2582_v48, 0.0  ;;  %v2616_v3 = vmul.f32 %v6916_v39, %v2582_v48  ;;  %v2631_v57 = vsel %vm2597_vm2, %v2581_v26, %v2615_v51  ;;  %4084 = vmatprep.subr.bf16.mxu0 %v4315_v63 }
 0x3ad   :  { %v2634_v25 = vsel %vm2600_vm5, %v2584_v4, %v2618_v55  ;;  %4085 = vmatpush3.bf16.msra.mxu0 %v4315_v63 }
 0x3ae   :  { %v2632_v5 = vsel %vm2598_vm6, %v2582_v48, %v2616_v3  ;;  %v2642_v49 = vpack.c.bf16 %v2634_v25, %v2633_v20  ;;  %4086 = vmatprep.subr.bf16.mxu0 %v4316_v21 }
 0x3af   :  { %v2641_v16 = vpack.c.bf16 %v2632_v5, %v2631_v57 }
 0x3b1   :  { %4036 = vmatprep.mubr.bf16.mxu1 %v2641_v16  ;;  %4087 = vmatpush3.bf16.msra.mxu0 %v4316_v21 }
 0x3b2   :  { %4037 = vmatmul.mubr.bf16.gmra.mrb[12].mxu1 %v2642_v49 }
 0x3c4   :  { %v4026_v27 = vpop.f32.mrb[0].mxu1 }
 0x3c5   :  { %v2754_v11 = vadd.f32 %v4026_v27, %v6954_v8  ;;  %v2745_v39 = vpop.f32.mrb[1].mxu1 }
 0x3c6   :  { %v2746_v38 = vadd.f32 %v2745_v39, %v6954_v8  ;;  %v4027_v44 = vpop.f32.mrb[2].mxu1 }
 0x3c7   :  { %v2828_v0 = vmul.f32 %v6956_v12, %v2754_v11  ;;  %v2757_v56 = vadd.f32 %v4027_v44, %v6954_v8  ;;  %v2748_v53 = vpop.f32.mrb[3].mxu1  ;;  %vm2810_vm8 = vcmp.gt.f32.partialorder %v2754_v11, 0.0 }
 0x3c8   :  { %v2826_v61 = vmul.f32 %v6956_v12, %v2746_v38  ;;  %v2749_v58 = vadd.f32 %v2748_v53, %v6954_v8  ;;  %vm2808_vm7 = vcmp.gt.f32.partialorder %v2746_v38, 0.0 }
 0x3c9   :  { %vm2811_vm9 = vcmp.gt.f32.partialorder %v2757_v56, 0.0  ;;  %v2829_v9 = vmul.f32 %v6956_v12, %v2757_v56  ;;  %v2844_v47 = vsel %vm2810_vm8, %v2754_v11, %v2828_v0 }
 0x3ca   :  { %vm2809_vm15 = vcmp.gt.f32.partialorder %v2749_v58, 0.0  ;;  %v2827_v19 = vmul.f32 %v6956_v12, %v2749_v58  ;;  %v2842_v10 = vsel %vm2808_vm7, %v2746_v38, %v2826_v61 }
 0x3cb   :  { %v2845_v18 = vsel %vm2811_vm9, %v2757_v56, %v2829_v9 }
 0x3cc   :  { %v2859_v40 = vpack.c.bf16 %v2845_v18, %v2844_v47  ;;  %v4030_v45 = vpop.f32.mrb[4].mxu1  ;;  %v2843_v6 = vsel %vm2809_vm15, %v2749_v58, %v2827_v19 }
 0x3cd   :  { %v2770_v15 = vadd.f32 %v4030_v45, %v6954_v8  ;;  %v2761_v43 = vpop.f32.mrb[5].mxu1  ;;  %v2858_v52 = vpack.c.bf16 %v2843_v6, %v2842_v10 }
 0x3ce   :  { %v2762_v30 = vadd.f32 %v2761_v43, %v6954_v8  ;;  %v4031_v35 = vpop.f32.mrb[6].mxu1 }
 0x3cf   :  { %v2832_v22 = vmul.f32 %v6956_v12, %v2770_v15  ;;  %v2773_v29 = vadd.f32 %v4031_v35, %v6954_v8  ;;  %v2764_v42 = vpop.f32.mrb[7].mxu1  ;;  %4056 = vmatprep.mubr.bf16.mxu1 %v2858_v52  ;;  %vm2814_vm1 = vcmp.gt.f32.partialorder %v2770_v15, 0.0  ;;  %v7446_v52 = vsub.s32 2, %v7442_v1 }
 0x3d0   :  { %v2830_v59 = vmul.f32 %v6956_v12, %v2762_v30  ;;  %v2765_v36 = vadd.f32 %v2764_v42, %v6954_v8  ;;  %4057 = vmatmul.mubr.bf16.vlgmr.msra.gmra.mrb[16].mxu1 %v2859_v40  ;;  %vm2812_vm11 = vcmp.gt.f32.partialorder %v2762_v30, 0.0  ;;  %v6995_v35 = vstv %s3833_s30 }
 0x3d1   :  { %vm2815_vm0 = vcmp.gt.f32.partialorder %v2773_v29, 0.0  ;;  %v2833_v46 = vmul.f32 %v6956_v12, %v2773_v29  ;;  %v2848_v17 = vsel %vm2814_vm1, %v2770_v15, %v2832_v22 }
 0x3d2   :  { %vm2813_vm12 = vcmp.gt.f32.partialorder %v2765_v36, 0.0  ;;  %v2831_v37 = vmul.f32 %v6956_v12, %v2765_v36  ;;  %v2846_v33 = vsel %vm2812_vm11, %v2762_v30, %v2830_v59 }
 0x3d3   :  { %v2849_v14 = vsel %vm2815_vm0, %v2773_v29, %v2833_v46 }
 0x3d4   :  { %v2847_v2 = vsel %vm2813_vm12, %v2765_v36, %v2831_v37  ;;  %v2861_v34 = vpack.c.bf16 %v2849_v14, %v2848_v17 }
 0x3d5   :  { %v2860_v28 = vpack.c.bf16 %v2847_v2, %v2846_v33 }
 0x3d7   :  { %4060 = vmatprep.mubr.bf16.mxu1 %v2860_v28 }
 0x3d8   :  { %4061 = vmatmul.mubr.bf16.gmra.mrb[20].mxu1 %v2861_v34 }
 0x433   :  { %v4034_v26 = vpop.f32.mrb[8].mxu1 }
 0x434   :  { %v2786_v13 = vadd.f32 %v4034_v26, %v6954_v8  ;;  %v2777_v7 = vpop.f32.mrb[9].mxu1 }
 0x435   :  { %v2778_v4 = vadd.f32 %v2777_v7, %v6954_v8  ;;  %v4035_v41 = vpop.f32.mrb[10].mxu1 }
 0x436   :  { %v2836_v51 = vmul.f32 %v6956_v12, %v2786_v13  ;;  %v2789_v48 = vadd.f32 %v4035_v41, %v6954_v8  ;;  %v2780_v55 = vpop.f32.mrb[11].mxu1  ;;  %vm2818_vm14 = vcmp.gt.f32.partialorder %v2786_v13, 0.0 }
 0x437   :  { %v2834_v3 = vmul.f32 %v6956_v12, %v2778_v4  ;;  %v2781_v20 = vadd.f32 %v2780_v55, %v6954_v8  ;;  %vm2816_vm3 = vcmp.gt.f32.partialorder %v2778_v4, 0.0 }
 0x438   :  { %vm2819_vm13 = vcmp.gt.f32.partialorder %v2789_v48, 0.0  ;;  %v2837_v25 = vmul.f32 %v6956_v12, %v2789_v48  ;;  %v2852_v5 = vsel %vm2818_vm14, %v2786_v13, %v2836_v51 }
 0x439   :  { %vm2817_vm10 = vcmp.gt.f32.partialorder %v2781_v20, 0.0  ;;  %v2835_v57 = vmul.f32 %v6956_v12, %v2781_v20  ;;  %v2850_v16 = vsel %vm2816_vm3, %v2778_v4, %v2834_v3 }
 0x43a   :  { %v2853_v49 = vsel %vm2819_vm13, %v2789_v48, %v2837_v25 }
 0x43b   :  { %v2851_v32 = vsel %vm2817_vm10, %v2781_v20, %v2835_v57  ;;  %v2863_v27 = vpack.c.bf16 %v2853_v49, %v2852_v5  ;;  %v4317_v49 = vld [vmem:[#allocation6 + $0xc0] sm:$0xff]  }
 0x43c   :  { %v2862_v11 = vpack.c.bf16 %v2851_v32, %v2850_v16  ;;  %v4318_v16 = vld [vmem:[#allocation6 + $0xc8] sm:$0xff]   ;;  %4104 = vmatprep.subr.bf16.mxu1 %v4317_v49  ;;  %v4319_v32 = vld [vmem:[#allocation6 + $0xd0] sm:$0xff]  }
 0x43d   :  { %4105 = vmatpush3.bf16.msra.mxu1 %v4317_v49 }
 0x43e   :  { %4064 = vmatprep.mubr.bf16.mxu1 %v2862_v11  ;;  %4106 = vmatprep.subr.bf16.mxu1 %v4318_v16  ;;  %v4321_v11 = vld [vmem:[#allocation6 + $0xe0] sm:$0xff]  }
 0x43f   :  { %4065 = vmatmul.mubr.bf16.gmra.mrb[24].mxu1 %v2863_v27  ;;  %v4320_v27 = vld [vmem:[#allocation6 + $0xd8] sm:$0xff]  }
 0x441   :  { %4107 = vmatpush3.bf16.msra.mxu1 %v4318_v16 }
 0x442   :  { %4108 = vmatprep.subr.bf16.mxu1 %v4319_v32 }
 0x445   :  { %4109 = vmatpush3.bf16.msra.mxu1 %v4319_v32 }
 0x446   :  { %4110 = vmatprep.subr.bf16.mxu1 %v4320_v27 }
 0x449   :  { %4111 = vmatpush3.bf16.msra.mxu1 %v4320_v27 }
 0x44a   :  { %4112 = vmatprep.subr.bf16.mxu1 %v4321_v11 }
 0x44d   :  { %4113 = vmatpush3.bf16.msra.mxu1 %v4321_v11 }
 0x485   :  { %v4038_v39 = vpop.f32.mrb[12].mxu1 }
 0x486   :  { %v2802_v38 = vadd.f32 %v4038_v39, %v6954_v8  ;;  %v2793_v44 = vpop.f32.mrb[13].mxu1  ;;  %v4322_v39 = vld [vmem:[#allocation6 + $0xe8] sm:$0xff]  }
 0x487   :  { %v2794_v0 = vadd.f32 %v2793_v44, %v6954_v8  ;;  %v4039_v56 = vpop.f32.mrb[14].mxu1  ;;  %4114 = vmatprep.subr.bf16.mxu1 %v4322_v39  ;;  %v4324_v44 = vld [vmem:[#allocation6 + $0xf8] sm:$0xff]  }
 0x488   :  { %v2840_v53 = vmul.f32 %v6956_v12, %v2802_v38  ;;  %v2805_v61 = vadd.f32 %v4039_v56, %v6954_v8  ;;  %v2796_v58 = vpop.f32.mrb[15].mxu1  ;;  %vm2822_vm2 = vcmp.gt.f32.partialorder %v2802_v38, 0.0  ;;  %4115 = vmatpush3.bf16.msra.mxu1 %v4322_v39 }
 0x489   :  { %v2838_v9 = vmul.f32 %v6956_v12, %v2794_v0  ;;  %v2797_v19 = vadd.f32 %v2796_v58, %v6954_v8  ;;  %vm2820_vm5 = vcmp.gt.f32.partialorder %v2794_v0, 0.0  ;;  %v6993_v8 = vrot.slane %v6909_v31, %v7446_v52 }
 0x48a   :  { %vm2823_vm6 = vcmp.gt.f32.partialorder %v2805_v61, 0.0  ;;  %v2841_v47 = vmul.f32 %v6956_v12, %v2805_v61  ;;  %v2856_v40 = vsel %vm2822_vm2, %v2802_v38, %v2840_v53  ;;  %v4323_v38 = vld [vmem:[#allocation6 + $0xf0] sm:$0xff]  }
 0x48b   :  { %vm2821_vm8 = vcmp.gt.f32.partialorder %v2797_v19, 0.0  ;;  %v2839_v18 = vmul.f32 %v6956_v12, %v2797_v19  ;;  %v2854_v10 = vsel %vm2820_vm5, %v2794_v0, %v2838_v9  ;;  %4116 = vmatprep.subr.bf16.mxu1 %v4323_v38 }
 0x48c   :  { %v2857_v45 = vsel %vm2823_vm6, %v2805_v61, %v2841_v47  ;;  %4117 = vmatpush3.bf16.msra.mxu1 %v4323_v38 }
 0x48d   :  { %v2855_v6 = vsel %vm2821_vm8, %v2797_v19, %v2839_v18  ;;  %v2865_v15 = vpack.c.bf16 %v2857_v45, %v2856_v40  ;;  %4118 = vmatprep.subr.bf16.mxu1 %v4324_v44 }
 0x48e   :  { %v2864_v43 = vpack.c.bf16 %v2855_v6, %v2854_v10 }
 0x490   :  { %4068 = vmatprep.mubr.bf16.mxu1 %v2864_v43  ;;  %4119 = vmatpush3.bf16.msra.mxu1 %v4324_v44 }
 0x491   :  { %4069 = vmatmul.mubr.bf16.gmra.mrb[28].mxu1 %v2865_v15 }
 0x4a3   :  { %v4058_v30 = vpop.f32.mrb[16].mxu1 }
 0x4a4   :  { %v2978_v22 = vadd.f32 %v4058_v30, %v6993_v8  ;;  %v2969_v12 = vpop.f32.mrb[17].mxu1 }
 0x4a5   :  { %v2970_v29 = vadd.f32 %v2969_v12, %v6993_v8  ;;  %v4059_v42 = vpop.f32.mrb[18].mxu1 }
 0x4a6   :  { %v3052_v59 = vmul.f32 %v6995_v35, %v2978_v22  ;;  %v2981_v36 = vadd.f32 %v4059_v42, %v6993_v8  ;;  %v2972_v46 = vpop.f32.mrb[19].mxu1  ;;  %vm3034_vm7 = vcmp.gt.f32.partialorder %v2978_v22, 0.0 }
 0x4a7   :  { %v3050_v37 = vmul.f32 %v6995_v35, %v2970_v29  ;;  %v2973_v17 = vadd.f32 %v2972_v46, %v6993_v8  ;;  %vm3032_vm9 = vcmp.gt.f32.partialorder %v2970_v29, 0.0 }
 0x4a8   :  { %vm3035_vm15 = vcmp.gt.f32.partialorder %v2981_v36, 0.0  ;;  %v3053_v14 = vmul.f32 %v6995_v35, %v2981_v36  ;;  %v3068_v2 = vsel %vm3034_vm7, %v2978_v22, %v3052_v59 }
 0x4a9   :  { %vm3033_vm1 = vcmp.gt.f32.partialorder %v2973_v17, 0.0  ;;  %v3051_v33 = vmul.f32 %v6995_v35, %v2973_v17  ;;  %v3066_v24 = vsel %vm3032_vm9, %v2970_v29, %v3050_v37 }
 0x4aa   :  { %v3069_v34 = vsel %vm3035_vm15, %v2981_v36, %v3053_v14 }
 0x4ab   :  { %v3083_v28 = vpack.c.bf16 %v3069_v34, %v3068_v2  ;;  %v4062_v60 = vpop.f32.mrb[20].mxu1  ;;  %v3067_v62 = vsel %vm3033_vm1, %v2973_v17, %v3051_v33 }
 0x4ac   :  { %v2994_v54 = vadd.f32 %v4062_v60, %v6993_v8  ;;  %v2985_v23 = vpop.f32.mrb[21].mxu1  ;;  %v3082_v50 = vpack.c.bf16 %v3067_v62, %v3066_v24 }
 0x4ad   :  { %v2986_v63 = vadd.f32 %v2985_v23, %v6993_v8  ;;  %v4063_v21 = vpop.f32.mrb[22].mxu1 }
 0x4ae   :  { %v3056_v26 = vmul.f32 %v6995_v35, %v2994_v54  ;;  %v2997_v13 = vadd.f32 %v4063_v21, %v6993_v8  ;;  %v2988_v7 = vpop.f32.mrb[23].mxu1  ;;  %4088 = vmatprep.mubr.bf16.mxu0 %v3082_v50  ;;  %vm3038_vm11 = vcmp.gt.f32.partialorder %v2994_v54, 0.0  ;;  %v7447_v50 = vsub.s32 3, %v7442_v1 }
 0x4af   :  { %v3054_v4 = vmul.f32 %v6995_v35, %v2986_v63  ;;  %v2989_v41 = vadd.f32 %v2988_v7, %v6993_v8  ;;  %4089 = vmatmul.mubr.bf16.vlgmr.msra.gmra.mrb[16].mxu0 %v3083_v28  ;;  %vm3036_vm0 = vcmp.gt.f32.partialorder %v2986_v63, 0.0  ;;  %v7034_v21 = vstv %s3842_s15 }
 0x4b0   :  { %vm3039_vm12 = vcmp.gt.f32.partialorder %v2997_v13, 0.0  ;;  %v3057_v51 = vmul.f32 %v6995_v35, %v2997_v13  ;;  %v3072_v55 = vsel %vm3038_vm11, %v2994_v54, %v3056_v26 }
 0x4b1   :  { %vm3037_vm14 = vcmp.gt.f32.partialorder %v2989_v41, 0.0  ;;  %v3055_v48 = vmul.f32 %v6995_v35, %v2989_v41  ;;  %v3070_v20 = vsel %vm3036_vm0, %v2986_v63, %v3054_v4 }
 0x4b2   :  { %v3073_v3 = vsel %vm3039_vm12, %v2997_v13, %v3057_v51 }
 0x4b3   :  { %v3071_v25 = vsel %vm3037_vm14, %v2989_v41, %v3055_v48  ;;  %v3085_v57 = vpack.c.bf16 %v3073_v3, %v3072_v55 }
 0x4b4   :  { %v3084_v5 = vpack.c.bf16 %v3071_v25, %v3070_v20 }
 0x4b6   :  { %4092 = vmatprep.mubr.bf16.mxu0 %v3084_v5 }
 0x4b7   :  { %4093 = vmatmul.mubr.bf16.gmra.mrb[20].mxu0 %v3085_v57 }
 0x512   :  { %v4066_v0 = vpop.f32.mrb[24].mxu1 }
 0x513   :  { %v3010_v56 = vadd.f32 %v4066_v0, %v6993_v8  ;;  %v3001_v53 = vpop.f32.mrb[25].mxu1 }
 0x514   :  { %v3002_v61 = vadd.f32 %v3001_v53, %v6993_v8  ;;  %v4067_v58 = vpop.f32.mrb[26].mxu1 }
 0x515   :  { %v3060_v9 = vmul.f32 %v6995_v35, %v3010_v56  ;;  %v3013_v19 = vadd.f32 %v4067_v58, %v6993_v8  ;;  %v3004_v47 = vpop.f32.mrb[27].mxu1  ;;  %vm3042_vm3 = vcmp.gt.f32.partialorder %v3010_v56, 0.0 }
 0x516   :  { %v3058_v18 = vmul.f32 %v6995_v35, %v3002_v61  ;;  %v3005_v40 = vadd.f32 %v3004_v47, %v6993_v8  ;;  %vm3040_vm13 = vcmp.gt.f32.partialorder %v3002_v61, 0.0 }
 0x517   :  { %vm3043_vm10 = vcmp.gt.f32.partialorder %v3013_v19, 0.0  ;;  %v3061_v45 = vmul.f32 %v6995_v35, %v3013_v19  ;;  %v3076_v6 = vsel %vm3042_vm3, %v3010_v56, %v3060_v9 }
 0x518   :  { %vm3041_vm2 = vcmp.gt.f32.partialorder %v3005_v40, 0.0  ;;  %v3059_v10 = vmul.f32 %v6995_v35, %v3005_v40  ;;  %v3074_v43 = vsel %vm3040_vm13, %v3002_v61, %v3058_v18 }
 0x519   :  { %v3077_v15 = vsel %vm3043_vm10, %v3013_v19, %v3061_v45 }
 0x51a   :  { %v3075_v52 = vsel %vm3041_vm2, %v3005_v40, %v3059_v10  ;;  %v3087_v30 = vpack.c.bf16 %v3077_v15, %v3076_v6 }
 0x51b   :  { %v3086_v22 = vpack.c.bf16 %v3075_v52, %v3074_v43 }
 0x51d   :  { %4096 = vmatprep.mubr.bf16.mxu0 %v3086_v22 }
 0x51e   :  { %4097 = vmatmul.mubr.bf16.gmra.mrb[24].mxu0 %v3087_v30 }
 0x564   :  { %v4070_v12 = vpop.f32.mrb[28].mxu1 }
 0x565   :  { %v3026_v29 = vadd.f32 %v4070_v12, %v6993_v8  ;;  %v3017_v42 = vpop.f32.mrb[29].mxu1 }
 0x566   :  { %v3018_v59 = vadd.f32 %v3017_v42, %v6993_v8  ;;  %v4071_v36 = vpop.f32.mrb[30].mxu1 }
 0x567   :  { %v3064_v46 = vmul.f32 %v6995_v35, %v3026_v29  ;;  %v3029_v37 = vadd.f32 %v4071_v36, %v6993_v8  ;;  %v3020_v17 = vpop.f32.mrb[31].mxu1  ;;  %vm3046_vm5 = vcmp.gt.f32.partialorder %v3026_v29, 0.0 }
 0x568   :  { %v3062_v14 = vmul.f32 %v6995_v35, %v3018_v59  ;;  %v3021_v33 = vadd.f32 %v3020_v17, %v6993_v8  ;;  %vm3044_vm6 = vcmp.gt.f32.partialorder %v3018_v59, 0.0  ;;  %v7032_v8 = vrot.slane %v6909_v31, %v7447_v50 }
 0x569   :  { %vm3047_vm8 = vcmp.gt.f32.partialorder %v3029_v37, 0.0  ;;  %v3065_v2 = vmul.f32 %v6995_v35, %v3029_v37  ;;  %v3080_v28 = vsel %vm3046_vm5, %v3026_v29, %v3064_v46 }
 0x56a   :  { %vm3045_vm7 = vcmp.gt.f32.partialorder %v3021_v33, 0.0  ;;  %v3063_v34 = vmul.f32 %v6995_v35, %v3021_v33  ;;  %v3078_v24 = vsel %vm3044_vm6, %v3018_v59, %v3062_v14 }
 0x56b   :  { %v3081_v60 = vsel %vm3047_vm8, %v3029_v37, %v3065_v2 }
 0x56c   :  { %v3079_v62 = vsel %vm3045_vm7, %v3021_v33, %v3063_v34  ;;  %v3089_v54 = vpack.c.bf16 %v3081_v60, %v3080_v28 }
 0x56d   :  { %v3088_v23 = vpack.c.bf16 %v3079_v62, %v3078_v24 }
 0x56f   :  { %4100 = vmatprep.mubr.bf16.mxu0 %v3088_v23 }
 0x570   :  { %4101 = vmatmul.mubr.bf16.gmra.mrb[28].mxu0 %v3089_v54 }
 0x582   :  { %v4090_v63 = vpop.f32.mrb[16].mxu0 }
 0x583   :  { %v3202_v26 = vadd.f32 %v4090_v63, %v7032_v8  ;;  %v3193_v35 = vpop.f32.mrb[17].mxu0 }
 0x584   :  { %v3194_v13 = vadd.f32 %v3193_v35, %v7032_v8  ;;  %v4091_v7 = vpop.f32.mrb[18].mxu0 }
 0x585   :  { %v3276_v4 = vmul.f32 %v7034_v21, %v3202_v26  ;;  %v3205_v41 = vadd.f32 %v4091_v7, %v7032_v8  ;;  %v3196_v51 = vpop.f32.mrb[19].mxu0  ;;  %vm3258_vm9 = vcmp.gt.f32.partialorder %v3202_v26, 0.0 }
 0x586   :  { %v3274_v48 = vmul.f32 %v7034_v21, %v3194_v13  ;;  %v3197_v55 = vadd.f32 %v3196_v51, %v7032_v8  ;;  %vm3256_vm15 = vcmp.gt.f32.partialorder %v3194_v13, 0.0 }
 0x587   :  { %vm3259_vm1 = vcmp.gt.f32.partialorder %v3205_v41, 0.0  ;;  %v3277_v3 = vmul.f32 %v7034_v21, %v3205_v41  ;;  %v3292_v25 = vsel %vm3258_vm9, %v3202_v26, %v3276_v4 }
 0x588   :  { %vm3257_vm11 = vcmp.gt.f32.partialorder %v3197_v55, 0.0  ;;  %v3275_v20 = vmul.f32 %v7034_v21, %v3197_v55  ;;  %v3290_v16 = vsel %vm3256_vm15, %v3194_v13, %v3274_v48 }
 0x589   :  { %v3293_v57 = vsel %vm3259_vm1, %v3205_v41, %v3277_v3 }
 0x58a   :  { %v3307_v5 = vpack.c.bf16 %v3293_v57, %v3292_v25  ;;  %v4094_v49 = vpop.f32.mrb[20].mxu0  ;;  %v3291_v32 = vsel %vm3257_vm11, %v3197_v55, %v3275_v20  ;;  %v3333_v25 = vsub.s32 4, %v7442_v1 }
 0x58b   :  { %v3218_v27 = vadd.f32 %v4094_v49, %v7032_v8  ;;  %v3209_v11 = vpop.f32.mrb[21].mxu0  ;;  %v3306_v39 = vpack.c.bf16 %v3291_v32, %v3290_v16 }
 0x58c   :  { %v3210_v38 = vadd.f32 %v3209_v11, %v7032_v8  ;;  %v4095_v44 = vpop.f32.mrb[22].mxu0 }
 0x58d   :  { %v3280_v0 = vmul.f32 %v7034_v21, %v3218_v27  ;;  %v3221_v56 = vadd.f32 %v4095_v44, %v7032_v8  ;;  %v3212_v53 = vpop.f32.mrb[23].mxu0  ;;  %4120 = vmatprep.mubr.bf16.mxu1 %v3306_v39  ;;  %vm3262_vm0 = vcmp.gt.f32.partialorder %v3218_v27, 0.0 }
 0x58e   :  { %v3278_v61 = vmul.f32 %v7034_v21, %v3210_v38  ;;  %v3213_v58 = vadd.f32 %v3212_v53, %v7032_v8  ;;  %4121 = vmatmul.mubr.bf16.vlgmr.msra.gmra.mrb[32].mxu1 %v3307_v5  ;;  %vm3260_vm12 = vcmp.gt.f32.partialorder %v3210_v38, 0.0  ;;  %v7072_v5 = vstv %s3851_s16 }
 0x58f   :  { %vm3263_vm14 = vcmp.gt.f32.partialorder %v3221_v56, 0.0  ;;  %v3281_v9 = vmul.f32 %v7034_v21, %v3221_v56  ;;  %v3296_v47 = vsel %vm3262_vm0, %v3218_v27, %v3280_v0 }
 0x590   :  { %vm3261_vm3 = vcmp.gt.f32.partialorder %v3213_v58, 0.0  ;;  %v3279_v19 = vmul.f32 %v7034_v21, %v3213_v58  ;;  %v3294_v40 = vsel %vm3260_vm12, %v3210_v38, %v3278_v61 }
 0x591   :  { %v3297_v18 = vsel %vm3263_vm14, %v3221_v56, %v3281_v9 }
 0x592   :  { %v3295_v45 = vsel %vm3261_vm3, %v3213_v58, %v3279_v19  ;;  %v3309_v10 = vpack.c.bf16 %v3297_v18, %v3296_v47 }
 0x593   :  { %v3308_v6 = vpack.c.bf16 %v3295_v45, %v3294_v40 }
 0x595   :  { %4124 = vmatprep.mubr.bf16.mxu1 %v3308_v6 }
 0x596   :  { %4125 = vmatmul.mubr.bf16.gmra.mrb[36].mxu1 %v3309_v10 }
 0x5f1   :  { %v4098_v15 = vpop.f32.mrb[24].mxu0 }
 0x5f2   :  { %v3234_v43 = vadd.f32 %v4098_v15, %v7032_v8  ;;  %v3225_v52 = vpop.f32.mrb[25].mxu0 }
 0x5f3   :  { %v3226_v30 = vadd.f32 %v3225_v52, %v7032_v8  ;;  %v4099_v22 = vpop.f32.mrb[26].mxu0 }
 0x5f4   :  { %v3284_v12 = vmul.f32 %v7034_v21, %v3234_v43  ;;  %v3237_v29 = vadd.f32 %v4099_v22, %v7032_v8  ;;  %v3228_v42 = vpop.f32.mrb[27].mxu0  ;;  %vm3266_vm13 = vcmp.gt.f32.partialorder %v3234_v43, 0.0 }
 0x5f5   :  { %v3282_v59 = vmul.f32 %v7034_v21, %v3226_v30  ;;  %v3229_v36 = vadd.f32 %v3228_v42, %v7032_v8  ;;  %vm3264_vm10 = vcmp.gt.f32.partialorder %v3226_v30, 0.0 }
 0x5f6   :  { %vm3267_vm2 = vcmp.gt.f32.partialorder %v3237_v29, 0.0  ;;  %v3285_v46 = vmul.f32 %v7034_v21, %v3237_v29  ;;  %v3300_v17 = vsel %vm3266_vm13, %v3234_v43, %v3284_v12 }
 0x5f7   :  { %vm3265_vm5 = vcmp.gt.f32.partialorder %v3229_v36, 0.0  ;;  %v3283_v37 = vmul.f32 %v7034_v21, %v3229_v36  ;;  %v3298_v33 = vsel %vm3264_vm10, %v3226_v30, %v3282_v59 }
 0x5f8   :  { %v3301_v14 = vsel %vm3267_vm2, %v3237_v29, %v3285_v46 }
 0x5f9   :  { %v3299_v2 = vsel %vm3265_vm5, %v3229_v36, %v3283_v37  ;;  %v3311_v34 = vpack.c.bf16 %v3301_v14, %v3300_v17 }
 0x5fa   :  { %v3310_v28 = vpack.c.bf16 %v3299_v2, %v3298_v33 }
 0x5fc   :  { %4128 = vmatprep.mubr.bf16.mxu1 %v3310_v28 }
 0x5fd   :  { %4129 = vmatmul.mubr.bf16.gmra.mrb[40].mxu1 %v3311_v34 }
 0x643   :  { %v4102_v60 = vpop.f32.mrb[28].mxu0 }
 0x644   :  { %v3250_v24 = vadd.f32 %v4102_v60, %v7032_v8  ;;  %v3241_v62 = vpop.f32.mrb[29].mxu0 }
 0x645   :  { %v3242_v54 = vadd.f32 %v3241_v62, %v7032_v8  ;;  %v4103_v23 = vpop.f32.mrb[30].mxu0 }
 0x646   :  { %v3288_v50 = vmul.f32 %v7034_v21, %v3250_v24  ;;  %v3253_v63 = vadd.f32 %v4103_v23, %v7032_v8  ;;  %v3244_v26 = vpop.f32.mrb[31].mxu0  ;;  %vm3270_vm6 = vcmp.gt.f32.partialorder %v3250_v24, 0.0 }
 0x647   :  { %v3286_v35 = vmul.f32 %v7034_v21, %v3242_v54  ;;  %v3245_v13 = vadd.f32 %v3244_v26, %v7032_v8  ;;  %vm3268_vm8 = vcmp.gt.f32.partialorder %v3242_v54, 0.0  ;;  %v7070_v8 = vrot.slane %v6909_v31, %v3333_v25 }
 0x648   :  { %vm3271_vm7 = vcmp.gt.f32.partialorder %v3253_v63, 0.0  ;;  %v3289_v7 = vmul.f32 %v7034_v21, %v3253_v63  ;;  %v3304_v41 = vsel %vm3270_vm6, %v3250_v24, %v3288_v50  ;;  %v4494_v50 = vmov 0.0  }
 0x649   :  { %vm3269_vm9 = vcmp.gt.f32.partialorder %v3245_v13, 0.0  ;;  %v3287_v4 = vmul.f32 %v7034_v21, %v3245_v13  ;;  %v3302_v48 = vsel %vm3268_vm8, %v3242_v54, %v3286_v35  ;;  %4144 = vmatprep.subr.bf16.mxu1 %v4494_v50  ;;  %4136 = vmatprep.subr.bf16.mxu0 %v4494_v50 }
 0x64a   :  { %v3305_v51 = vsel %vm3271_vm7, %v3253_v63, %v3289_v7  ;;  %v3586_v63 = vpop.trf.xlu0 }
 0x64b   :  { %v3303_v55 = vsel %vm3269_vm9, %v3245_v13, %v3287_v4  ;;  %v3313_v3 = vpack.c.bf16 %v3305_v51, %v3304_v41 }
 0x64c   :  { %v3312_v20 = vpack.c.bf16 %v3303_v55, %v3302_v48 }
 0x64e   :  { %4132 = vmatprep.mubr.bf16.mxu1 %v3312_v20  ;;  %v3587_v26 = vpop.trf.xlu0 }
 0x64f   :  { %4133 = vmatmul.mubr.bf16.gmra.mrb[44].mxu1 %v3313_v3  ;;  %v3602_v35 = vpack.c.bf16 %v3587_v26, %v3586_v63 }
 0x651   :  { %4137 = vmatpush3.bf16.msra.mxu0 %v3602_v35  ;;  %v3706_v35 = vld [vmem:[%s7133_s2] sm:$0xf] }
 0x652   :  { %4138 = vmatprep.subr.bf16.mxu0 %v4494_v50  ;;  %v3588_v13 = vpop.trf.xlu0 }
 0x656   :  { %v3589_v48 = vpop.trf.xlu0 }
 0x657   :  { %v3603_v3 = vpack.c.bf16 %v3589_v48, %v3588_v13 }
 0x659   :  { %4139 = vmatpush3.bf16.msra.mxu0 %v3603_v3 }
 0x661   :  { %v4122_v57 = vpop.f32.mrb[32].mxu1 }
 0x662   :  { %v3417_v49 = vpop.f32.mrb[33].mxu1  ;;  %v3426_v39 = vadd.f32 %v4122_v57, %v7070_v8 }
 0x663   :  { %v3418_v21 = vadd.f32 %v3417_v49, %v7070_v8  ;;  %v4123_v16 = vpop.f32.mrb[34].mxu1 }
 0x664   :  { %v3420_v32 = vpop.f32.mrb[35].mxu1  ;;  %v3500_v0 = vmul.f32 %v7072_v5, %v3426_v39  ;;  %v3429_v56 = vadd.f32 %v4123_v16, %v7070_v8  ;;  %vm3482_vm11 = vcmp.gt.f32.partialorder %v3426_v39, 0.0 }
 0x665   :  { %vm3480_vm15 = vcmp.gt.f32.partialorder %v3418_v21, 0.0  ;;  %v3498_v27 = vmul.f32 %v7072_v5, %v3418_v21  ;;  %v3421_v11 = vadd.f32 %v3420_v32, %v7070_v8 }
 0x666   :  { %v3501_v9 = vmul.f32 %v7072_v5, %v3429_v56  ;;  %v3516_v47 = vsel %vm3482_vm11, %v3426_v39, %v3500_v0  ;;  %vm3483_vm0 = vcmp.gt.f32.partialorder %v3429_v56, 0.0 }
 0x667   :  { %v3499_v1 = vmul.f32 %v7072_v5, %v3421_v11  ;;  %v3514_v38 = vsel %vm3480_vm15, %v3418_v21, %v3498_v27  ;;  %vm3481_vm1 = vcmp.gt.f32.partialorder %v3421_v11, 0.0 }
 0x668   :  { %3530 = vxpose.xlu1.b32.start [1/16] %v3514_v38, 128  ;;  %v3517_v45 = vsel %vm3483_vm0, %v3429_v56, %v3501_v9  ;;  %v3605_v38 = vld [vmem:[#allocation8] sm:$0xf] }
 0x669   :  { %v4126_v31 = vpop.f32.mrb[36].mxu1  ;;  %v3515_v61 = vsel %vm3481_vm1, %v3421_v11, %v3499_v1  ;;  %vm4495_vm1 = vmmov 0  }
 0x66a   :  { %v3433_v44 = vpop.f32.mrb[37].mxu1  ;;  %v3442_v10 = vadd.f32 %v4126_v31, %v7070_v8  ;;  %4140 = vmatprep.mubr.msk.bf16.mxu0 %vm4495_vm1, %v4494_v50  ;;  %4160 = vmatprep.mubr.msk.bf16.mxu1 %vm4495_vm1, %v4494_v50 }
 0x66b   :  { %v4127_v53 = vpop.f32.mrb[38].mxu1  ;;  %v3434_v19 = vadd.f32 %v3433_v44, %v7070_v8  ;;  %4141 = vmatmul.mubr.msk.bf16.vlgmr.msra.gmra.mrb[32].mxu0 %vm2443_vm4, %v3605_v38 }
 0x66c   :  { %v3436_v58 = vpop.f32.mrb[39].mxu1  ;;  %3531 = vxpose.xlu1.b32.cont [2/16] %v3515_v61, 128  ;;  %v3504_v43 = vmul.f32 %v7072_v5, %v3442_v10  ;;  %v3445_v52 = vadd.f32 %v4127_v53, %v7070_v8  ;;  %vm3486_vm3 = vcmp.gt.f32.partialorder %v3442_v10, 0.0 }
 0x66d   :  { %v3502_v18 = vmul.f32 %v7072_v5, %v3434_v19  ;;  %v3437_v40 = vadd.f32 %v3436_v58, %v7070_v8  ;;  %vm3484_vm12 = vcmp.gt.f32.partialorder %v3434_v19, 0.0 }
 0x66e   :  { %v3505_v22 = vmul.f32 %v7072_v5, %v3445_v52  ;;  %v3520_v12 = vsel %vm3486_vm3, %v3442_v10, %v3504_v43  ;;  %vm3487_vm13 = vcmp.gt.f32.partialorder %v3445_v52, 0.0 }
 0x66f   :  { %v3503_v6 = vmul.f32 %v7072_v5, %v3437_v40  ;;  %v3518_v15 = vsel %vm3484_vm12, %v3434_v19, %v3502_v18  ;;  %vm3485_vm14 = vcmp.gt.f32.partialorder %v3437_v40, 0.0 }
 0x670   :  { %3532 = vxpose.xlu1.b32.cont [3/16] %v3516_v47, 128  ;;  %v3521_v29 = vsel %vm3487_vm13, %v3445_v52, %v3505_v22 }
 0x671   :  { %v3519_v30 = vsel %vm3485_vm14, %v3437_v40, %v3503_v6 }
 0x674   :  { %3533 = vxpose.xlu1.b32.cont [4/16] %v3517_v45, 128 }
 0x678   :  { %3534 = vxpose.xlu1.b32.cont [5/16] %v3518_v15, 128 }
 0x67c   :  { %3535 = vxpose.xlu1.b32.cont [6/16] %v3519_v30, 128 }
 0x680   :  { %3536 = vxpose.xlu1.b32.cont [7/16] %v3520_v12, 128 }
 0x684   :  { %3537 = vxpose.xlu1.b32.cont [8/16] %v3521_v29, 128 }
 0x6d0   :  { %v4130_v42 = vpop.f32.mrb[40].mxu1 }
 0x6d1   :  { %v3449_v59 = vpop.f32.mrb[41].mxu1  ;;  %v3458_v33 = vadd.f32 %v4130_v42, %v7070_v8 }
 0x6d2   :  { %v3450_v36 = vadd.f32 %v3449_v59, %v7070_v8  ;;  %v4131_v46 = vpop.f32.mrb[42].mxu1  ;;  %v3604_v59 = vld [vmem:[%s7141_s10] sm:$0xf] }
 0x6d3   :  { %v3452_v37 = vpop.f32.mrb[43].mxu1  ;;  %v3508_v28 = vmul.f32 %v7072_v5, %v3458_v33  ;;  %v3461_v60 = vadd.f32 %v4131_v46, %v7070_v8  ;;  %vm3490_vm5 = vcmp.gt.f32.partialorder %v3458_v33, 0.0 }
 0x6d4   :  { %vm3488_vm10 = vcmp.gt.f32.partialorder %v3450_v36, 0.0  ;;  %v3506_v17 = vmul.f32 %v7072_v5, %v3450_v36  ;;  %v3453_v14 = vadd.f32 %v3452_v37, %v7070_v8 }
 0x6d5   :  { %v3509_v62 = vmul.f32 %v7072_v5, %v3461_v60  ;;  %v3524_v54 = vsel %vm3490_vm5, %v3458_v33, %v3508_v28  ;;  %vm3491_vm6 = vcmp.gt.f32.partialorder %v3461_v60, 0.0 }
 0x6d6   :  { %v3507_v2 = vmul.f32 %v7072_v5, %v3453_v14  ;;  %v3522_v34 = vsel %vm3488_vm10, %v3450_v36, %v3506_v17  ;;  %vm3489_vm2 = vcmp.gt.f32.partialorder %v3453_v14, 0.0 }
 0x6d7   :  { %3538 = vxpose.xlu1.b32.cont [9/16] %v3522_v34, 128  ;;  %v3525_v23 = vsel %vm3491_vm6, %v3461_v60, %v3509_v62 }
 0x6d8   :  { %v3523_v24 = vsel %vm3489_vm2, %v3453_v14, %v3507_v2 }
 0x6db   :  { %3539 = vxpose.xlu1.b32.cont [10/16] %v3523_v24, 128 }
 0x6df   :  { %3540 = vxpose.xlu1.b32.cont [11/16] %v3524_v54, 128 }
 0x6e3   :  { %3541 = vxpose.xlu1.b32.cont [12/16] %v3525_v23, 128 }
 0x722   :  { %v4134_v7 = vpop.f32.mrb[44].mxu1 }
 0x723   :  { %v3465_v4 = vpop.f32.mrb[45].mxu1  ;;  %v3474_v57 = vadd.f32 %v4134_v7, %v7070_v8 }
 0x724   :  { %v3466_v41 = vadd.f32 %v3465_v4, %v7070_v8  ;;  %v4135_v51 = vpop.f32.mrb[46].mxu1 }
 0x725   :  { %v3468_v55 = vpop.f32.mrb[47].mxu1  ;;  %v3512_v16 = vmul.f32 %v7072_v5, %v3474_v57  ;;  %v3477_v32 = vadd.f32 %v4135_v51, %v7070_v8  ;;  %vm3494_vm9 = vcmp.gt.f32.partialorder %v3474_v57, 0.0 }
 0x726   :  { %vm3492_vm8 = vcmp.gt.f32.partialorder %v3466_v41, 0.0  ;;  %v3510_v20 = vmul.f32 %v7072_v5, %v3466_v41  ;;  %v3469_v25 = vadd.f32 %v3468_v55, %v7070_v8  ;;  %v3689_v8 = vld [vmem:[%s7143_s12] sm:$0xff] }
 0x727   :  { %v3513_v11 = vmul.f32 %v7072_v5, %v3477_v32  ;;  %v3528_v39 = vsel %vm3494_vm9, %v3474_v57, %v3512_v16  ;;  %vm3495_vm15 = vcmp.gt.f32.partialorder %v3477_v32, 0.0  ;;  %3692 = vperm.xlu0 %4282, %v3689_v8  }
 0x728   :  { %v3511_v49 = vmul.f32 %v7072_v5, %v3469_v25  ;;  %v3526_v21 = vsel %vm3492_vm8, %v3466_v41, %v3510_v20  ;;  %vm3493_vm7 = vcmp.gt.f32.partialorder %v3469_v25, 0.0 }
 0x729   :  { %3542 = vxpose.xlu1.b32.cont [13/16] %v3526_v21, 128  ;;  %v3529_v1 = vsel %vm3495_vm15, %v3477_v32, %v3513_v11 }
 0x72a   :  { %v3527_v27 = vsel %vm3493_vm7, %v3469_v25, %v3511_v49 }
 0x72d   :  { %3543 = vxpose.xlu1.b32.cont [14/16] %v3527_v27, 128 }
 0x731   :  { %3544 = vxpose.xlu1.b32.cont [15/16] %v3528_v39, 128 }
 0x735   :  { %3545 = vxpose.xlu1.b32.end [16/16] %v3529_v1, 128 }
 0x73e   :  { %v3643_v36 = vpop.f32.mrb[32].mxu0 }
 0x73f   :  { %v4142_v46 = vpop.f32.mrb[33].mxu0 }
 0x740   :  { %v3646_v37 = vpop.f32.mrb[34].mxu0 }
 0x741   :  { %v4143_v17 = vpop.f32.mrb[35].mxu0 }
 0x779   :  { %v3546_v31 = vpop.trf.xlu1 }
 0x77d   :  { %v3547_v5 = vpop.trf.xlu1 }
 0x77e   :  { %v3562_v44 = vpack.c.bf16 %v3547_v5, %v3546_v31 }
 0x780   :  { %4145 = vmatpush3.bf16.msra.mxu1 %v3562_v44 }
 0x781   :  { %v3548_v0 = vpop.trf.xlu1  ;;  %4146 = vmatprep.subr.bf16.mxu1 %v4494_v50 }
 0x785   :  { %v3549_v56 = vpop.trf.xlu1 }
 0x786   :  { %v3563_v53 = vpack.c.bf16 %v3549_v56, %v3548_v0 }
 0x788   :  { %4147 = vmatpush3.bf16.msra.mxu1 %v3563_v53 }
 0x789   :  { %v3550_v61 = vpop.trf.xlu1  ;;  %4148 = vmatprep.subr.bf16.mxu1 %v4494_v50 }
 0x78d   :  { %v3551_v58 = vpop.trf.xlu1 }
 0x78e   :  { %v3564_v9 = vpack.c.bf16 %v3551_v58, %v3550_v61 }
 0x790   :  { %4149 = vmatpush3.bf16.msra.mxu1 %v3564_v9 }
 0x791   :  { %v3552_v19 = vpop.trf.xlu1  ;;  %4150 = vmatprep.subr.bf16.mxu1 %v4494_v50 }
 0x795   :  { %v3553_v47 = vpop.trf.xlu1 }
 0x796   :  { %v3565_v18 = vpack.c.bf16 %v3553_v47, %v3552_v19 }
 0x798   :  { %4151 = vmatpush3.bf16.msra.mxu1 %v3565_v18 }
 0x799   :  { %v3554_v40 = vpop.trf.xlu1  ;;  %4152 = vmatprep.subr.bf16.mxu1 %v4494_v50 }
 0x79d   :  { %v3555_v45 = vpop.trf.xlu1 }
 0x79e   :  { %v3566_v10 = vpack.c.bf16 %v3555_v45, %v3554_v40 }
 0x7a0   :  { %4153 = vmatpush3.bf16.msra.mxu1 %v3566_v10 }
 0x7a1   :  { %v3556_v6 = vpop.trf.xlu1  ;;  %4154 = vmatprep.subr.bf16.mxu1 %v4494_v50 }
 0x7a5   :  { %v3557_v15 = vpop.trf.xlu1 }
 0x7a6   :  { %v3567_v43 = vpack.c.bf16 %v3557_v15, %v3556_v6  ;;  %v3693_v33 = vpop.permute.xlu0 %3692 }
 0x7a8   :  { %4155 = vmatpush3.bf16.msra.mxu1 %v3567_v43 }
 0x7a9   :  { %v3558_v52 = vpop.trf.xlu1  ;;  %4156 = vmatprep.subr.bf16.mxu1 %v4494_v50 }
 0x7ad   :  { %v3559_v30 = vpop.trf.xlu1 }
 0x7ae   :  { %v3568_v22 = vpack.c.bf16 %v3559_v30, %v3558_v52 }
 0x7b0   :  { %4157 = vmatpush3.bf16.msra.mxu1 %v3568_v22 }
 0x7b1   :  { %v3560_v12 = vpop.trf.xlu1  ;;  %4158 = vmatprep.subr.bf16.mxu1 %v4494_v50 }
 0x7b5   :  { %v3561_v29 = vpop.trf.xlu1 }
 0x7b6   :  { %v3569_v42 = vpack.c.bf16 %v3561_v29, %v3560_v12 }
 0x7b8   :  { %4159 = vmatpush3.bf16.msra.mxu1 %v3569_v42 }
 0x7bb   :  { %4161 = vmatmul.mubr.bf16.vlgmr.msra.gmra.mrb[48].mxu1 %v3604_v59 }
 0x88e   :  { %v3683_v14 = vpop.f32.mrb[48].mxu1 }
 0x88f   :  { %v3684_v2 = vadd.f32 %v3683_v14, %v3643_v36  ;;  %v4162_v34 = vpop.f32.mrb[49].mxu1 }
 0x890   :  { %v3686_v28 = vpop.f32.mrb[50].mxu1 }
 0x891   :  { %v3695_v60 = vadd.f32 %v3693_v33, %v3684_v2  ;;  %v4163_v24 = vpop.f32.mrb[51].mxu1 }
 0x893   :  { %v3853_v62 = vmul.f32 -1.442695, %v3695_v60 }
 0x895   :  { %4389 = vpow2.f32 %v3853_v62 }
 0x89f   :  { %v4390_v54 = vpop.eup %4389 }
 0x8a0   :  { %v3699_v23 = vadd.f32 1.0, %v4390_v54 }
 0x8a2   :  { %4391 = vrcp.f32 %v3699_v23 }
 0x8ac   :  { %v4392_v50 = vpop.eup %4391 }
 0x8ad   :  { %v3703_v63 = vrot.slane %v4392_v50, 4 }
 0x8af   :  { %v3705_v26 = vmul.f32 %v3703_v63, %v3695_v60 }
 0x8b1   :  { %v3707_v13 = vadd.f32 1.0, %v3705_v26 }
 0x8b3   :  { %v3708_v7 = vmul.f32 %v3707_v13, %v3706_v35 }
 0x8b5   :  { %3709 = vst [vmem:[%s7144_s13] sm:$0xf] %v3708_v7 }
 0x8b6   :  { %3714 = vsyncpa [#allocation3], 1 }
 0x8b7   :  { %3715 = vsyncpa [#allocation7], 1 }
 0x8b8   :  { %3716 = vsyncpa [#allocation4], 1 }

</bundles_post_ra>
